<compile_context>
chip_gen: v7x
topology: tpu7x:2x2x1
jax: 0.10.0
libtpu: 0.0.40
codegen_flags: <defaults>
</compile_context>

<pallas_src>
import jax
import jax.numpy as jnp
from jax.experimental import pallas as pl
from jax.experimental.pallas import tpu as pltpu

LN_EPS = 1e-5  # nn.LayerNorm default eps


def _layer_norm(x, gamma, beta):
    # x: (rows, C); LayerNorm over the channel (last / lane) axis.
    mean = jnp.mean(x, axis=-1, keepdims=True)
    var = jnp.mean(jnp.square(x - mean), axis=-1, keepdims=True)
    return (x - mean) * jax.lax.rsqrt(var + LN_EPS) * gamma + beta


# --------------------------- fused encoder kernel ---------------------------
def _encoder_kernel(*args):
    # args = [x_ref, w0, vec0, (dwd, pw, cvec, w1, w2, fvec) x L, o_ref]
    x_ref, o_ref = args[0], args[-1]
    BB, T, Cin = x_ref.shape
    num_layers = (len(args) - 4) // 6
    it = iter(args[1:-1])
    nxt = lambda: next(it)[...].astype(jnp.float32)

    # ------- initial causal conv as ONE im2col matmul, + ReLU + LayerNorm -------
    w0, vec0 = nxt(), nxt()                                # (K0*Cin, F0), (3, F0)
    b0, g0, be0 = vec0[0:1, :], vec0[1:2, :], vec0[2:3, :]
    K0 = w0.shape[0] // Cin
    zpad = jnp.zeros((K0 - 1, Cin), jnp.float32)
    rows = []
    for b in range(BB):                                    # static unroll over the batch block
        xb = jnp.concatenate([zpad, x_ref[b].astype(jnp.float32)], axis=0)  # causal left-pad
        # im2col row t = [x[t-K0+1], ..., x[t]] flattened over (tap, channel)
        rows.append(jnp.concatenate([xb[k:k + T, :] for k in range(K0)], axis=1))
    xcol = jnp.concatenate(rows, axis=0) if BB > 1 else rows[0]             # (BB*T, K0*Cin)
    h = jnp.dot(xcol, w0, preferred_element_type=jnp.float32) + b0
    a = _layer_norm(jnp.maximum(h, 0.0), g0, be0)                           # (BB*T, F0)
    # dropout: identity (eval)

    # ------------------- L x (TDSConv, TDSFullyConnectedBlock) -------------------
    for _ in range(num_layers):
        # TDSConv: depthwise causal conv + ReLU + 1x1 conv + ReLU + LayerNorm
        dwd, pw, cvec = nxt(), nxt(), nxt()                # (K+1, C), (C, Cout), (3, Cout)
        K = dwd.shape[0] - 1
        C = dwd.shape[1]
        dw, dwb = dwd[0:K, :], dwd[K:K + 1, :]
        pwb, gc, bec = cvec[0:1, :], cvec[1:2, :], cvec[2:3, :]
        zpad = jnp.zeros((K - 1, C), jnp.float32)
        rows = []
        for b in range(BB):                                # depthwise conv is per-sequence (time)
            ab = jnp.concatenate([zpad, a[b * T:(b + 1) * T, :]], axis=0)
            acc = ab[0:T, :] * dw[0:1, :]
            for k in range(1, K):                          # VPU shifted mul-adds
                acc = acc + ab[k:k + T, :] * dw[k:k + 1, :]
            rows.append(acc)
        d = jnp.concatenate(rows, axis=0) if BB > 1 else rows[0]            # (BB*T, C)
        d = jnp.maximum(d + dwb, 0.0)
        y = jnp.dot(d, pw, preferred_element_type=jnp.float32) + pwb       # folded-row matmul
        a = _layer_norm(jnp.maximum(y, 0.0), gc, bec)                       # (BB*T, Cout)
        # dropout: identity (eval)

        # TDSFullyConnectedBlock: Linear -> ReLU -> Linear, residual, LayerNorm
        w1, w2, fvec = nxt(), nxt(), nxt()                 # (N, N), (N, N), (4, N)
        b1, b2, gf, bef = fvec[0:1, :], fvec[1:2, :], fvec[2:3, :], fvec[3:4, :]
        hh = jnp.maximum(jnp.dot(a, w1, preferred_element_type=jnp.float32) + b1, 0.0)
        y = jnp.dot(hh, w2, preferred_element_type=jnp.float32) + b2 + a
        a = _layer_norm(y, gf, bef)

    # --------- store (channels-last; wrapper restores torch NCL layout) ---------
    a = a.astype(o_ref.dtype)
    for b in range(BB):
        o_ref[b] = a[b * T:(b + 1) * T, :]


# --------------------------- wrapper / param packing ---------------------------
def _pack_params(params, in_channels):
    """Flatten torch-layout params into the kernel's resident-weight operands."""
    p0 = params["init"]
    F0, _, K0 = p0["w"].shape
    # im2col weight: row index = k*Cin + c, matching the in-kernel column order.
    w0 = jnp.transpose(p0["w"], (2, 1, 0)).reshape(K0 * in_channels, F0)   # (K0*Cin, F0)
    vec0 = jnp.stack([p0["b"], p0["gamma"], p0["beta"]])                    # (3, F0)
    weights = [w0, vec0]
    c_out = F0
    for cname, fname in (("conv1", "fc1"), ("conv2", "fc2"), ("conv3", "fc3")):
        pc = params[cname]
        C, _, K = pc["dw"].shape
        Cout = pc["pw"].shape[0]
        dwd = jnp.concatenate([pc["dw"][:, 0, :].T, pc["dwb"].reshape(1, C)], axis=0)  # (K+1, C)
        pw = pc["pw"][:, :, 0].T                                                        # (C, Cout)
        cvec = jnp.stack([pc["pwb"], pc["gamma"], pc["beta"]])                          # (3, Cout)
        pf = params[fname]
        fvec = jnp.stack([pf["b1"], pf["b2"], pf["gamma"], pf["beta"]])                 # (4, N)
        weights += [dwd, pw, cvec, pf["w1"].T, pf["w2"].T, fvec]
        c_out = Cout
    return weights, c_out


def encoder_forward(x_bct, params, *, batch_block=8):
    # x_bct: (B, Cin, T) torch Conv1d layout -> returns (B, 64, T)
    B, Cin, T = x_bct.shape
    x = jnp.transpose(x_bct, (0, 2, 1))            # (B, T, Cin) channels-last (KB-sized tensor)
    weights, c_out = _pack_params(params, Cin)

    BB = min(batch_block, B)                        # fold up to batch_block sequences per step
    grid = (pl.cdiv(B, BB),)
    in_specs = [pl.BlockSpec((BB, T, Cin), lambda i: (i, 0, 0))]
    for w in weights:                               # resident weights: constant index map
        in_specs.append(pl.BlockSpec(w.shape, lambda i, _n=w.ndim: (0,) * _n))

    out = pl.pallas_call(
        _encoder_kernel,
        out_shape=jax.ShapeDtypeStruct((B, T, c_out), x_bct.dtype),
        grid=grid,
        in_specs=in_specs,
        out_specs=pl.BlockSpec((BB, T, c_out), lambda i: (i, 0, 0)),
        compiler_params=pltpu.CompilerParams(dimension_semantics=("parallel",)),
    )(x, *weights)
    return jnp.transpose(out, (0, 2, 1))            # back to torch (B, C, T)


# ----------------------------- Parameter setup -----------------------------
def init_params(key, in_channels, init_kernel_size, init_num_features):
    ks = iter(jax.random.split(key, 64))

    def nrm(shape, scale=0.1):
        return scale * jax.random.normal(next(ks), shape, jnp.float32)

    params = {}
    F = init_num_features
    params["init"] = dict(w=nrm((F, in_channels, init_kernel_size)), b=nrm((F,)),
                          gamma=1.0 + nrm((F,), 0.05), beta=nrm((F,), 0.05))
    c_in = F
    for name in ["conv1", "conv2", "conv3"]:
        c_out = 64
        params[name] = dict(dw=nrm((c_in, 1, 3)), dwb=nrm((c_in,)),
                            pw=nrm((c_out, c_in, 1)), pwb=nrm((c_out,)),
                            gamma=1.0 + nrm((c_out,), 0.05), beta=nrm((c_out,), 0.05))
        c_in = c_out
    for name in ["fc1", "fc2", "fc3"]:
        params[name] = dict(w1=nrm((64, 64)), b1=nrm((64,)),
                            w2=nrm((64, 64)), b2=nrm((64,)),
                            gamma=1.0 + nrm((64,), 0.05), beta=nrm((64,), 0.05))
    return params


# ----------------------------- Pure-JAX reference -----------------------------
def _ref_ln(x, g, b):
    m = x.mean(-1, keepdims=True)
    v = ((x - m) ** 2).mean(-1, keepdims=True)
    return (x - m) / jnp.sqrt(v + LN_EPS) * g + b


def ref_forward(x_bct, params):
    x = jnp.transpose(x_bct, (0, 2, 1))
    T = x.shape[1]
    p = params["init"]
    K = p["w"].shape[2]
    xp = jnp.pad(x, ((0, 0), (K - 1, 0), (0, 0)))
    wk = jnp.transpose(p["w"], (2, 1, 0))
    y = sum(jnp.einsum("btc,cf->btf", xp[:, k:k + T, :], wk[k]) for k in range(K)) + p["b"]
    x = _ref_ln(jnp.maximum(y, 0.0), p["gamma"], p["beta"])
    for cname, fname in [("conv1", "fc1"), ("conv2", "fc2"), ("conv3", "fc3")]:
        p = params[cname]
        K = p["dw"].shape[2]
        xp = jnp.pad(x, ((0, 0), (K - 1, 0), (0, 0)))
        dwk = p["dw"][:, 0, :].T
        y = sum(xp[:, k:k + T, :] * dwk[k] for k in range(K)) + p["dwb"]
        y = jnp.maximum(y, 0.0)
        y = jnp.einsum("btc,fc->btf", y, p["pw"][:, :, 0]) + p["pwb"]
        x = _ref_ln(jnp.maximum(y, 0.0), p["gamma"], p["beta"])
        p = params[fname]
        h = jnp.maximum(jnp.einsum("btc,fc->btf", x, p["w1"]) + p["b1"], 0.0)
        y = jnp.einsum("btc,fc->btf", h, p["w2"]) + p["b2"] + x
        x = _ref_ln(y, p["gamma"], p["beta"])
    return jnp.transpose(x, (0, 2, 1))


if __name__ == "__main__":
    B, Cin, T = 2, 4, 16           # batch, in_channels, sequence length
    K0, F0 = 4, 32                 # init_conv_kernel_size, init_num_features
    key = jax.random.PRNGKey(0)
    kx, kp = jax.random.split(key)
    x = jax.random.normal(kx, (B, Cin, T), jnp.float32)   # torch (B, C, T) layout
    params = init_params(kp, Cin, K0, F0)

    out = jax.block_until_ready(encoder_forward(x, params))
    ref = jax.block_until_ready(ref_forward(x, params))

    assert out.shape == (B, 64, T), out.shape
    err = float(jnp.max(jnp.abs(out - ref)))
    assert err < 1e-4, f"mismatch vs reference: {err}"
    print("KERNEL_OK")
</pallas_src>

<mosaic_0001>
module attributes {stable_mosaic.version = 11 : i64} {
  func.func @_encoder_kernel(%arg0: i32, %arg1: memref<2x16x4xf32, #tpu.memory_space<vmem>>, %arg2: memref<16x32xf32, #tpu.memory_space<vmem>>, %arg3: memref<3x32xf32, #tpu.memory_space<vmem>>, %arg4: memref<4x32xf32, #tpu.memory_space<vmem>>, %arg5: memref<32x64xf32, #tpu.memory_space<vmem>>, %arg6: memref<3x64xf32, #tpu.memory_space<vmem>>, %arg7: memref<64x64xf32, #tpu.memory_space<vmem>>, %arg8: memref<64x64xf32, #tpu.memory_space<vmem>>, %arg9: memref<4x64xf32, #tpu.memory_space<vmem>>, %arg10: memref<4x64xf32, #tpu.memory_space<vmem>>, %arg11: memref<64x64xf32, #tpu.memory_space<vmem>>, %arg12: memref<3x64xf32, #tpu.memory_space<vmem>>, %arg13: memref<64x64xf32, #tpu.memory_space<vmem>>, %arg14: memref<64x64xf32, #tpu.memory_space<vmem>>, %arg15: memref<4x64xf32, #tpu.memory_space<vmem>>, %arg16: memref<4x64xf32, #tpu.memory_space<vmem>>, %arg17: memref<64x64xf32, #tpu.memory_space<vmem>>, %arg18: memref<3x64xf32, #tpu.memory_space<vmem>>, %arg19: memref<64x64xf32, #tpu.memory_space<vmem>>, %arg20: memref<64x64xf32, #tpu.memory_space<vmem>>, %arg21: memref<4x64xf32, #tpu.memory_space<vmem>>, %arg22: memref<2x16x64xf32, #tpu.memory_space<vmem>>) attributes {dimension_semantics = [#tpu.dimension_semantics<parallel>], iteration_bounds = array<i64: 1>, scalar_prefetch = 0 : i64, scratch_operands = 0 : i64, tpu.core_type = #tpu.core_type<tc>, window_params = [{transform_indices = @transform_0, window_bounds = array<i64: 2, 16, 4>}, {pipeline_mode = #tpu.pipeline_mode<synchronous>, transform_indices = @transform_1, window_bounds = array<i64: 16, 32>}, {pipeline_mode = #tpu.pipeline_mode<synchronous>, transform_indices = @transform_2, window_bounds = array<i64: 3, 32>}, {pipeline_mode = #tpu.pipeline_mode<synchronous>, transform_indices = @transform_3, window_bounds = array<i64: 4, 32>}, {pipeline_mode = #tpu.pipeline_mode<synchronous>, transform_indices = @transform_4, window_bounds = array<i64: 32, 64>}, {pipeline_mode = #tpu.pipeline_mode<synchronous>, transform_indices = @transform_5, window_bounds = array<i64: 3, 64>}, {pipeline_mode = #tpu.pipeline_mode<synchronous>, transform_indices = @transform_6, window_bounds = array<i64: 64, 64>}, {pipeline_mode = #tpu.pipeline_mode<synchronous>, transform_indices = @transform_7, window_bounds = array<i64: 64, 64>}, {pipeline_mode = #tpu.pipeline_mode<synchronous>, transform_indices = @transform_8, window_bounds = array<i64: 4, 64>}, {pipeline_mode = #tpu.pipeline_mode<synchronous>, transform_indices = @transform_9, window_bounds = array<i64: 4, 64>}, {pipeline_mode = #tpu.pipeline_mode<synchronous>, transform_indices = @transform_10, window_bounds = array<i64: 64, 64>}, {pipeline_mode = #tpu.pipeline_mode<synchronous>, transform_indices = @transform_11, window_bounds = array<i64: 3, 64>}, {pipeline_mode = #tpu.pipeline_mode<synchronous>, transform_indices = @transform_12, window_bounds = array<i64: 64, 64>}, {pipeline_mode = #tpu.pipeline_mode<synchronous>, transform_indices = @transform_13, window_bounds = array<i64: 64, 64>}, {pipeline_mode = #tpu.pipeline_mode<synchronous>, transform_indices = @transform_14, window_bounds = array<i64: 4, 64>}, {pipeline_mode = #tpu.pipeline_mode<synchronous>, transform_indices = @transform_15, window_bounds = array<i64: 4, 64>}, {pipeline_mode = #tpu.pipeline_mode<synchronous>, transform_indices = @transform_16, window_bounds = array<i64: 64, 64>}, {pipeline_mode = #tpu.pipeline_mode<synchronous>, transform_indices = @transform_17, window_bounds = array<i64: 3, 64>}, {pipeline_mode = #tpu.pipeline_mode<synchronous>, transform_indices = @transform_18, window_bounds = array<i64: 64, 64>}, {pipeline_mode = #tpu.pipeline_mode<synchronous>, transform_indices = @transform_19, window_bounds = array<i64: 64, 64>}, {pipeline_mode = #tpu.pipeline_mode<synchronous>, transform_indices = @transform_20, window_bounds = array<i64: 4, 64>}, {transform_indices = @transform_21, window_bounds = array<i64: 2, 16, 64>}]} {
    %c0 = arith.constant 0 : index
    %c0_0 = arith.constant 0 : index
    %0 = vector.load %arg2[%c0, %c0_0] : memref<16x32xf32, #tpu.memory_space<vmem>>, vector<16x32xf32>
    %c0_1 = arith.constant 0 : index
    %c0_2 = arith.constant 0 : index
    %1 = vector.load %arg3[%c0_1, %c0_2] : memref<3x32xf32, #tpu.memory_space<vmem>>, vector<3x32xf32>
    %2 = vector.extract_strided_slice %1 {offsets = [0, 0], sizes = [1, 32], strides = [1, 1]} : vector<3x32xf32> to vector<1x32xf32>
    %3 = vector.extract_strided_slice %1 {offsets = [1, 0], sizes = [1, 32], strides = [1, 1]} : vector<3x32xf32> to vector<1x32xf32>
    %4 = vector.extract_strided_slice %1 {offsets = [2, 0], sizes = [1, 32], strides = [1, 1]} : vector<3x32xf32> to vector<1x32xf32>
    %cst = arith.constant 0.000000e+00 : f32
    %5 = vector.broadcast %cst : f32 to vector<3x4xf32>
    %c0_3 = arith.constant 0 : index
    %c0_4 = arith.constant 0 : index
    %c0_5 = arith.constant 0 : index
    %6 = vector.load %arg1[%c0_3, %c0_4, %c0_5] : memref<2x16x4xf32, #tpu.memory_space<vmem>>, vector<1x16x4xf32>
    %7 = vector.shape_cast %6 : vector<1x16x4xf32> to vector<16x4xf32>
    %8 = tpu.concatenate %5, %7 in 0 : vector<3x4xf32>, vector<16x4xf32> -> vector<19x4xf32>
    %9 = vector.extract_strided_slice %8 {offsets = [0, 0], sizes = [16, 4], strides = [1, 1]} : vector<19x4xf32> to vector<16x4xf32>
    %10 = vector.extract_strided_slice %8 {offsets = [1, 0], sizes = [16, 4], strides = [1, 1]} : vector<19x4xf32> to vector<16x4xf32>
    %11 = vector.extract_strided_slice %8 {offsets = [2, 0], sizes = [16, 4], strides = [1, 1]} : vector<19x4xf32> to vector<16x4xf32>
    %12 = vector.extract_strided_slice %8 {offsets = [3, 0], sizes = [16, 4], strides = [1, 1]} : vector<19x4xf32> to vector<16x4xf32>
    %13 = tpu.concatenate %9, %10, %11, %12 in 1 : vector<16x4xf32>, vector<16x4xf32>, vector<16x4xf32>, vector<16x4xf32> -> vector<16x16xf32>
    %c1 = arith.constant 1 : index
    %c0_6 = arith.constant 0 : index
    %c0_7 = arith.constant 0 : index
    %14 = vector.load %arg1[%c1, %c0_6, %c0_7] : memref<2x16x4xf32, #tpu.memory_space<vmem>>, vector<1x16x4xf32>
    %15 = vector.shape_cast %14 : vector<1x16x4xf32> to vector<16x4xf32>
    %16 = tpu.concatenate %5, %15 in 0 : vector<3x4xf32>, vector<16x4xf32> -> vector<19x4xf32>
    %17 = vector.extract_strided_slice %16 {offsets = [0, 0], sizes = [16, 4], strides = [1, 1]} : vector<19x4xf32> to vector<16x4xf32>
    %18 = vector.extract_strided_slice %16 {offsets = [1, 0], sizes = [16, 4], strides = [1, 1]} : vector<19x4xf32> to vector<16x4xf32>
    %19 = vector.extract_strided_slice %16 {offsets = [2, 0], sizes = [16, 4], strides = [1, 1]} : vector<19x4xf32> to vector<16x4xf32>
    %20 = vector.extract_strided_slice %16 {offsets = [3, 0], sizes = [16, 4], strides = [1, 1]} : vector<19x4xf32> to vector<16x4xf32>
    %21 = tpu.concatenate %17, %18, %19, %20 in 1 : vector<16x4xf32>, vector<16x4xf32>, vector<16x4xf32>, vector<16x4xf32> -> vector<16x16xf32>
    %22 = tpu.concatenate %13, %21 in 0 : vector<16x16xf32>, vector<16x16xf32> -> vector<32x16xf32>
    %cst_8 = arith.constant dense<0.000000e+00> : vector<32x32xf32>
    %23 = tpu.matmul %22, %0, %cst_8 {dimension_numbers = #tpu.dot_dimension_numbers<[1], [0], [0], [1], [0, 0, 1, 1], [], []>} : vector<32x16xf32>, vector<16x32xf32>, vector<32x32xf32> -> vector<32x32xf32>
    %24 = vector.broadcast %2 : vector<1x32xf32> to vector<32x32xf32>
    %25 = arith.addf %23, %24 : vector<32x32xf32>
    %cst_9 = arith.constant 0.000000e+00 : f32
    %26 = vector.broadcast %cst_9 : f32 to vector<32x32xf32>
    %27 = arith.maximumf %25, %26 : vector<32x32xf32>
    %cst_10 = arith.constant dense<0.000000e+00> : vector<32xf32>
    %28 = vector.multi_reduction <add>, %27, %cst_10 [1] : vector<32x32xf32> to vector<32xf32>
    %29 = vector.shape_cast %28 : vector<32xf32> to vector<32x1xf32>
    %cst_11 = arith.constant 3.200000e+01 : f32
    %30 = vector.broadcast %cst_11 : f32 to vector<32x1xf32>
    %31 = arith.divf %29, %30 : vector<32x1xf32>
    %32 = vector.broadcast %31 : vector<32x1xf32> to vector<32x32xf32>
    %33 = arith.subf %27, %32 : vector<32x32xf32>
    %34 = arith.mulf %33, %33 : vector<32x32xf32>
    %cst_12 = arith.constant dense<0.000000e+00> : vector<32xf32>
    %35 = vector.multi_reduction <add>, %34, %cst_12 [1] : vector<32x32xf32> to vector<32xf32>
    %36 = vector.shape_cast %35 : vector<32xf32> to vector<32x1xf32>
    %cst_13 = arith.constant 3.200000e+01 : f32
    %37 = vector.broadcast %cst_13 : f32 to vector<32x1xf32>
    %38 = arith.divf %36, %37 : vector<32x1xf32>
    %39 = vector.broadcast %31 : vector<32x1xf32> to vector<32x32xf32>
    %40 = arith.subf %27, %39 : vector<32x32xf32>
    %cst_14 = arith.constant 9.99999974E-6 : f32
    %41 = vector.broadcast %cst_14 : f32 to vector<32x1xf32>
    %42 = arith.addf %38, %41 : vector<32x1xf32>
    %43 = math.rsqrt %42 : vector<32x1xf32>
    %44 = vector.broadcast %43 : vector<32x1xf32> to vector<32x32xf32>
    %45 = arith.mulf %40, %44 : vector<32x32xf32>
    %46 = vector.broadcast %3 : vector<1x32xf32> to vector<32x32xf32>
    %47 = arith.mulf %45, %46 : vector<32x32xf32>
    %48 = vector.broadcast %4 : vector<1x32xf32> to vector<32x32xf32>
    %49 = arith.addf %47, %48 : vector<32x32xf32>
    %c0_15 = arith.constant 0 : index
    %c0_16 = arith.constant 0 : index
    %50 = vector.load %arg4[%c0_15, %c0_16] : memref<4x32xf32, #tpu.memory_space<vmem>>, vector<4x32xf32>
    %c0_17 = arith.constant 0 : index
    %c0_18 = arith.constant 0 : index
    %51 = vector.load %arg5[%c0_17, %c0_18] : memref<32x64xf32, #tpu.memory_space<vmem>>, vector<32x64xf32>
    %c0_19 = arith.constant 0 : index
    %c0_20 = arith.constant 0 : index
    %52 = vector.load %arg6[%c0_19, %c0_20] : memref<3x64xf32, #tpu.memory_space<vmem>>, vector<3x64xf32>
    %53 = vector.extract_strided_slice %50 {offsets = [0, 0], sizes = [3, 32], strides = [1, 1]} : vector<4x32xf32> to vector<3x32xf32>
    %54 = vector.extract_strided_slice %50 {offsets = [3, 0], sizes = [1, 32], strides = [1, 1]} : vector<4x32xf32> to vector<1x32xf32>
    %55 = vector.extract_strided_slice %52 {offsets = [0, 0], sizes = [1, 64], strides = [1, 1]} : vector<3x64xf32> to vector<1x64xf32>
    %56 = vector.extract_strided_slice %52 {offsets = [1, 0], sizes = [1, 64], strides = [1, 1]} : vector<3x64xf32> to vector<1x64xf32>
    %57 = vector.extract_strided_slice %52 {offsets = [2, 0], sizes = [1, 64], strides = [1, 1]} : vector<3x64xf32> to vector<1x64xf32>
    %cst_21 = arith.constant 0.000000e+00 : f32
    %58 = vector.broadcast %cst_21 : f32 to vector<2x32xf32>
    %59 = vector.extract_strided_slice %49 {offsets = [0, 0], sizes = [16, 32], strides = [1, 1]} : vector<32x32xf32> to vector<16x32xf32>
    %60 = tpu.concatenate %58, %59 in 0 : vector<2x32xf32>, vector<16x32xf32> -> vector<18x32xf32>
    %61 = vector.extract_strided_slice %60 {offsets = [0, 0], sizes = [16, 32], strides = [1, 1]} : vector<18x32xf32> to vector<16x32xf32>
    %62 = vector.extract_strided_slice %53 {offsets = [0, 0], sizes = [1, 32], strides = [1, 1]} : vector<3x32xf32> to vector<1x32xf32>
    %63 = vector.broadcast %62 : vector<1x32xf32> to vector<16x32xf32>
    %64 = arith.mulf %61, %63 : vector<16x32xf32>
    %65 = vector.extract_strided_slice %60 {offsets = [1, 0], sizes = [16, 32], strides = [1, 1]} : vector<18x32xf32> to vector<16x32xf32>
    %66 = vector.extract_strided_slice %53 {offsets = [1, 0], sizes = [1, 32], strides = [1, 1]} : vector<3x32xf32> to vector<1x32xf32>
    %67 = vector.broadcast %66 : vector<1x32xf32> to vector<16x32xf32>
    %68 = arith.mulf %65, %67 : vector<16x32xf32>
    %69 = arith.addf %64, %68 : vector<16x32xf32>
    %70 = vector.extract_strided_slice %60 {offsets = [2, 0], sizes = [16, 32], strides = [1, 1]} : vector<18x32xf32> to vector<16x32xf32>
    %71 = vector.extract_strided_slice %53 {offsets = [2, 0], sizes = [1, 32], strides = [1, 1]} : vector<3x32xf32> to vector<1x32xf32>
    %72 = vector.broadcast %71 : vector<1x32xf32> to vector<16x32xf32>
    %73 = arith.mulf %70, %72 : vector<16x32xf32>
    %74 = arith.addf %69, %73 : vector<16x32xf32>
    %75 = vector.extract_strided_slice %49 {offsets = [16, 0], sizes = [16, 32], strides = [1, 1]} : vector<32x32xf32> to vector<16x32xf32>
    %76 = tpu.concatenate %58, %75 in 0 : vector<2x32xf32>, vector<16x32xf32> -> vector<18x32xf32>
    %77 = vector.extract_strided_slice %76 {offsets = [0, 0], sizes = [16, 32], strides = [1, 1]} : vector<18x32xf32> to vector<16x32xf32>
    %78 = vector.extract_strided_slice %53 {offsets = [0, 0], sizes = [1, 32], strides = [1, 1]} : vector<3x32xf32> to vector<1x32xf32>
    %79 = vector.broadcast %78 : vector<1x32xf32> to vector<16x32xf32>
    %80 = arith.mulf %77, %79 : vector<16x32xf32>
    %81 = vector.extract_strided_slice %76 {offsets = [1, 0], sizes = [16, 32], strides = [1, 1]} : vector<18x32xf32> to vector<16x32xf32>
    %82 = vector.extract_strided_slice %53 {offsets = [1, 0], sizes = [1, 32], strides = [1, 1]} : vector<3x32xf32> to vector<1x32xf32>
    %83 = vector.broadcast %82 : vector<1x32xf32> to vector<16x32xf32>
    %84 = arith.mulf %81, %83 : vector<16x32xf32>
    %85 = arith.addf %80, %84 : vector<16x32xf32>
    %86 = vector.extract_strided_slice %76 {offsets = [2, 0], sizes = [16, 32], strides = [1, 1]} : vector<18x32xf32> to vector<16x32xf32>
    %87 = vector.extract_strided_slice %53 {offsets = [2, 0], sizes = [1, 32], strides = [1, 1]} : vector<3x32xf32> to vector<1x32xf32>
    %88 = vector.broadcast %87 : vector<1x32xf32> to vector<16x32xf32>
    %89 = arith.mulf %86, %88 : vector<16x32xf32>
    %90 = arith.addf %85, %89 : vector<16x32xf32>
    %91 = tpu.concatenate %74, %90 in 0 : vector<16x32xf32>, vector<16x32xf32> -> vector<32x32xf32>
    %92 = vector.broadcast %54 : vector<1x32xf32> to vector<32x32xf32>
    %93 = arith.addf %91, %92 : vector<32x32xf32>
    %cst_22 = arith.constant 0.000000e+00 : f32
    %94 = vector.broadcast %cst_22 : f32 to vector<32x32xf32>
    %95 = arith.maximumf %93, %94 : vector<32x32xf32>
    %cst_23 = arith.constant dense<0.000000e+00> : vector<32x64xf32>
    %96 = tpu.matmul %95, %51, %cst_23 {dimension_numbers = #tpu.dot_dimension_numbers<[1], [0], [0], [1], [0, 0, 1, 1], [], []>} : vector<32x32xf32>, vector<32x64xf32>, vector<32x64xf32> -> vector<32x64xf32>
    %97 = vector.broadcast %55 : vector<1x64xf32> to vector<32x64xf32>
    %98 = arith.addf %96, %97 : vector<32x64xf32>
    %cst_24 = arith.constant 0.000000e+00 : f32
    %99 = vector.broadcast %cst_24 : f32 to vector<32x64xf32>
    %100 = arith.maximumf %98, %99 : vector<32x64xf32>
    %cst_25 = arith.constant dense<0.000000e+00> : vector<32xf32>
    %101 = vector.multi_reduction <add>, %100, %cst_25 [1] : vector<32x64xf32> to vector<32xf32>
    %102 = vector.shape_cast %101 : vector<32xf32> to vector<32x1xf32>
    %cst_26 = arith.constant 6.400000e+01 : f32
    %103 = vector.broadcast %cst_26 : f32 to vector<32x1xf32>
    %104 = arith.divf %102, %103 : vector<32x1xf32>
    %105 = vector.broadcast %104 : vector<32x1xf32> to vector<32x64xf32>
    %106 = arith.subf %100, %105 : vector<32x64xf32>
    %107 = arith.mulf %106, %106 : vector<32x64xf32>
    %cst_27 = arith.constant dense<0.000000e+00> : vector<32xf32>
    %108 = vector.multi_reduction <add>, %107, %cst_27 [1] : vector<32x64xf32> to vector<32xf32>
    %109 = vector.shape_cast %108 : vector<32xf32> to vector<32x1xf32>
    %cst_28 = arith.constant 6.400000e+01 : f32
    %110 = vector.broadcast %cst_28 : f32 to vector<32x1xf32>
    %111 = arith.divf %109, %110 : vector<32x1xf32>
    %112 = vector.broadcast %104 : vector<32x1xf32> to vector<32x64xf32>
    %113 = arith.subf %100, %112 : vector<32x64xf32>
    %cst_29 = arith.constant 9.99999974E-6 : f32
    %114 = vector.broadcast %cst_29 : f32 to vector<32x1xf32>
    %115 = arith.addf %111, %114 : vector<32x1xf32>
    %116 = math.rsqrt %115 : vector<32x1xf32>
    %117 = vector.broadcast %116 : vector<32x1xf32> to vector<32x64xf32>
    %118 = arith.mulf %113, %117 : vector<32x64xf32>
    %119 = vector.broadcast %56 : vector<1x64xf32> to vector<32x64xf32>
    %120 = arith.mulf %118, %119 : vector<32x64xf32>
    %121 = vector.broadcast %57 : vector<1x64xf32> to vector<32x64xf32>
    %122 = arith.addf %120, %121 : vector<32x64xf32>
    %c0_30 = arith.constant 0 : index
    %c0_31 = arith.constant 0 : index
    %123 = vector.load %arg7[%c0_30, %c0_31] : memref<64x64xf32, #tpu.memory_space<vmem>>, vector<64x64xf32>
    %c0_32 = arith.constant 0 : index
    %c0_33 = arith.constant 0 : index
    %124 = vector.load %arg8[%c0_32, %c0_33] : memref<64x64xf32, #tpu.memory_space<vmem>>, vector<64x64xf32>
    %c0_34 = arith.constant 0 : index
    %c0_35 = arith.constant 0 : index
    %125 = vector.load %arg9[%c0_34, %c0_35] : memref<4x64xf32, #tpu.memory_space<vmem>>, vector<4x64xf32>
    %126 = vector.extract_strided_slice %125 {offsets = [0, 0], sizes = [1, 64], strides = [1, 1]} : vector<4x64xf32> to vector<1x64xf32>
    %127 = vector.extract_strided_slice %125 {offsets = [1, 0], sizes = [1, 64], strides = [1, 1]} : vector<4x64xf32> to vector<1x64xf32>
    %128 = vector.extract_strided_slice %125 {offsets = [2, 0], sizes = [1, 64], strides = [1, 1]} : vector<4x64xf32> to vector<1x64xf32>
    %129 = vector.extract_strided_slice %125 {offsets = [3, 0], sizes = [1, 64], strides = [1, 1]} : vector<4x64xf32> to vector<1x64xf32>
    %cst_36 = arith.constant dense<0.000000e+00> : vector<32x64xf32>
    %130 = tpu.matmul %122, %123, %cst_36 {dimension_numbers = #tpu.dot_dimension_numbers<[1], [0], [0], [1], [0, 0, 1, 1], [], []>} : vector<32x64xf32>, vector<64x64xf32>, vector<32x64xf32> -> vector<32x64xf32>
    %131 = vector.broadcast %126 : vector<1x64xf32> to vector<32x64xf32>
    %132 = arith.addf %130, %131 : vector<32x64xf32>
    %cst_37 = arith.constant 0.000000e+00 : f32
    %133 = vector.broadcast %cst_37 : f32 to vector<32x64xf32>
    %134 = arith.maximumf %132, %133 : vector<32x64xf32>
    %cst_38 = arith.constant dense<0.000000e+00> : vector<32x64xf32>
    %135 = tpu.matmul %134, %124, %cst_38 {dimension_numbers = #tpu.dot_dimension_numbers<[1], [0], [0], [1], [0, 0, 1, 1], [], []>} : vector<32x64xf32>, vector<64x64xf32>, vector<32x64xf32> -> vector<32x64xf32>
    %136 = vector.broadcast %127 : vector<1x64xf32> to vector<32x64xf32>
    %137 = arith.addf %135, %136 : vector<32x64xf32>
    %138 = arith.addf %137, %122 : vector<32x64xf32>
    %cst_39 = arith.constant dense<0.000000e+00> : vector<32xf32>
    %139 = vector.multi_reduction <add>, %138, %cst_39 [1] : vector<32x64xf32> to vector<32xf32>
    %140 = vector.shape_cast %139 : vector<32xf32> to vector<32x1xf32>
    %cst_40 = arith.constant 6.400000e+01 : f32
    %141 = vector.broadcast %cst_40 : f32 to vector<32x1xf32>
    %142 = arith.divf %140, %141 : vector<32x1xf32>
    %143 = vector.broadcast %142 : vector<32x1xf32> to vector<32x64xf32>
    %144 = arith.subf %138, %143 : vector<32x64xf32>
    %145 = arith.mulf %144, %144 : vector<32x64xf32>
    %cst_41 = arith.constant dense<0.000000e+00> : vector<32xf32>
    %146 = vector.multi_reduction <add>, %145, %cst_41 [1] : vector<32x64xf32> to vector<32xf32>
    %147 = vector.shape_cast %146 : vector<32xf32> to vector<32x1xf32>
    %cst_42 = arith.constant 6.400000e+01 : f32
    %148 = vector.broadcast %cst_42 : f32 to vector<32x1xf32>
    %149 = arith.divf %147, %148 : vector<32x1xf32>
    %150 = vector.broadcast %142 : vector<32x1xf32> to vector<32x64xf32>
    %151 = arith.subf %138, %150 : vector<32x64xf32>
    %cst_43 = arith.constant 9.99999974E-6 : f32
    %152 = vector.broadcast %cst_43 : f32 to vector<32x1xf32>
    %153 = arith.addf %149, %152 : vector<32x1xf32>
    %154 = math.rsqrt %153 : vector<32x1xf32>
    %155 = vector.broadcast %154 : vector<32x1xf32> to vector<32x64xf32>
    %156 = arith.mulf %151, %155 : vector<32x64xf32>
    %157 = vector.broadcast %128 : vector<1x64xf32> to vector<32x64xf32>
    %158 = arith.mulf %156, %157 : vector<32x64xf32>
    %159 = vector.broadcast %129 : vector<1x64xf32> to vector<32x64xf32>
    %160 = arith.addf %158, %159 : vector<32x64xf32>
    %c0_44 = arith.constant 0 : index
    %c0_45 = arith.constant 0 : index
    %161 = vector.load %arg10[%c0_44, %c0_45] : memref<4x64xf32, #tpu.memory_space<vmem>>, vector<4x64xf32>
    %c0_46 = arith.constant 0 : index
    %c0_47 = arith.constant 0 : index
    %162 = vector.load %arg11[%c0_46, %c0_47] : memref<64x64xf32, #tpu.memory_space<vmem>>, vector<64x64xf32>
    %c0_48 = arith.constant 0 : index
    %c0_49 = arith.constant 0 : index
    %163 = vector.load %arg12[%c0_48, %c0_49] : memref<3x64xf32, #tpu.memory_space<vmem>>, vector<3x64xf32>
    %164 = vector.extract_strided_slice %161 {offsets = [0, 0], sizes = [3, 64], strides = [1, 1]} : vector<4x64xf32> to vector<3x64xf32>
    %165 = vector.extract_strided_slice %161 {offsets = [3, 0], sizes = [1, 64], strides = [1, 1]} : vector<4x64xf32> to vector<1x64xf32>
    %166 = vector.extract_strided_slice %163 {offsets = [0, 0], sizes = [1, 64], strides = [1, 1]} : vector<3x64xf32> to vector<1x64xf32>
    %167 = vector.extract_strided_slice %163 {offsets = [1, 0], sizes = [1, 64], strides = [1, 1]} : vector<3x64xf32> to vector<1x64xf32>
    %168 = vector.extract_strided_slice %163 {offsets = [2, 0], sizes = [1, 64], strides = [1, 1]} : vector<3x64xf32> to vector<1x64xf32>
    %cst_50 = arith.constant 0.000000e+00 : f32
    %169 = vector.broadcast %cst_50 : f32 to vector<2x64xf32>
    %170 = vector.extract_strided_slice %160 {offsets = [0, 0], sizes = [16, 64], strides = [1, 1]} : vector<32x64xf32> to vector<16x64xf32>
    %171 = tpu.concatenate %169, %170 in 0 : vector<2x64xf32>, vector<16x64xf32> -> vector<18x64xf32>
    %172 = vector.extract_strided_slice %171 {offsets = [0, 0], sizes = [16, 64], strides = [1, 1]} : vector<18x64xf32> to vector<16x64xf32>
    %173 = vector.extract_strided_slice %164 {offsets = [0, 0], sizes = [1, 64], strides = [1, 1]} : vector<3x64xf32> to vector<1x64xf32>
    %174 = vector.broadcast %173 : vector<1x64xf32> to vector<16x64xf32>
    %175 = arith.mulf %172, %174 : vector<16x64xf32>
    %176 = vector.extract_strided_slice %171 {offsets = [1, 0], sizes = [16, 64], strides = [1, 1]} : vector<18x64xf32> to vector<16x64xf32>
    %177 = vector.extract_strided_slice %164 {offsets = [1, 0], sizes = [1, 64], strides = [1, 1]} : vector<3x64xf32> to vector<1x64xf32>
    %178 = vector.broadcast %177 : vector<1x64xf32> to vector<16x64xf32>
    %179 = arith.mulf %176, %178 : vector<16x64xf32>
    %180 = arith.addf %175, %179 : vector<16x64xf32>
    %181 = vector.extract_strided_slice %171 {offsets = [2, 0], sizes = [16, 64], strides = [1, 1]} : vector<18x64xf32> to vector<16x64xf32>
    %182 = vector.extract_strided_slice %164 {offsets = [2, 0], sizes = [1, 64], strides = [1, 1]} : vector<3x64xf32> to vector<1x64xf32>
    %183 = vector.broadcast %182 : vector<1x64xf32> to vector<16x64xf32>
    %184 = arith.mulf %181, %183 : vector<16x64xf32>
    %185 = arith.addf %180, %184 : vector<16x64xf32>
    %186 = vector.extract_strided_slice %160 {offsets = [16, 0], sizes = [16, 64], strides = [1, 1]} : vector<32x64xf32> to vector<16x64xf32>
    %187 = tpu.concatenate %169, %186 in 0 : vector<2x64xf32>, vector<16x64xf32> -> vector<18x64xf32>
    %188 = vector.extract_strided_slice %187 {offsets = [0, 0], sizes = [16, 64], strides = [1, 1]} : vector<18x64xf32> to vector<16x64xf32>
    %189 = vector.extract_strided_slice %164 {offsets = [0, 0], sizes = [1, 64], strides = [1, 1]} : vector<3x64xf32> to vector<1x64xf32>
    %190 = vector.broadcast %189 : vector<1x64xf32> to vector<16x64xf32>
    %191 = arith.mulf %188, %190 : vector<16x64xf32>
    %192 = vector.extract_strided_slice %187 {offsets = [1, 0], sizes = [16, 64], strides = [1, 1]} : vector<18x64xf32> to vector<16x64xf32>
    %193 = vector.extract_strided_slice %164 {offsets = [1, 0], sizes = [1, 64], strides = [1, 1]} : vector<3x64xf32> to vector<1x64xf32>
    %194 = vector.broadcast %193 : vector<1x64xf32> to vector<16x64xf32>
    %195 = arith.mulf %192, %194 : vector<16x64xf32>
    %196 = arith.addf %191, %195 : vector<16x64xf32>
    %197 = vector.extract_strided_slice %187 {offsets = [2, 0], sizes = [16, 64], strides = [1, 1]} : vector<18x64xf32> to vector<16x64xf32>
    %198 = vector.extract_strided_slice %164 {offsets = [2, 0], sizes = [1, 64], strides = [1, 1]} : vector<3x64xf32> to vector<1x64xf32>
    %199 = vector.broadcast %198 : vector<1x64xf32> to vector<16x64xf32>
    %200 = arith.mulf %197, %199 : vector<16x64xf32>
    %201 = arith.addf %196, %200 : vector<16x64xf32>
    %202 = tpu.concatenate %185, %201 in 0 : vector<16x64xf32>, vector<16x64xf32> -> vector<32x64xf32>
    %203 = vector.broadcast %165 : vector<1x64xf32> to vector<32x64xf32>
    %204 = arith.addf %202, %203 : vector<32x64xf32>
    %cst_51 = arith.constant 0.000000e+00 : f32
    %205 = vector.broadcast %cst_51 : f32 to vector<32x64xf32>
    %206 = arith.maximumf %204, %205 : vector<32x64xf32>
    %cst_52 = arith.constant dense<0.000000e+00> : vector<32x64xf32>
    %207 = tpu.matmul %206, %162, %cst_52 {dimension_numbers = #tpu.dot_dimension_numbers<[1], [0], [0], [1], [0, 0, 1, 1], [], []>} : vector<32x64xf32>, vector<64x64xf32>, vector<32x64xf32> -> vector<32x64xf32>
    %208 = vector.broadcast %166 : vector<1x64xf32> to vector<32x64xf32>
    %209 = arith.addf %207, %208 : vector<32x64xf32>
    %cst_53 = arith.constant 0.000000e+00 : f32
    %210 = vector.broadcast %cst_53 : f32 to vector<32x64xf32>
    %211 = arith.maximumf %209, %210 : vector<32x64xf32>
    %cst_54 = arith.constant dense<0.000000e+00> : vector<32xf32>
    %212 = vector.multi_reduction <add>, %211, %cst_54 [1] : vector<32x64xf32> to vector<32xf32>
    %213 = vector.shape_cast %212 : vector<32xf32> to vector<32x1xf32>
    %cst_55 = arith.constant 6.400000e+01 : f32
    %214 = vector.broadcast %cst_55 : f32 to vector<32x1xf32>
    %215 = arith.divf %213, %214 : vector<32x1xf32>
    %216 = vector.broadcast %215 : vector<32x1xf32> to vector<32x64xf32>
    %217 = arith.subf %211, %216 : vector<32x64xf32>
    %218 = arith.mulf %217, %217 : vector<32x64xf32>
    %cst_56 = arith.constant dense<0.000000e+00> : vector<32xf32>
    %219 = vector.multi_reduction <add>, %218, %cst_56 [1] : vector<32x64xf32> to vector<32xf32>
    %220 = vector.shape_cast %219 : vector<32xf32> to vector<32x1xf32>
    %cst_57 = arith.constant 6.400000e+01 : f32
    %221 = vector.broadcast %cst_57 : f32 to vector<32x1xf32>
    %222 = arith.divf %220, %221 : vector<32x1xf32>
    %223 = vector.broadcast %215 : vector<32x1xf32> to vector<32x64xf32>
    %224 = arith.subf %211, %223 : vector<32x64xf32>
    %cst_58 = arith.constant 9.99999974E-6 : f32
    %225 = vector.broadcast %cst_58 : f32 to vector<32x1xf32>
    %226 = arith.addf %222, %225 : vector<32x1xf32>
    %227 = math.rsqrt %226 : vector<32x1xf32>
    %228 = vector.broadcast %227 : vector<32x1xf32> to vector<32x64xf32>
    %229 = arith.mulf %224, %228 : vector<32x64xf32>
    %230 = vector.broadcast %167 : vector<1x64xf32> to vector<32x64xf32>
    %231 = arith.mulf %229, %230 : vector<32x64xf32>
    %232 = vector.broadcast %168 : vector<1x64xf32> to vector<32x64xf32>
    %233 = arith.addf %231, %232 : vector<32x64xf32>
    %c0_59 = arith.constant 0 : index
    %c0_60 = arith.constant 0 : index
    %234 = vector.load %arg13[%c0_59, %c0_60] : memref<64x64xf32, #tpu.memory_space<vmem>>, vector<64x64xf32>
    %c0_61 = arith.constant 0 : index
    %c0_62 = arith.constant 0 : index
    %235 = vector.load %arg14[%c0_61, %c0_62] : memref<64x64xf32, #tpu.memory_space<vmem>>, vector<64x64xf32>
    %c0_63 = arith.constant 0 : index
    %c0_64 = arith.constant 0 : index
    %236 = vector.load %arg15[%c0_63, %c0_64] : memref<4x64xf32, #tpu.memory_space<vmem>>, vector<4x64xf32>
    %237 = vector.extract_strided_slice %236 {offsets = [0, 0], sizes = [1, 64], strides = [1, 1]} : vector<4x64xf32> to vector<1x64xf32>
    %238 = vector.extract_strided_slice %236 {offsets = [1, 0], sizes = [1, 64], strides = [1, 1]} : vector<4x64xf32> to vector<1x64xf32>
    %239 = vector.extract_strided_slice %236 {offsets = [2, 0], sizes = [1, 64], strides = [1, 1]} : vector<4x64xf32> to vector<1x64xf32>
    %240 = vector.extract_strided_slice %236 {offsets = [3, 0], sizes = [1, 64], strides = [1, 1]} : vector<4x64xf32> to vector<1x64xf32>
    %cst_65 = arith.constant dense<0.000000e+00> : vector<32x64xf32>
    %241 = tpu.matmul %233, %234, %cst_65 {dimension_numbers = #tpu.dot_dimension_numbers<[1], [0], [0], [1], [0, 0, 1, 1], [], []>} : vector<32x64xf32>, vector<64x64xf32>, vector<32x64xf32> -> vector<32x64xf32>
    %242 = vector.broadcast %237 : vector<1x64xf32> to vector<32x64xf32>
    %243 = arith.addf %241, %242 : vector<32x64xf32>
    %cst_66 = arith.constant 0.000000e+00 : f32
    %244 = vector.broadcast %cst_66 : f32 to vector<32x64xf32>
    %245 = arith.maximumf %243, %244 : vector<32x64xf32>
    %cst_67 = arith.constant dense<0.000000e+00> : vector<32x64xf32>
    %246 = tpu.matmul %245, %235, %cst_67 {dimension_numbers = #tpu.dot_dimension_numbers<[1], [0], [0], [1], [0, 0, 1, 1], [], []>} : vector<32x64xf32>, vector<64x64xf32>, vector<32x64xf32> -> vector<32x64xf32>
    %247 = vector.broadcast %238 : vector<1x64xf32> to vector<32x64xf32>
    %248 = arith.addf %246, %247 : vector<32x64xf32>
    %249 = arith.addf %248, %233 : vector<32x64xf32>
    %cst_68 = arith.constant dense<0.000000e+00> : vector<32xf32>
    %250 = vector.multi_reduction <add>, %249, %cst_68 [1] : vector<32x64xf32> to vector<32xf32>
    %251 = vector.shape_cast %250 : vector<32xf32> to vector<32x1xf32>
    %cst_69 = arith.constant 6.400000e+01 : f32
    %252 = vector.broadcast %cst_69 : f32 to vector<32x1xf32>
    %253 = arith.divf %251, %252 : vector<32x1xf32>
    %254 = vector.broadcast %253 : vector<32x1xf32> to vector<32x64xf32>
    %255 = arith.subf %249, %254 : vector<32x64xf32>
    %256 = arith.mulf %255, %255 : vector<32x64xf32>
    %cst_70 = arith.constant dense<0.000000e+00> : vector<32xf32>
    %257 = vector.multi_reduction <add>, %256, %cst_70 [1] : vector<32x64xf32> to vector<32xf32>
    %258 = vector.shape_cast %257 : vector<32xf32> to vector<32x1xf32>
    %cst_71 = arith.constant 6.400000e+01 : f32
    %259 = vector.broadcast %cst_71 : f32 to vector<32x1xf32>
    %260 = arith.divf %258, %259 : vector<32x1xf32>
    %261 = vector.broadcast %253 : vector<32x1xf32> to vector<32x64xf32>
    %262 = arith.subf %249, %261 : vector<32x64xf32>
    %cst_72 = arith.constant 9.99999974E-6 : f32
    %263 = vector.broadcast %cst_72 : f32 to vector<32x1xf32>
    %264 = arith.addf %260, %263 : vector<32x1xf32>
    %265 = math.rsqrt %264 : vector<32x1xf32>
    %266 = vector.broadcast %265 : vector<32x1xf32> to vector<32x64xf32>
    %267 = arith.mulf %262, %266 : vector<32x64xf32>
    %268 = vector.broadcast %239 : vector<1x64xf32> to vector<32x64xf32>
    %269 = arith.mulf %267, %268 : vector<32x64xf32>
    %270 = vector.broadcast %240 : vector<1x64xf32> to vector<32x64xf32>
    %271 = arith.addf %269, %270 : vector<32x64xf32>
    %c0_73 = arith.constant 0 : index
    %c0_74 = arith.constant 0 : index
    %272 = vector.load %arg16[%c0_73, %c0_74] : memref<4x64xf32, #tpu.memory_space<vmem>>, vector<4x64xf32>
    %c0_75 = arith.constant 0 : index
    %c0_76 = arith.constant 0 : index
    %273 = vector.load %arg17[%c0_75, %c0_76] : memref<64x64xf32, #tpu.memory_space<vmem>>, vector<64x64xf32>
    %c0_77 = arith.constant 0 : index
    %c0_78 = arith.constant 0 : index
    %274 = vector.load %arg18[%c0_77, %c0_78] : memref<3x64xf32, #tpu.memory_space<vmem>>, vector<3x64xf32>
    %275 = vector.extract_strided_slice %272 {offsets = [0, 0], sizes = [3, 64], strides = [1, 1]} : vector<4x64xf32> to vector<3x64xf32>
    %276 = vector.extract_strided_slice %272 {offsets = [3, 0], sizes = [1, 64], strides = [1, 1]} : vector<4x64xf32> to vector<1x64xf32>
    %277 = vector.extract_strided_slice %274 {offsets = [0, 0], sizes = [1, 64], strides = [1, 1]} : vector<3x64xf32> to vector<1x64xf32>
    %278 = vector.extract_strided_slice %274 {offsets = [1, 0], sizes = [1, 64], strides = [1, 1]} : vector<3x64xf32> to vector<1x64xf32>
    %279 = vector.extract_strided_slice %274 {offsets = [2, 0], sizes = [1, 64], strides = [1, 1]} : vector<3x64xf32> to vector<1x64xf32>
    %cst_79 = arith.constant 0.000000e+00 : f32
    %280 = vector.broadcast %cst_79 : f32 to vector<2x64xf32>
    %281 = vector.extract_strided_slice %271 {offsets = [0, 0], sizes = [16, 64], strides = [1, 1]} : vector<32x64xf32> to vector<16x64xf32>
    %282 = tpu.concatenate %280, %281 in 0 : vector<2x64xf32>, vector<16x64xf32> -> vector<18x64xf32>
    %283 = vector.extract_strided_slice %282 {offsets = [0, 0], sizes = [16, 64], strides = [1, 1]} : vector<18x64xf32> to vector<16x64xf32>
    %284 = vector.extract_strided_slice %275 {offsets = [0, 0], sizes = [1, 64], strides = [1, 1]} : vector<3x64xf32> to vector<1x64xf32>
    %285 = vector.broadcast %284 : vector<1x64xf32> to vector<16x64xf32>
    %286 = arith.mulf %283, %285 : vector<16x64xf32>
    %287 = vector.extract_strided_slice %282 {offsets = [1, 0], sizes = [16, 64], strides = [1, 1]} : vector<18x64xf32> to vector<16x64xf32>
    %288 = vector.extract_strided_slice %275 {offsets = [1, 0], sizes = [1, 64], strides = [1, 1]} : vector<3x64xf32> to vector<1x64xf32>
    %289 = vector.broadcast %288 : vector<1x64xf32> to vector<16x64xf32>
    %290 = arith.mulf %287, %289 : vector<16x64xf32>
    %291 = arith.addf %286, %290 : vector<16x64xf32>
    %292 = vector.extract_strided_slice %282 {offsets = [2, 0], sizes = [16, 64], strides = [1, 1]} : vector<18x64xf32> to vector<16x64xf32>
    %293 = vector.extract_strided_slice %275 {offsets = [2, 0], sizes = [1, 64], strides = [1, 1]} : vector<3x64xf32> to vector<1x64xf32>
    %294 = vector.broadcast %293 : vector<1x64xf32> to vector<16x64xf32>
    %295 = arith.mulf %292, %294 : vector<16x64xf32>
    %296 = arith.addf %291, %295 : vector<16x64xf32>
    %297 = vector.extract_strided_slice %271 {offsets = [16, 0], sizes = [16, 64], strides = [1, 1]} : vector<32x64xf32> to vector<16x64xf32>
    %298 = tpu.concatenate %280, %297 in 0 : vector<2x64xf32>, vector<16x64xf32> -> vector<18x64xf32>
    %299 = vector.extract_strided_slice %298 {offsets = [0, 0], sizes = [16, 64], strides = [1, 1]} : vector<18x64xf32> to vector<16x64xf32>
    %300 = vector.extract_strided_slice %275 {offsets = [0, 0], sizes = [1, 64], strides = [1, 1]} : vector<3x64xf32> to vector<1x64xf32>
    %301 = vector.broadcast %300 : vector<1x64xf32> to vector<16x64xf32>
    %302 = arith.mulf %299, %301 : vector<16x64xf32>
    %303 = vector.extract_strided_slice %298 {offsets = [1, 0], sizes = [16, 64], strides = [1, 1]} : vector<18x64xf32> to vector<16x64xf32>
    %304 = vector.extract_strided_slice %275 {offsets = [1, 0], sizes = [1, 64], strides = [1, 1]} : vector<3x64xf32> to vector<1x64xf32>
    %305 = vector.broadcast %304 : vector<1x64xf32> to vector<16x64xf32>
    %306 = arith.mulf %303, %305 : vector<16x64xf32>
    %307 = arith.addf %302, %306 : vector<16x64xf32>
    %308 = vector.extract_strided_slice %298 {offsets = [2, 0], sizes = [16, 64], strides = [1, 1]} : vector<18x64xf32> to vector<16x64xf32>
    %309 = vector.extract_strided_slice %275 {offsets = [2, 0], sizes = [1, 64], strides = [1, 1]} : vector<3x64xf32> to vector<1x64xf32>
    %310 = vector.broadcast %309 : vector<1x64xf32> to vector<16x64xf32>
    %311 = arith.mulf %308, %310 : vector<16x64xf32>
    %312 = arith.addf %307, %311 : vector<16x64xf32>
    %313 = tpu.concatenate %296, %312 in 0 : vector<16x64xf32>, vector<16x64xf32> -> vector<32x64xf32>
    %314 = vector.broadcast %276 : vector<1x64xf32> to vector<32x64xf32>
    %315 = arith.addf %313, %314 : vector<32x64xf32>
    %cst_80 = arith.constant 0.000000e+00 : f32
    %316 = vector.broadcast %cst_80 : f32 to vector<32x64xf32>
    %317 = arith.maximumf %315, %316 : vector<32x64xf32>
    %cst_81 = arith.constant dense<0.000000e+00> : vector<32x64xf32>
    %318 = tpu.matmul %317, %273, %cst_81 {dimension_numbers = #tpu.dot_dimension_numbers<[1], [0], [0], [1], [0, 0, 1, 1], [], []>} : vector<32x64xf32>, vector<64x64xf32>, vector<32x64xf32> -> vector<32x64xf32>
    %319 = vector.broadcast %277 : vector<1x64xf32> to vector<32x64xf32>
    %320 = arith.addf %318, %319 : vector<32x64xf32>
    %cst_82 = arith.constant 0.000000e+00 : f32
    %321 = vector.broadcast %cst_82 : f32 to vector<32x64xf32>
    %322 = arith.maximumf %320, %321 : vector<32x64xf32>
    %cst_83 = arith.constant dense<0.000000e+00> : vector<32xf32>
    %323 = vector.multi_reduction <add>, %322, %cst_83 [1] : vector<32x64xf32> to vector<32xf32>
    %324 = vector.shape_cast %323 : vector<32xf32> to vector<32x1xf32>
    %cst_84 = arith.constant 6.400000e+01 : f32
    %325 = vector.broadcast %cst_84 : f32 to vector<32x1xf32>
    %326 = arith.divf %324, %325 : vector<32x1xf32>
    %327 = vector.broadcast %326 : vector<32x1xf32> to vector<32x64xf32>
    %328 = arith.subf %322, %327 : vector<32x64xf32>
    %329 = arith.mulf %328, %328 : vector<32x64xf32>
    %cst_85 = arith.constant dense<0.000000e+00> : vector<32xf32>
    %330 = vector.multi_reduction <add>, %329, %cst_85 [1] : vector<32x64xf32> to vector<32xf32>
    %331 = vector.shape_cast %330 : vector<32xf32> to vector<32x1xf32>
    %cst_86 = arith.constant 6.400000e+01 : f32
    %332 = vector.broadcast %cst_86 : f32 to vector<32x1xf32>
    %333 = arith.divf %331, %332 : vector<32x1xf32>
    %334 = vector.broadcast %326 : vector<32x1xf32> to vector<32x64xf32>
    %335 = arith.subf %322, %334 : vector<32x64xf32>
    %cst_87 = arith.constant 9.99999974E-6 : f32
    %336 = vector.broadcast %cst_87 : f32 to vector<32x1xf32>
    %337 = arith.addf %333, %336 : vector<32x1xf32>
    %338 = math.rsqrt %337 : vector<32x1xf32>
    %339 = vector.broadcast %338 : vector<32x1xf32> to vector<32x64xf32>
    %340 = arith.mulf %335, %339 : vector<32x64xf32>
    %341 = vector.broadcast %278 : vector<1x64xf32> to vector<32x64xf32>
    %342 = arith.mulf %340, %341 : vector<32x64xf32>
    %343 = vector.broadcast %279 : vector<1x64xf32> to vector<32x64xf32>
    %344 = arith.addf %342, %343 : vector<32x64xf32>
    %c0_88 = arith.constant 0 : index
    %c0_89 = arith.constant 0 : index
    %345 = vector.load %arg19[%c0_88, %c0_89] : memref<64x64xf32, #tpu.memory_space<vmem>>, vector<64x64xf32>
    %c0_90 = arith.constant 0 : index
    %c0_91 = arith.constant 0 : index
    %346 = vector.load %arg20[%c0_90, %c0_91] : memref<64x64xf32, #tpu.memory_space<vmem>>, vector<64x64xf32>
    %c0_92 = arith.constant 0 : index
    %c0_93 = arith.constant 0 : index
    %347 = vector.load %arg21[%c0_92, %c0_93] : memref<4x64xf32, #tpu.memory_space<vmem>>, vector<4x64xf32>
    %348 = vector.extract_strided_slice %347 {offsets = [0, 0], sizes = [1, 64], strides = [1, 1]} : vector<4x64xf32> to vector<1x64xf32>
    %349 = vector.extract_strided_slice %347 {offsets = [1, 0], sizes = [1, 64], strides = [1, 1]} : vector<4x64xf32> to vector<1x64xf32>
    %350 = vector.extract_strided_slice %347 {offsets = [2, 0], sizes = [1, 64], strides = [1, 1]} : vector<4x64xf32> to vector<1x64xf32>
    %351 = vector.extract_strided_slice %347 {offsets = [3, 0], sizes = [1, 64], strides = [1, 1]} : vector<4x64xf32> to vector<1x64xf32>
    %cst_94 = arith.constant dense<0.000000e+00> : vector<32x64xf32>
    %352 = tpu.matmul %344, %345, %cst_94 {dimension_numbers = #tpu.dot_dimension_numbers<[1], [0], [0], [1], [0, 0, 1, 1], [], []>} : vector<32x64xf32>, vector<64x64xf32>, vector<32x64xf32> -> vector<32x64xf32>
    %353 = vector.broadcast %348 : vector<1x64xf32> to vector<32x64xf32>
    %354 = arith.addf %352, %353 : vector<32x64xf32>
    %cst_95 = arith.constant 0.000000e+00 : f32
    %355 = vector.broadcast %cst_95 : f32 to vector<32x64xf32>
    %356 = arith.maximumf %354, %355 : vector<32x64xf32>
    %cst_96 = arith.constant dense<0.000000e+00> : vector<32x64xf32>
    %357 = tpu.matmul %356, %346, %cst_96 {dimension_numbers = #tpu.dot_dimension_numbers<[1], [0], [0], [1], [0, 0, 1, 1], [], []>} : vector<32x64xf32>, vector<64x64xf32>, vector<32x64xf32> -> vector<32x64xf32>
    %358 = vector.broadcast %349 : vector<1x64xf32> to vector<32x64xf32>
    %359 = arith.addf %357, %358 : vector<32x64xf32>
    %360 = arith.addf %359, %344 : vector<32x64xf32>
    %cst_97 = arith.constant dense<0.000000e+00> : vector<32xf32>
    %361 = vector.multi_reduction <add>, %360, %cst_97 [1] : vector<32x64xf32> to vector<32xf32>
    %362 = vector.shape_cast %361 : vector<32xf32> to vector<32x1xf32>
    %cst_98 = arith.constant 6.400000e+01 : f32
    %363 = vector.broadcast %cst_98 : f32 to vector<32x1xf32>
    %364 = arith.divf %362, %363 : vector<32x1xf32>
    %365 = vector.broadcast %364 : vector<32x1xf32> to vector<32x64xf32>
    %366 = arith.subf %360, %365 : vector<32x64xf32>
    %367 = arith.mulf %366, %366 : vector<32x64xf32>
    %cst_99 = arith.constant dense<0.000000e+00> : vector<32xf32>
    %368 = vector.multi_reduction <add>, %367, %cst_99 [1] : vector<32x64xf32> to vector<32xf32>
    %369 = vector.shape_cast %368 : vector<32xf32> to vector<32x1xf32>
    %cst_100 = arith.constant 6.400000e+01 : f32
    %370 = vector.broadcast %cst_100 : f32 to vector<32x1xf32>
    %371 = arith.divf %369, %370 : vector<32x1xf32>
    %372 = vector.broadcast %364 : vector<32x1xf32> to vector<32x64xf32>
    %373 = arith.subf %360, %372 : vector<32x64xf32>
    %cst_101 = arith.constant 9.99999974E-6 : f32
    %374 = vector.broadcast %cst_101 : f32 to vector<32x1xf32>
    %375 = arith.addf %371, %374 : vector<32x1xf32>
    %376 = math.rsqrt %375 : vector<32x1xf32>
    %377 = vector.broadcast %376 : vector<32x1xf32> to vector<32x64xf32>
    %378 = arith.mulf %373, %377 : vector<32x64xf32>
    %379 = vector.broadcast %350 : vector<1x64xf32> to vector<32x64xf32>
    %380 = arith.mulf %378, %379 : vector<32x64xf32>
    %381 = vector.broadcast %351 : vector<1x64xf32> to vector<32x64xf32>
    %382 = arith.addf %380, %381 : vector<32x64xf32>
    %383 = vector.extract_strided_slice %382 {offsets = [0, 0], sizes = [16, 64], strides = [1, 1]} : vector<32x64xf32> to vector<16x64xf32>
    %c0_102 = arith.constant 0 : index
    %c0_103 = arith.constant 0 : index
    %c0_104 = arith.constant 0 : index
    %384 = vector.load %arg22[%c0_102, %c0_103, %c0_104] : memref<2x16x64xf32, #tpu.memory_space<vmem>>, vector<1x16x64xf32>
    %385 = vector.shape_cast %384 : vector<1x16x64xf32> to vector<16x64xf32>
    %386 = vector.shape_cast %383 : vector<16x64xf32> to vector<1x16x64xf32>
    tpu.vector_store %arg22[%c0_102, %c0_103, %c0_104], %386 {strides = array<i32>} : memref<2x16x64xf32, #tpu.memory_space<vmem>>, vector<1x16x64xf32>,
    %387 = vector.extract_strided_slice %382 {offsets = [16, 0], sizes = [16, 64], strides = [1, 1]} : vector<32x64xf32> to vector<16x64xf32>
    %c1_105 = arith.constant 1 : index
    %c0_106 = arith.constant 0 : index
    %c0_107 = arith.constant 0 : index
    %388 = vector.load %arg22[%c1_105, %c0_106, %c0_107] : memref<2x16x64xf32, #tpu.memory_space<vmem>>, vector<1x16x64xf32>
    %389 = vector.shape_cast %388 : vector<1x16x64xf32> to vector<16x64xf32>
    %390 = vector.shape_cast %387 : vector<16x64xf32> to vector<1x16x64xf32>
    tpu.vector_store %arg22[%c1_105, %c0_106, %c0_107], %390 {strides = array<i32>} : memref<2x16x64xf32, #tpu.memory_space<vmem>>, vector<1x16x64xf32>,
    return
  }
  func.func @transform_0(%arg0: i32) -> (i32, i32, i32) {
    %c0_i32 = arith.constant 0 : i32
    %c0_i32_0 = arith.constant 0 : i32
    %c0_i32_1 = arith.constant 0 : i32
    return %arg0, %c0_i32, %c0_i32_0 : i32, i32, i32
  }
  func.func @transform_1(%arg0: i32) -> (i32, i32) {
    %c0_i32 = arith.constant 0 : i32
    %c0_i32_0 = arith.constant 0 : i32
    %c0_i32_1 = arith.constant 0 : i32
    return %c0_i32, %c0_i32_0 : i32, i32
  }
  func.func @transform_2(%arg0: i32) -> (i32, i32) {
    %c0_i32 = arith.constant 0 : i32
    %c0_i32_0 = arith.constant 0 : i32
    %c0_i32_1 = arith.constant 0 : i32
    return %c0_i32, %c0_i32_0 : i32, i32
  }
  func.func @transform_3(%arg0: i32) -> (i32, i32) {
    %c0_i32 = arith.constant 0 : i32
    %c0_i32_0 = arith.constant 0 : i32
    %c0_i32_1 = arith.constant 0 : i32
    return %c0_i32, %c0_i32_0 : i32, i32
  }
  func.func @transform_4(%arg0: i32) -> (i32, i32) {
    %c0_i32 = arith.constant 0 : i32
    %c0_i32_0 = arith.constant 0 : i32
    %c0_i32_1 = arith.constant 0 : i32
    return %c0_i32, %c0_i32_0 : i32, i32
  }
  func.func @transform_5(%arg0: i32) -> (i32, i32) {
    %c0_i32 = arith.constant 0 : i32
    %c0_i32_0 = arith.constant 0 : i32
    %c0_i32_1 = arith.constant 0 : i32
    return %c0_i32, %c0_i32_0 : i32, i32
  }
  func.func @transform_6(%arg0: i32) -> (i32, i32) {
    %c0_i32 = arith.constant 0 : i32
    %c0_i32_0 = arith.constant 0 : i32
    %c0_i32_1 = arith.constant 0 : i32
    return %c0_i32, %c0_i32_0 : i32, i32
  }
  func.func @transform_7(%arg0: i32) -> (i32, i32) {
    %c0_i32 = arith.constant 0 : i32
    %c0_i32_0 = arith.constant 0 : i32
    %c0_i32_1 = arith.constant 0 : i32
    return %c0_i32, %c0_i32_0 : i32, i32
  }
  func.func @transform_8(%arg0: i32) -> (i32, i32) {
    %c0_i32 = arith.constant 0 : i32
    %c0_i32_0 = arith.constant 0 : i32
    %c0_i32_1 = arith.constant 0 : i32
    return %c0_i32, %c0_i32_0 : i32, i32
  }
  func.func @transform_9(%arg0: i32) -> (i32, i32) {
    %c0_i32 = arith.constant 0 : i32
    %c0_i32_0 = arith.constant 0 : i32
    %c0_i32_1 = arith.constant 0 : i32
    return %c0_i32, %c0_i32_0 : i32, i32
  }
  func.func @transform_10(%arg0: i32) -> (i32, i32) {
    %c0_i32 = arith.constant 0 : i32
    %c0_i32_0 = arith.constant 0 : i32
    %c0_i32_1 = arith.constant 0 : i32
    return %c0_i32, %c0_i32_0 : i32, i32
  }
  func.func @transform_11(%arg0: i32) -> (i32, i32) {
    %c0_i32 = arith.constant 0 : i32
    %c0_i32_0 = arith.constant 0 : i32
    %c0_i32_1 = arith.constant 0 : i32
    return %c0_i32, %c0_i32_0 : i32, i32
  }
  func.func @transform_12(%arg0: i32) -> (i32, i32) {
    %c0_i32 = arith.constant 0 : i32
    %c0_i32_0 = arith.constant 0 : i32
    %c0_i32_1 = arith.constant 0 : i32
    return %c0_i32, %c0_i32_0 : i32, i32
  }
  func.func @transform_13(%arg0: i32) -> (i32, i32) {
    %c0_i32 = arith.constant 0 : i32
    %c0_i32_0 = arith.constant 0 : i32
    %c0_i32_1 = arith.constant 0 : i32
    return %c0_i32, %c0_i32_0 : i32, i32
  }
  func.func @transform_14(%arg0: i32) -> (i32, i32) {
    %c0_i32 = arith.constant 0 : i32
    %c0_i32_0 = arith.constant 0 : i32
    %c0_i32_1 = arith.constant 0 : i32
    return %c0_i32, %c0_i32_0 : i32, i32
  }
  func.func @transform_15(%arg0: i32) -> (i32, i32) {
    %c0_i32 = arith.constant 0 : i32
    %c0_i32_0 = arith.constant 0 : i32
    %c0_i32_1 = arith.constant 0 : i32
    return %c0_i32, %c0_i32_0 : i32, i32
  }
  func.func @transform_16(%arg0: i32) -> (i32, i32) {
    %c0_i32 = arith.constant 0 : i32
    %c0_i32_0 = arith.constant 0 : i32
    %c0_i32_1 = arith.constant 0 : i32
    return %c0_i32, %c0_i32_0 : i32, i32
  }
  func.func @transform_17(%arg0: i32) -> (i32, i32) {
    %c0_i32 = arith.constant 0 : i32
    %c0_i32_0 = arith.constant 0 : i32
    %c0_i32_1 = arith.constant 0 : i32
    return %c0_i32, %c0_i32_0 : i32, i32
  }
  func.func @transform_18(%arg0: i32) -> (i32, i32) {
    %c0_i32 = arith.constant 0 : i32
    %c0_i32_0 = arith.constant 0 : i32
    %c0_i32_1 = arith.constant 0 : i32
    return %c0_i32, %c0_i32_0 : i32, i32
  }
  func.func @transform_19(%arg0: i32) -> (i32, i32) {
    %c0_i32 = arith.constant 0 : i32
    %c0_i32_0 = arith.constant 0 : i32
    %c0_i32_1 = arith.constant 0 : i32
    return %c0_i32, %c0_i32_0 : i32, i32
  }
  func.func @transform_20(%arg0: i32) -> (i32, i32) {
    %c0_i32 = arith.constant 0 : i32
    %c0_i32_0 = arith.constant 0 : i32
    %c0_i32_1 = arith.constant 0 : i32
    return %c0_i32, %c0_i32_0 : i32, i32
  }
  func.func @transform_21(%arg0: i32) -> (i32, i32, i32) {
    %c0_i32 = arith.constant 0 : i32
    %c0_i32_0 = arith.constant 0 : i32
    %c0_i32_1 = arith.constant 0 : i32
    return %arg0, %c0_i32, %c0_i32_0 : i32, i32, i32
  }
}

</mosaic_0001>

<bundles_post_ra>
// kernel: tpu_custom_call.1
= control target key start
LH: loop header
LB: loop body
LE: loop exit
PB: predicated region body
PF: predicated region fallthrough
CT: control target
= control target key end

     0   :  { %s3875_s0 = inlined_call_operand.vmem [shape: f32[2,16,4], index: 0, kind: input, shape index: {}]   ;;  %s3876_s1 = inlined_call_operand.hbm [shape: f32[16,32], index: 1, kind: input, shape index: {}]   ;;  %s3877_s2 = inlined_call_operand.hbm [shape: f32[3,32], index: 2, kind: input, shape index: {}]   ;;  %s3878_s3 = inlined_call_operand.hbm [shape: f32[4,32], index: 3, kind: input, shape index: {}]   ;;  %s3879_s4 = inlined_call_operand.hbm [shape: f32[32,64], index: 4, kind: input, shape index: {}]   ;;  %s3880_s5 = inlined_call_operand.hbm [shape: f32[3,64], index: 5, kind: input, shape index: {}]   ;;  %s3881_s6 = inlined_call_operand.hbm [shape: f32[64,64], index: 6, kind: input, shape index: {}]   ;;  %s3882_s7 = inlined_call_operand.vmem [shape: f32[64,64], index: 7, kind: input, shape index: {}]   ;;  %s3883_s8 = inlined_call_operand.vmem [shape: f32[4,64], index: 8, kind: input, shape index: {}]   ;;  %s3884_s9 = inlined_call_operand.vmem [shape: f32[4,64], index: 9, kind: input, shape index: {}]   ;;  %s3885_s10 = inlined_call_operand.hbm [shape: f32[64,64], index: 10, kind: input, shape index: {}]   ;;  %s3886_s11 = inlined_call_operand.vmem [shape: f32[3,64], index: 11, kind: input, shape index: {}]   ;;  %s3887_s12 = inlined_call_operand.hbm [shape: f32[64,64], index: 12, kind: input, shape index: {}]   ;;  %s3888_s13 = inlined_call_operand.hbm [shape: f32[64,64], index: 13, kind: input, shape index: {}]   ;;  %s3889_s14 = inlined_call_operand.vmem [shape: f32[4,64], index: 14, kind: input, shape index: {}]   ;;  %s3890_s15 = inlined_call_operand.vmem [shape: f32[4,64], index: 15, kind: input, shape index: {}]   ;;  %s3891_s16 = inlined_call_operand.hbm [shape: f32[64,64], index: 16, kind: input, shape index: {}]   ;;  %s3892_s17 = inlined_call_operand.vmem [shape: f32[3,64], index: 17, kind: input, shape index: {}]   ;;  %s3893_s18 = inlined_call_operand.hbm [shape: f32[64,64], index: 18, kind: input, shape index: {}]   ;;  %s3894_s19 = inlined_call_operand.hbm [shape: f32[64,64], index: 19, kind: input, shape index: {}]   ;;  %s3895_s20 = inlined_call_operand.vmem [shape: f32[4,64], index: 20, kind: input, shape index: {}]   ;;  %s3896_s21 = inlined_call_operand.hbm [shape: f32[2,16,64], index: 21, kind: output, shape index: {}]  }
   0x1   :  { %3904 = sst [smem:[#allocation31_spill]] %s3875_s0 }
   0x2   :  { %3905 = sst [smem:[#allocation32_spill]] %s3876_s1 }
   0x3   :  { %3906 = sst [smem:[#allocation33_spill]] %s3877_s2 }
   0x4   :  { %3907 = sst [smem:[#allocation34_spill]] %s3878_s3 }
   0x5   :  { %3908 = sst [smem:[#allocation35_spill]] %s3879_s4 }
   0x6   :  { %3909 = sst [smem:[#allocation36_spill]] %s3880_s5 }
   0x7   :  { %3910 = sst [smem:[#allocation37_spill]] %s3896_s21 }
   0x8   :  { %26 = vsyncpa [#allocation3], 0 }
   0x9   :  { %27 = vsyncpa [#allocation6], 0 }
   0xa   :  { %28 = vsyncpa [#allocation9], 0 }
   0xb   :  { %29 = vsyncpa [#allocation12], 0 }
   0xc   :  { %30 = vsyncpa [#allocation15], 0 }
   0xd   :  { %31 = vsyncpa [#allocation18], 0 }
   0xe   :  { %32 = vsyncpa [#allocation21], 0 }
   0xf   :  { %33 = vsyncpa [#allocation4], 0  ;;  %s3159_s2 = smov [#allocation5]   ;;  %s3911_s3 = sld [smem:[#allocation33_spill]] }
  0x10   :  { %s54_s25 = sshll.u32 %s3159_s2, 4  ;;  %s55_s25 = int_to_ptr.vmem [resolvable:$true] %s54_s25 }
  0x15   :  { %s2857_s28 = scalar_lea.hbm %s3911_s3, 64 }
  0x16   :  { %p2858_p0 = scmp.ne.s32.totalorder %s3911_s3, %s2857_s28  ;;  %p2861_p1 = scmp.lt.u32.totalorder %s2857_s28, %s3911_s3 }
  0x18   :  { %p2863_p2 = pnand %p2861_p1, %p2858_p0 }
  0x1a   :  { %2866 = shalt.err (!%p2863_p2)
}
  0x1b   :  { %s2867_s5 = scalar_lea.vmem %s55_s25, 64  ;;  %p2872_p4 = scmp.lt.s32.totalorder %s55_s25, %s55_s25 }
  0x1c   :  { %p2868_p3 = scmp.ne.s32.totalorder %s55_s25, %s2867_s5  ;;  %p2873_p5 = scmp.lt.s32.totalorder %s2867_s5, %s2867_s5 }
  0x1e   :  { %p2874_p6 = por %p2873_p5, %p2872_p4 }
  0x20   :  { %p2875_p7 = pnand %p2874_p6, %p2868_p3 }
  0x22   :  { %2878 = shalt.err (!%p2875_p7)
}
  0x23   :  { %57 = dma.hbm_to_vmem [thread:$0]  %s3911_s3, 64, %s55_s25, [#allocation6]  }
  0x24   :  { %s3160_s1 = smov [#allocation8]   ;;  %s3161_s2 = smov [#allocation11]  }
  0x25   :  { %s73_s24 = sshll.u32 %s3160_s1, 4  ;;  %s95_s26 = sshll.u32 %s3161_s2, 4  ;;  %s74_s24 = int_to_ptr.vmem [resolvable:$true] %s73_s24  ;;  %s96_s26 = int_to_ptr.vmem [resolvable:$true] %s95_s26 }
  0x26   :  { %s3912_s29 = sld [smem:[#allocation35_spill]] }
  0x2c   :  { %s2879_s0 = scalar_lea.hbm %s3912_s29, 512 }
  0x2d   :  { %p2880_p8 = scmp.ne.s32.totalorder %s3912_s29, %s2879_s0  ;;  %p2883_p9 = scmp.lt.u32.totalorder %s2879_s0, %s3912_s29 }
  0x2f   :  { %p2885_p10 = pnand %p2883_p9, %p2880_p8 }
  0x31   :  { %2888 = shalt.err (!%p2885_p10)
}
  0x32   :  { %s2889_s25 = scalar_lea.vmem %s74_s24, 512  ;;  %p2894_p12 = scmp.lt.s32.totalorder %s74_s24, %s74_s24 }
  0x33   :  { %p2890_p11 = scmp.ne.s32.totalorder %s74_s24, %s2889_s25  ;;  %p2895_p13 = scmp.lt.s32.totalorder %s2889_s25, %s2889_s25 }
  0x35   :  { %p2896_p0 = por %p2895_p13, %p2894_p12 }
  0x37   :  { %p2897_p1 = pnand %p2896_p0, %p2890_p11 }
  0x39   :  { %2900 = shalt.err (!%p2897_p1)
}
  0x3a   :  { %s3162_s3 = smov 128   ;;  %s3163_s22 = smov 8  }
  0x3b   :  { %79 = dma.hbm_to_vmem [thread:$0]  %s3912_s29, 512, %s74_s24, [#allocation9], %s3162_s3, %s3162_s3, %s3163_s22  }
  0x3c   :  { %s2901_s27 = scalar_lea.hbm %s3881_s6, 1024 }
  0x3d   :  { %p2902_p2 = scmp.ne.s32.totalorder %s3881_s6, %s2901_s27  ;;  %p2905_p3 = scmp.lt.u32.totalorder %s2901_s27, %s3881_s6 }
  0x3f   :  { %p2907_p4 = pnand %p2905_p3, %p2902_p2 }
  0x41   :  { %2910 = shalt.err (!%p2907_p4)
}
  0x42   :  { %s2911_s5 = scalar_lea.vmem %s96_s26, 1024  ;;  %p2916_p6 = scmp.lt.s32.totalorder %s96_s26, %s96_s26 }
  0x43   :  { %p2912_p5 = scmp.ne.s32.totalorder %s96_s26, %s2911_s5  ;;  %p2917_p7 = scmp.lt.s32.totalorder %s2911_s5, %s2911_s5 }
  0x45   :  { %p2918_p8 = por %p2917_p7, %p2916_p6 }
  0x47   :  { %p2919_p9 = pnand %p2918_p8, %p2912_p5 }
  0x49   :  { %2922 = shalt.err (!%p2919_p9)
}
  0x4a   :  { %101 = dma.hbm_to_vmem [thread:$0]  %s3881_s6, 1024, %s96_s26, [#allocation12], %s3162_s3, %s3162_s3, %s3163_s22  }
  0x4b   :  { %s3164_s25 = smov [#allocation14]   ;;  %s3165_s1 = smov [#allocation17]  }
  0x4c   :  { %s127_s23 = sshll.u32 %s3164_s25, 4  ;;  %s155_s21 = sshll.u32 %s3165_s1, 4  ;;  %s128_s23 = int_to_ptr.vmem [resolvable:$true] %s127_s23  ;;  %s156_s21 = int_to_ptr.vmem [resolvable:$true] %s155_s21 }
  0x4d   :  { %s2923_s28 = scalar_lea.hbm %s3887_s12, 1024 }
  0x4e   :  { %p2924_p10 = scmp.ne.s32.totalorder %s3887_s12, %s2923_s28  ;;  %p2927_p11 = scmp.lt.u32.totalorder %s2923_s28, %s3887_s12 }
  0x50   :  { %p2929_p12 = pnand %p2927_p11, %p2924_p10 }
  0x52   :  { %2932 = shalt.err (!%p2929_p12)
}
  0x53   :  { %s2933_s6 = scalar_lea.vmem %s128_s23, 1024  ;;  %p2938_p0 = scmp.lt.s32.totalorder %s128_s23, %s128_s23 }
  0x54   :  { %p2934_p13 = scmp.ne.s32.totalorder %s128_s23, %s2933_s6  ;;  %p2939_p1 = scmp.lt.s32.totalorder %s2933_s6, %s2933_s6 }
  0x56   :  { %p2940_p2 = por %p2939_p1, %p2938_p0 }
  0x58   :  { %p2941_p3 = pnand %p2940_p2, %p2934_p13 }
  0x5a   :  { %2944 = shalt.err (!%p2941_p3)
}
  0x5b   :  { %133 = dma.hbm_to_vmem [thread:$0]  %s3887_s12, 1024, %s128_s23, [#allocation15], %s3162_s3, %s3162_s3, %s3163_s22  }
  0x5c   :  { %s2945_s1 = scalar_lea.hbm %s3891_s16, 1024 }
  0x5d   :  { %p2946_p4 = scmp.ne.s32.totalorder %s3891_s16, %s2945_s1  ;;  %p2949_p5 = scmp.lt.u32.totalorder %s2945_s1, %s3891_s16 }
  0x5f   :  { %p2951_p6 = pnand %p2949_p5, %p2946_p4 }
  0x61   :  { %2954 = shalt.err (!%p2951_p6)
}
  0x62   :  { %s2955_s4 = scalar_lea.vmem %s156_s21, 1024  ;;  %p2960_p8 = scmp.lt.s32.totalorder %s156_s21, %s156_s21 }
  0x63   :  { %p2956_p7 = scmp.ne.s32.totalorder %s156_s21, %s2955_s4  ;;  %p2961_p9 = scmp.lt.s32.totalorder %s2955_s4, %s2955_s4 }
  0x65   :  { %p2962_p10 = por %p2961_p9, %p2960_p8 }
  0x67   :  { %p2963_p11 = pnand %p2962_p10, %p2956_p7 }
  0x69   :  { %2966 = shalt.err (!%p2963_p11)
}
  0x6a   :  { %161 = dma.hbm_to_vmem [thread:$0]  %s3891_s16, 1024, %s156_s21, [#allocation18], %s3162_s3, %s3162_s3, %s3163_s22  }
  0x6b   :  { %s3166_s30 = smov [#allocation2]   ;;  %s3167_s6 = smov [#allocation7]  }
  0x6c   :  { %s41_s5 = sshll.u32 %s3166_s30, 4  ;;  %s64_s26 = sshll.u32 %s3167_s6, 4  ;;  %s42_s5 = int_to_ptr.vmem [resolvable:$true] %s41_s5  ;;  %s65_s26 = int_to_ptr.vmem [resolvable:$true] %s64_s26 }
  0x6d   :  { %s3913_s25 = sld [smem:[#allocation32_spill]] }
  0x73   :  { %s2967_s1 = scalar_lea.hbm %s3913_s25, 256 }
  0x74   :  { %p2968_p12 = scmp.ne.s32.totalorder %s3913_s25, %s2967_s1  ;;  %p2971_p13 = scmp.lt.u32.totalorder %s2967_s1, %s3913_s25 }
  0x76   :  { %p2973_p0 = pnand %p2971_p13, %p2968_p12 }
  0x78   :  { %2976 = shalt.err (!%p2973_p0)
}
  0x79   :  { %s2977_s16 = scalar_lea.vmem %s42_s5, 256  ;;  %p2982_p2 = scmp.lt.s32.totalorder %s42_s5, %s42_s5 }
  0x7a   :  { %p2978_p1 = scmp.ne.s32.totalorder %s42_s5, %s2977_s16  ;;  %p2983_p3 = scmp.lt.s32.totalorder %s2977_s16, %s2977_s16 }
  0x7c   :  { %p2984_p4 = por %p2983_p3, %p2982_p2 }
  0x7e   :  { %p2985_p5 = pnand %p2984_p4, %p2978_p1 }
  0x80   :  { %2988 = shalt.err (!%p2985_p5)
}
  0x81   :  { %47 = dma.hbm_to_vmem [thread:$0]  %s3913_s25, 256, %s42_s5, [#allocation3], %s3162_s3, %s3162_s3, %s3163_s22  }
  0x82   :  { %s3914_s30 = sld [smem:[#allocation34_spill]] }
  0x88   :  { %s2989_s6 = scalar_lea.hbm %s3914_s30, 64 }
  0x89   :  { %p2990_p6 = scmp.ne.s32.totalorder %s3914_s30, %s2989_s6  ;;  %p2993_p7 = scmp.lt.u32.totalorder %s2989_s6, %s3914_s30 }
  0x8b   :  { %p2995_p8 = pnand %p2993_p7, %p2990_p6 }
  0x8d   :  { %2998 = shalt.err (!%p2995_p8)
}
  0x8e   :  { %s2999_s27 = scalar_lea.vmem %s65_s26, 64  ;;  %p3004_p10 = scmp.lt.s32.totalorder %s65_s26, %s65_s26 }
  0x8f   :  { %p3000_p9 = scmp.ne.s32.totalorder %s65_s26, %s2999_s27  ;;  %p3005_p11 = scmp.lt.s32.totalorder %s2999_s27, %s2999_s27 }
  0x91   :  { %p3006_p12 = por %p3005_p11, %p3004_p10 }
  0x93   :  { %p3007_p13 = pnand %p3006_p12, %p3000_p9 }
  0x95   :  { %3010 = shalt.err (!%p3007_p13)
}
  0x96   :  { %67 = dma.hbm_to_vmem [thread:$0]  %s3914_s30, 64, %s65_s26, [#allocation6]  }
  0x97   :  { %s3168_s28 = smov [#allocation10]   ;;  %s3169_s16 = smov [#allocation13]  }
  0x98   :  { %s86_s0 = sshll.u32 %s3168_s28, 4  ;;  %s113_s21 = sshll.u32 %s3169_s16, 4  ;;  %s87_s0 = int_to_ptr.vmem [resolvable:$true] %s86_s0  ;;  %s114_s21 = int_to_ptr.vmem [resolvable:$true] %s113_s21 }
  0x99   :  { %s3915_s23 = sld [smem:[#allocation36_spill]] }
  0x9f   :  { %s3011_s6 = scalar_lea.hbm %s3915_s23, 64 }
  0xa0   :  { %p3012_p0 = scmp.ne.s32.totalorder %s3915_s23, %s3011_s6  ;;  %p3015_p1 = scmp.lt.u32.totalorder %s3011_s6, %s3915_s23 }
  0xa2   :  { %p3017_p2 = pnand %p3015_p1, %p3012_p0 }
  0xa4   :  { %3020 = shalt.err (!%p3017_p2)
}
  0xa5   :  { %s3021_s26 = scalar_lea.vmem %s87_s0, 64  ;;  %p3026_p4 = scmp.lt.s32.totalorder %s87_s0, %s87_s0 }
  0xa6   :  { %p3022_p3 = scmp.ne.s32.totalorder %s87_s0, %s3021_s26  ;;  %p3027_p5 = scmp.lt.s32.totalorder %s3021_s26, %s3021_s26 }
  0xa8   :  { %p3028_p6 = por %p3027_p5, %p3026_p4 }
  0xaa   :  { %p3029_p7 = pnand %p3028_p6, %p3022_p3 }
  0xac   :  { %3032 = shalt.err (!%p3029_p7)
}
  0xad   :  { %89 = dma.hbm_to_vmem [thread:$0]  %s3915_s23, 64, %s87_s0, [#allocation9]  }
  0xae   :  { %s3033_s28 = scalar_lea.hbm %s3885_s10, 1024 }
  0xaf   :  { %p3034_p8 = scmp.ne.s32.totalorder %s3885_s10, %s3033_s28  ;;  %p3037_p9 = scmp.lt.u32.totalorder %s3033_s28, %s3885_s10 }
  0xb1   :  { %p3039_p10 = pnand %p3037_p9, %p3034_p8 }
  0xb3   :  { %3042 = shalt.err (!%p3039_p10)
}
  0xb4   :  { %s3043_s24 = scalar_lea.vmem %s114_s21, 1024  ;;  %p3048_p12 = scmp.lt.s32.totalorder %s114_s21, %s114_s21 }
  0xb5   :  { %p3044_p11 = scmp.ne.s32.totalorder %s114_s21, %s3043_s24  ;;  %p3049_p13 = scmp.lt.s32.totalorder %s3043_s24, %s3043_s24 }
  0xb7   :  { %p3050_p0 = por %p3049_p13, %p3048_p12 }
  0xb9   :  { %p3051_p1 = pnand %p3050_p0, %p3044_p11 }
  0xbb   :  { %3054 = shalt.err (!%p3051_p1)
}
  0xbc   :  { %119 = dma.hbm_to_vmem [thread:$0]  %s3885_s10, 1024, %s114_s21, [#allocation12], %s3162_s3, %s3162_s3, %s3163_s22  }
  0xbd   :  { %s3170_s29 = smov [#allocation16]   ;;  %s3171_s2 = smov [#allocation19]  }
  0xbe   :  { %s139_s1 = sshll.u32 %s3170_s29, 4  ;;  %s169_s26 = sshll.u32 %s3171_s2, 4  ;;  %s140_s1 = int_to_ptr.vmem [resolvable:$true] %s139_s1  ;;  %s170_s26 = int_to_ptr.vmem [resolvable:$true] %s169_s26 }
  0xbf   :  { %s3055_s5 = scalar_lea.hbm %s3888_s13, 1024 }
  0xc0   :  { %p3056_p2 = scmp.ne.s32.totalorder %s3888_s13, %s3055_s5  ;;  %p3059_p3 = scmp.lt.u32.totalorder %s3055_s5, %s3888_s13 }
  0xc2   :  { %p3061_p4 = pnand %p3059_p3, %p3056_p2 }
  0xc4   :  { %3064 = shalt.err (!%p3061_p4)
}
  0xc5   :  { %s3065_s10 = scalar_lea.vmem %s140_s1, 1024  ;;  %p3070_p6 = scmp.lt.s32.totalorder %s140_s1, %s140_s1 }
  0xc6   :  { %p3066_p5 = scmp.ne.s32.totalorder %s140_s1, %s3065_s10  ;;  %p3071_p7 = scmp.lt.s32.totalorder %s3065_s10, %s3065_s10 }
  0xc8   :  { %p3072_p8 = por %p3071_p7, %p3070_p6 }
  0xca   :  { %p3073_p9 = pnand %p3072_p8, %p3066_p5 }
  0xcc   :  { %3076 = shalt.err (!%p3073_p9)
}
  0xcd   :  { %145 = dma.hbm_to_vmem [thread:$0]  %s3888_s13, 1024, %s140_s1, [#allocation15], %s3162_s3, %s3162_s3, %s3163_s22  }
  0xce   :  { %s3077_s0 = scalar_lea.hbm %s3893_s18, 1024 }
  0xcf   :  { %p3078_p10 = scmp.ne.s32.totalorder %s3893_s18, %s3077_s0  ;;  %p3081_p11 = scmp.lt.u32.totalorder %s3077_s0, %s3893_s18 }
  0xd1   :  { %p3083_p12 = pnand %p3081_p11, %p3078_p10 }
  0xd3   :  { %3086 = shalt.err (!%p3083_p12)
}
  0xd4   :  { %s3087_s27 = scalar_lea.vmem %s170_s26, 1024  ;;  %p3092_p0 = scmp.lt.s32.totalorder %s170_s26, %s170_s26 }
  0xd5   :  { %p3088_p13 = scmp.ne.s32.totalorder %s170_s26, %s3087_s27  ;;  %p3093_p1 = scmp.lt.s32.totalorder %s3087_s27, %s3087_s27 }
  0xd7   :  { %p3094_p2 = por %p3093_p1, %p3092_p0 }
  0xd9   :  { %p3095_p3 = pnand %p3094_p2, %p3088_p13 }
  0xdb   :  { %3098 = shalt.err (!%p3095_p3)
}
  0xdc   :  { %175 = dma.hbm_to_vmem [thread:$0]  %s3893_s18, 1024, %s170_s26, [#allocation18], %s3162_s3, %s3162_s3, %s3163_s22  }
  0xdd   :  { %s3172_s5 = smov [#allocation20]   ;;  %s3099_s4 = scalar_lea.hbm %s3894_s19, 1024 }
  0xde   :  { %s181_s25 = sshll.u32 %s3172_s5, 4  ;;  %p3100_p4 = scmp.ne.s32.totalorder %s3894_s19, %s3099_s4  ;;  %s182_s25 = int_to_ptr.vmem [resolvable:$true] %s181_s25 }
  0xdf   :  { %p3103_p5 = scmp.lt.u32.totalorder %s3099_s4, %s3894_s19 }
  0xe1   :  { %p3105_p6 = pnand %p3103_p5, %p3100_p4 }
  0xe3   :  { %3108 = shalt.err (!%p3105_p6)
}
  0xe4   :  { %s3109_s24 = scalar_lea.vmem %s182_s25, 1024  ;;  %p3114_p8 = scmp.lt.s32.totalorder %s182_s25, %s182_s25 }
  0xe5   :  { %p3110_p7 = scmp.ne.s32.totalorder %s182_s25, %s3109_s24  ;;  %p3115_p9 = scmp.lt.s32.totalorder %s3109_s24, %s3109_s24 }
  0xe7   :  { %p3116_p10 = por %p3115_p9, %p3114_p8 }
  0xe9   :  { %p3117_p11 = pnand %p3116_p10, %p3110_p7 }
  0xeb   :  { %3120 = shalt.err (!%p3117_p11)
}
  0xec   :  { %187 = dma.hbm_to_vmem [thread:$0]  %s3894_s19, 1024, %s182_s25, [#allocation21], %s3162_s3, %s3162_s3, %s3163_s22  }
  0xed   :  { %3143 = dma.done.wait [#allocation3], 256  }
  0xee   :  { %3144 = vsyncadd [#allocation3], 4294967040 }
  0xef   :  { %3145 = dma.done.wait [#allocation6], 128  }
  0xf0   :  { %3146 = vsyncadd [#allocation6], 4294967168 }
  0xf1   :  { %3147 = dma.done.wait [#allocation9], 576  }
  0xf2   :  { %3148 = vsyncadd [#allocation9], 4294966720 }
  0xf3   :  { %3149 = dma.done.wait [#allocation12], 2048  }
  0xf4   :  { %3150 = vsyncadd [#allocation12], 4294965248 }
  0xf5   :  { %3151 = dma.done.wait [#allocation15], 2048  }
  0xf6   :  { %3152 = vsyncadd [#allocation15], 4294965248 }
  0xf7   :  { %3153 = dma.done.wait [#allocation18], 2048  }
  0xf8   :  { %3154 = vsyncadd [#allocation18], 4294965248 }
  0xf9   :  { %3155 = dma.done.wait [#allocation21], 1024  }
  0xfa   :  { %3156 = vsyncadd [#allocation21], 4294966272  ;;  %s3916_s29 = sld [smem:[#allocation31_spill]]  ;;  %vm233_vm0 = vcmask 1042432   ;;  %v226_v4 = vld [vmem:[#allocation2] sm:$0xff]  ;;  %v227_v5 = vld [vmem:[#allocation2 + $0x8] sm:$0xff] }
  0xfb   :  { %vm253_vm1 = vcmask 1045504   ;;  %vm241_vm2 = vcmask 1046528   ;;  %v2644_v8 = vpack.c.bf16 %v227_v5, %v226_v4  ;;  %s3173_s5 = smov 4   ;;  %vm265_vm3 = vcmask 1044480   ;;  %s3174_s25 = smov 12  }
  0xfc   :  { %vm277_vm4 = vcmask 31744   ;;  %vm280_vm5 = vcmask 64512   ;;  %vm283_vm6 = vcmask 97280   ;;  %vm341_vm7 = vcmask 130048  }
  0xfd   :  { %2645 = vmatprep.subr.bf16.mxu0 %v2644_v8  ;;  %v337_v5 = vlaneseq  ;;  %vm443_vm8 = vcmask 261120   ;;  %vm521_vm9 = vcmask 1041408   ;;  %vm731_vm10 = vcmask 523264  }
  0xfe   :  { %2647 = vmatpush3.bf16.msra.mxu0 %v2644_v8  ;;  %v3510_v8 = vld [vmem:[#allocation5] sm:$0x7] }
 0x100   :  { %v229_v0 = vld [vmem:[%s3916_s29] sm:$0xff]  ;;  %v230_v1 = vld [vmem:[%s3916_s29 + $0x8] sm:$0xff]  ;;  %v2292_v6 = vld [vmem:[%s3916_s29 + $0x10] sm:$0xff] }
 0x101   :  { %v234_v2 = vrot.slane %v229_v0, 5  ;;  %v235_v3 = vrot.slane %v230_v1, 5  ;;  %v2293_v7 = vld [vmem:[%s3916_s29 + $0x18] sm:$0xff]  ;;  %v291_v17 = vrot.slane %v2292_v6, 5  ;;  %v3505_v6 = vshrl.u32 %v337_v5, 7 }
 0x102   :  { %v292_v18 = vrot.slane %v2293_v7, 5 }
 0x103   :  { %v236_v9 = vsel %vm233_vm0, %v234_v2, %v235_v3  ;;  %v239_v10 = vsel %vm233_vm0, 0.0, %v234_v2  ;;  %v257_v11 = vrot.slane %v235_v3, 2  ;;  %v245_v12 = vrot.slane %v235_v3, 1 }
 0x104   :  { %v254_v13 = vrot.slane %v239_v10, 2  ;;  %v255_v14 = vrot.slane %v236_v9, 2  ;;  %v242_v15 = vrot.slane %v239_v10, 1  ;;  %v243_v16 = vrot.slane %v236_v9, 1 }
 0x105   :  { %v267_v21 = vrot.slane %v236_v9, 3  ;;  %v269_v22 = vrot.slane %v235_v3, 3  ;;  %v266_v25 = vrot.slane %v239_v10, 3  ;;  %v293_v26 = vsel %vm233_vm0, %v291_v17, %v292_v18 }
 0x106   :  { %v256_v19 = vsel %vm253_vm1, %v254_v13, %v255_v14  ;;  %v244_v20 = vsel %vm241_vm2, %v242_v15, %v243_v16  ;;  %v258_v23 = vsel %vm253_vm1, %v255_v14, %v257_v11  ;;  %v246_v24 = vsel %vm241_vm2, %v243_v16, %v245_v12 }
 0x107   :  { %259 = vrot.lane.b32.xlu1 %v256_v19, %s3163_s22  ;;  %247 = vrot.lane.b32.xlu0 %v244_v20, %s3173_s5  ;;  %v296_v27 = vsel %vm233_vm0, 0.0, %v291_v17  ;;  %v270_v28 = vsel %vm265_vm3, %v267_v21, %v269_v22  ;;  %v268_v29 = vsel %vm265_vm3, %v266_v25, %v267_v21  ;;  %v299_v30 = vrot.slane %v293_v26, 1 }
 0x108   :  { %v301_v31 = vrot.slane %v292_v18, 1  ;;  %v298_v32 = vrot.slane %v296_v27, 1  ;;  %v310_v33 = vrot.slane %v293_v26, 2  ;;  %v312_v36 = vrot.slane %v292_v18, 2 }
 0x109   :  { %v309_v37 = vrot.slane %v296_v27, 2  ;;  %v321_v38 = vrot.slane %v293_v26, 3  ;;  %v323_v41 = vrot.slane %v292_v18, 3  ;;  %v320_v42 = vrot.slane %v296_v27, 3 }
 0x10a   :  { %v302_v34 = vsel %vm241_vm2, %v299_v30, %v301_v31  ;;  %v300_v35 = vsel %vm241_vm2, %v298_v32, %v299_v30  ;;  %v313_v39 = vsel %vm253_vm1, %v310_v33, %v312_v36  ;;  %v3508_v7 = vsub.s32 0, %v3505_v6 }
 0x10b   :  { %261 = vrot.lane.b32.xlu1 %v258_v23, %s3163_s22  ;;  %249 = vrot.lane.b32.xlu0 %v246_v24, %s3173_s5  ;;  %v311_v40 = vsel %vm253_vm1, %v309_v37, %v310_v33  ;;  %v324_v43 = vsel %vm265_vm3, %v321_v38, %v323_v41  ;;  %v322_v44 = vsel %vm265_vm3, %v320_v42, %v321_v38 }
 0x10f   :  { %273 = vrot.lane.b32.xlu1 %v270_v28, %s3174_s25  ;;  %271 = vrot.lane.b32.xlu0 %v268_v29, %s3174_s25 }
 0x113   :  { %305 = vrot.lane.b32.xlu1 %v302_v34, %s3173_s5  ;;  %303 = vrot.lane.b32.xlu0 %v300_v35, %s3173_s5 }
 0x117   :  { %316 = vrot.lane.b32.xlu1 %v313_v39, %s3163_s22  ;;  %314 = vrot.lane.b32.xlu0 %v311_v40, %s3163_s22 }
 0x11b   :  { %327 = vrot.lane.b32.xlu1 %v324_v43, %s3174_s25  ;;  %325 = vrot.lane.b32.xlu0 %v322_v44, %s3174_s25 }
 0x179   :  { %v260_v45 = vpop.permute.xlu1 %259  ;;  %v248_v46 = vpop.permute.xlu0 %247 }
 0x17a   :  { %v278_v49 = vsel %vm277_vm4, %v239_v10, %v248_v46  ;;  %v514_v46 = vld [vmem:[#allocation8] sm:$0xff] }
 0x17b   :  { %v281_v54 = vsel %vm280_vm5, %v278_v49, %v260_v45  ;;  %v516_v49 = vld [vmem:[#allocation8 + $0x10] sm:$0xff] }
 0x17d   :  { %v262_v47 = vpop.permute.xlu1 %261  ;;  %v250_v48 = vpop.permute.xlu0 %249 }
 0x17e   :  { %v279_v50 = vsel %vm277_vm4, %v236_v9, %v250_v48  ;;  %v340_v9 = vrot.slane %v3510_v8, %v3508_v7 }
 0x17f   :  { %v282_v52 = vsel %vm280_vm5, %v279_v50, %v262_v47  ;;  %v515_v47 = vld [vmem:[#allocation8 + $0x8] sm:$0xff]  ;;  %v517_v50 = vld [vmem:[#allocation8 + $0x18] sm:$0xff] }
 0x180   :  { %v2648_v48 = vpack.c.bf16 %v515_v47, %v514_v46 }
 0x181   :  { %v274_v51 = vpop.permute.xlu1 %273  ;;  %v272_v53 = vpop.permute.xlu0 %271 }
 0x182   :  { %v285_v55 = vsel %vm283_vm6, %v282_v52, %v274_v51  ;;  %v284_v56 = vsel %vm283_vm6, %v281_v54, %v272_v53  ;;  %2649 = vmatprep.subr.bf16.mxu1 %v2648_v48  ;;  %v2652_v51 = vpack.c.bf16 %v517_v50, %v516_v49 }
 0x183   :  { %2448 = vmatprep.mubr.msk.f32.mxu0 %vm341_vm7, %v284_v56  ;;  %2651 = vmatpush3.bf16.msra.mxu1 %v2648_v48 }
 0x184   :  { %2449 = vmatmul.mubr.msk.f32.vlgmr.msra.gmra.mrb[0].mxu0 %vm341_vm7, %v285_v55  ;;  %2653 = vmatprep.subr.bf16.mxu1 %v2652_v51 }
 0x185   :  { %v306_v57 = vpop.permute.xlu1 %305  ;;  %v304_v58 = vpop.permute.xlu0 %303 }
 0x186   :  { %v332_v61 = vsel %vm277_vm4, %v293_v26, %v306_v57  ;;  %v331_v62 = vsel %vm277_vm4, %v296_v27, %v304_v58  ;;  %v3531_v58 = vsub.s32 1, %v3505_v6 }
 0x187   :  { %2655 = vmatpush3.bf16.msra.mxu1 %v2652_v51 }
 0x189   :  { %v317_v59 = vpop.permute.xlu1 %316  ;;  %v315_v60 = vpop.permute.xlu0 %314 }
 0x18a   :  { %v334_v63 = vsel %vm280_vm5, %v332_v61, %v317_v59  ;;  %v333_v0 = vsel %vm280_vm5, %v331_v62, %v315_v60  ;;  %v3534_v59 = vsub.s32 2, %v3505_v6  ;;  %v500_v61 = vrot.slane %v3510_v8, %v3531_v58 }
 0x18d   :  { %v328_v1 = vpop.permute.xlu1 %327  ;;  %v326_v2 = vpop.permute.xlu0 %325 }
 0x18e   :  { %v336_v3 = vsel %vm283_vm6, %v334_v63, %v328_v1  ;;  %v335_v4 = vsel %vm283_vm6, %v333_v0, %v326_v2  ;;  %v508_v1 = vrot.slane %v3510_v8, %v3534_v59 }
 0x18f   :  { %2451 = vmatprep.mubr.msk.f32.mxu0 %vm341_vm7, %v335_v4 }
 0x190   :  { %2452 = vmatmul.mubr.msk.f32.gmra.mrb[2].mxu0 %vm341_vm7, %v336_v3 }
 0x257   :  { %v2450_v10 = vpop.f32.mrb[0].mxu0 }
 0x258   :  { %v426_v11 = vadd.f32 %v2450_v10, %v340_v9  ;;  %v420_v12 = vpop.f32.mrb[1].mxu0 }
 0x259   :  { %v421_v13 = vadd.f32 %v420_v12, %v340_v9 }
 0x25a   :  { %v440_v14 = vmax.f32 %v426_v11, 0.0 }
 0x25b   :  { %v439_v15 = vmax.f32 %v421_v13, 0.0 }
 0x25c   :  { %v447_v16 = vsel %vm443_vm8, %v440_v14, 0.0 }
 0x25d   :  { %448 = vadd.xlane.f32.xlu1 %v447_v16  ;;  %v444_v17 = vsel %vm443_vm8, %v439_v15, 0.0 }
 0x25e   :  { %445 = vadd.xlane.f32.xlu0 %v444_v17 }
 0x263   :  { %v2453_v18 = vpop.f32.mrb[2].mxu0 }
 0x264   :  { %v430_v19 = vpop.f32.mrb[3].mxu0  ;;  %v436_v20 = vadd.f32 %v2453_v18, %v340_v9 }
 0x265   :  { %v431_v21 = vadd.f32 %v430_v19, %v340_v9  ;;  %v513_v9 = vld [vmem:[#allocation7] sm:$0xf] }
 0x266   :  { %v442_v23 = vmax.f32 %v436_v20, 0.0  ;;  %v557_v18 = vrot.slane %v513_v9, %v3534_v59 }
 0x267   :  { %v441_v22 = vmax.f32 %v431_v21, 0.0 }
 0x268   :  { %v453_v25 = vsel %vm443_vm8, %v442_v23, 0.0 }
 0x269   :  { %v450_v24 = vsel %vm443_vm8, %v441_v22, 0.0 }
 0x26a   :  { %451 = vadd.xlane.f32.xlu0 %v450_v24 }
 0x26e   :  { %454 = vadd.xlane.f32.xlu0 %v453_v25 }
 0x2ea   :  { %v449_v26 = vpop.xlane.xlu1 %448 }
 0x2eb   :  { %v458_v27 = vmul.f32 0.03125, %v449_v26  ;;  %v446_v28 = vpop.xlane.xlu0 %445 }
 0x2ec   :  { %v457_v29 = vmul.f32 0.03125, %v446_v28  ;;  %v3546_v28 = vsub.s32 3, %v3505_v6 }
 0x2ed   :  { %v462_v30 = vsub.f32 %v440_v14, %v458_v27 }
 0x2ee   :  { %v461_v31 = vsub.f32 %v439_v15, %v457_v29  ;;  %v538_v15 = vrot.slane %v513_v9, %v3531_v58  ;;  %v617_v6 = vrot.slane %v513_v9, %v3546_v28 }
 0x2ef   :  { %v466_v32 = vmul.f32 %v462_v30, %v462_v30 }
 0x2f0   :  { %v465_v33 = vmul.f32 %v461_v31, %v461_v31 }
 0x2f1   :  { %v472_v34 = vsel %vm443_vm8, %v466_v32, 0.0 }
 0x2f2   :  { %473 = vadd.xlane.f32.xlu0 %v472_v34  ;;  %v469_v35 = vsel %vm443_vm8, %v465_v33, 0.0 }
 0x2f3   :  { %470 = vadd.xlane.f32.xlu1 %v469_v35 }
 0x2f7   :  { %v452_v36 = vpop.xlane.xlu0 %451 }
 0x2f8   :  { %v459_v37 = vmul.f32 0.03125, %v452_v36 }
 0x2fa   :  { %v3520_v38 = vsub.f32 %v441_v22, %v459_v37  ;;  %v532_v22 = vrot.slane %v513_v9, %v3508_v7 }
 0x2fb   :  { %v455_v39 = vpop.xlane.xlu0 %454 }
 0x2fc   :  { %v460_v40 = vmul.f32 0.03125, %v455_v39  ;;  %v467_v41 = vmul.f32 %v3520_v38, %v3520_v38 }
 0x2fe   :  { %v3524_v42 = vsub.f32 %v442_v23, %v460_v40  ;;  %v475_v43 = vsel %vm443_vm8, %v467_v41, 0.0 }
 0x2ff   :  { %476 = vadd.xlane.f32.xlu1 %v475_v43 }
 0x300   :  { %v468_v44 = vmul.f32 %v3524_v42, %v3524_v42 }
 0x302   :  { %v478_v45 = vsel %vm443_vm8, %v468_v44, 0.0 }
 0x303   :  { %479 = vadd.xlane.f32.xlu0 %v478_v45 }
 0x37f   :  { %v474_v52 = vpop.xlane.xlu0 %473 }
 0x380   :  { %v482_v53 = vmul.f32 0.03125, %v474_v52  ;;  %v471_v54 = vpop.xlane.xlu1 %470 }
 0x381   :  { %v481_v55 = vmul.f32 0.03125, %v471_v54 }
 0x382   :  { %v486_v56 = vadd.f32 1e-05, %v482_v53 }
 0x383   :  { %v485_v57 = vadd.f32 1e-05, %v481_v55 }
 0x384   :  { %2801 = vrsqrt.f32 %v486_v56 }
 0x385   :  { %2803 = vrsqrt.f32 %v485_v57 }
 0x38c   :  { %v477_v60 = vpop.xlane.xlu1 %476 }
 0x38d   :  { %v483_v62 = vmul.f32 0.03125, %v477_v60 }
 0x38e   :  { %v2802_v63 = vpop.eup %2801 }
 0x38f   :  { %v2804_v0 = vpop.eup %2803  ;;  %v494_v2 = vmul.f32 %v2802_v63, %v462_v30  ;;  %v487_v3 = vadd.f32 1e-05, %v483_v62 }
 0x390   :  { %v493_v4 = vmul.f32 %v2804_v0, %v461_v31  ;;  %v480_v5 = vpop.xlane.xlu0 %479 }
 0x391   :  { %v502_v10 = vmul.f32 %v500_v61, %v494_v2  ;;  %2805 = vrsqrt.f32 %v487_v3  ;;  %v484_v11 = vmul.f32 0.03125, %v480_v5 }
 0x392   :  { %v501_v12 = vmul.f32 %v500_v61, %v493_v4 }
 0x393   :  { %v510_v13 = vadd.f32 %v508_v1, %v502_v10  ;;  %v488_v14 = vadd.f32 1e-05, %v484_v11 }
 0x394   :  { %v509_v16 = vadd.f32 %v508_v1, %v501_v12 }
 0x395   :  { %2807 = vrsqrt.f32 %v488_v14  ;;  %v523_v17 = vrot.slane %v510_v13, 6 }
 0x396   :  { %v522_v8 = vrot.slane %v509_v16, 6 }
 0x397   :  { %v541_v19 = vmul.f32 %v538_v15, %v523_v17  ;;  %v560_v26 = vmul.f32 %v557_v18, %v523_v17 }
 0x398   :  { %v524_v20 = vsel %vm521_vm9, %v522_v8, %v523_v17  ;;  %v528_v21 = vsel %vm521_vm9, 0.0, %v522_v8 }
 0x399   :  { %v539_v23 = vmul.f32 %v538_v15, %v528_v21  ;;  %v540_v24 = vmul.f32 %v538_v15, %v524_v20  ;;  %v558_v25 = vmul.f32 %v557_v18, %v528_v21  ;;  %v559_v27 = vmul.f32 %v557_v18, %v524_v20 }
 0x39a   :  { %v548_v33 = vrot.slane %v541_v19, 1  ;;  %v533_v35 = vmul.f32 %v532_v22, %v528_v21  ;;  %v534_v37 = vmul.f32 %v532_v22, %v524_v20  ;;  %v567_v41 = vrot.slane %v560_v26, 2 }
 0x39b   :  { %v2806_v29 = vpop.eup %2805  ;;  %v545_v30 = vrot.slane %v539_v23, 1  ;;  %v546_v31 = vrot.slane %v540_v24, 1  ;;  %v564_v32 = vrot.slane %v558_v25, 2  ;;  %v565_v36 = vrot.slane %v559_v27, 2 }
 0x39c   :  { %v495_v34 = vmul.f32 %v2806_v29, %v3520_v38 }
 0x39d   :  { %v547_v39 = vsel %vm241_vm2, %v545_v30, %v546_v31  ;;  %v549_v40 = vsel %vm241_vm2, %v546_v31, %v548_v33  ;;  %v566_v47 = vsel %vm253_vm1, %v564_v32, %v565_v36  ;;  %v568_v48 = vsel %vm253_vm1, %v565_v36, %v567_v41 }
 0x39e   :  { %v503_v43 = vmul.f32 %v500_v61, %v495_v34  ;;  %v552_v44 = vadd.f32 %v547_v39, %v533_v35  ;;  %v553_v45 = vadd.f32 %v549_v40, %v534_v37 }
 0x39f   :  { %v2808_v46 = vpop.eup %2807 }
 0x3a0   :  { %v511_v49 = vadd.f32 %v508_v1, %v503_v43  ;;  %v496_v38 = vmul.f32 %v2808_v46, %v3524_v42  ;;  %v571_v50 = vadd.f32 %v566_v47, %v552_v44  ;;  %v572_v51 = vadd.f32 %v568_v48, %v553_v45 }
 0x3a2   :  { %v575_v52 = vrot.slane %v511_v49, 6  ;;  %v504_v53 = vmul.f32 %v500_v61, %v496_v38  ;;  %v618_v54 = vadd.f32 %v617_v6, %v571_v50  ;;  %v619_v55 = vadd.f32 %v617_v6, %v572_v51 }
 0x3a4   :  { %v512_v56 = vadd.f32 %v508_v1, %v504_v53  ;;  %v622_v57 = vmax.f32 %v618_v54, 0.0  ;;  %v623_v60 = vmax.f32 %v619_v55, 0.0  ;;  %v581_v62 = vsel %vm521_vm9, 0.0, %v575_v52 }
 0x3a5   :  { %v584_v0 = vmul.f32 %v581_v62, %v538_v15  ;;  %v599_v5 = vmul.f32 %v581_v62, %v557_v18  ;;  %v582_v13 = vmul.f32 %v581_v62, %v532_v22 }
 0x3a6   :  { %v576_v63 = vrot.slane %v512_v56, 6  ;;  %2462 = vmatprep.mubr.msk.f32.mxu1 %vm443_vm8, %v622_v57 }
 0x3a7   :  { %2463 = vmatmul.mubr.msk.f32.vlgmr.msra.gmra.mrb[0].mxu1 %vm443_vm8, %v623_v60  ;;  %v590_v10 = vrot.slane %v584_v0, 1  ;;  %v605_v17 = vrot.slane %v599_v5, 2  ;;  %v801_v5 = vld [vmem:[#allocation11] sm:$0xff] }
 0x3a8   :  { %v577_v2 = vsel %vm521_vm9, %v575_v52, %v576_v63  ;;  %v586_v42 = vmul.f32 %v576_v63, %v538_v15  ;;  %v601_v3 = vmul.f32 %v576_v63, %v557_v18 }
 0x3a9   :  { %v585_v4 = vmul.f32 %v577_v2, %v538_v15  ;;  %v600_v61 = vmul.f32 %v577_v2, %v557_v18  ;;  %v583_v14 = vmul.f32 %v577_v2, %v532_v22  ;;  %v3565_v22 = vld [vmem:[#allocation10] sm:$0x7] }
 0x3aa   :  { %v593_v9 = vrot.slane %v586_v42, 1  ;;  %v608_v12 = vrot.slane %v601_v3, 2  ;;  %v629_v29 = vrot.slane %v3565_v22, %v3508_v7 }
 0x3ab   :  { %v591_v1 = vrot.slane %v585_v4, 1  ;;  %v606_v11 = vrot.slane %v600_v61, 2  ;;  %v802_v61 = vld [vmem:[#allocation11 + $0x8] sm:$0xff] }
 0x3ad   :  { %v592_v16 = vsel %vm241_vm2, %v590_v10, %v591_v1  ;;  %v594_v8 = vsel %vm241_vm2, %v591_v1, %v593_v9  ;;  %v607_v21 = vsel %vm253_vm1, %v605_v17, %v606_v11  ;;  %v609_v15 = vsel %vm253_vm1, %v606_v11, %v608_v12  ;;  %v803_v10 = vld [vmem:[#allocation11 + $0x10] sm:$0xff]  ;;  %v804_v1 = vld [vmem:[#allocation11 + $0x18] sm:$0xff]  ;;  %v805_v12 = vld [vmem:[#allocation11 + $0x20] sm:$0xff] }
 0x3ae   :  { %v597_v19 = vadd.f32 %v592_v16, %v582_v13  ;;  %v598_v20 = vadd.f32 %v594_v8, %v583_v14  ;;  %v2656_v9 = vpack.c.bf16 %v802_v61, %v801_v5  ;;  %v2660_v11 = vpack.c.bf16 %v804_v1, %v803_v10  ;;  %v806_v13 = vld [vmem:[#allocation11 + $0x28] sm:$0xff]  ;;  %v807_v16 = vld [vmem:[#allocation11 + $0x30] sm:$0xff]  ;;  %v808_v17 = vld [vmem:[#allocation11 + $0x38] sm:$0xff] }
 0x3af   :  { %v2664_v14 = vpack.c.bf16 %v806_v13, %v805_v12  ;;  %v2668_v8 = vpack.c.bf16 %v808_v17, %v807_v16 }
 0x3b0   :  { %v612_v23 = vadd.f32 %v607_v21, %v597_v19  ;;  %v613_v18 = vadd.f32 %v609_v15, %v598_v20  ;;  %2657 = vmatprep.subr.bf16.mxu0 %v2656_v9  ;;  %v809_v19 = vld [vmem:[%s3882_s7] sm:$0xff]  ;;  %v810_v20 = vld [vmem:[%s3882_s7 + $0x8] sm:$0xff]  ;;  %v811_v21 = vld [vmem:[%s3882_s7 + $0x10] sm:$0xff] }
 0x3b1   :  { %2659 = vmatpush3.bf16.msra.mxu0 %v2656_v9  ;;  %v2672_v15 = vpack.c.bf16 %v810_v20, %v809_v19 }
 0x3b2   :  { %v620_v24 = vadd.f32 %v617_v6, %v612_v23  ;;  %v621_v25 = vadd.f32 %v617_v6, %v613_v18  ;;  %2661 = vmatprep.subr.bf16.mxu0 %v2660_v11  ;;  %v812_v23 = vld [vmem:[%s3882_s7 + $0x18] sm:$0xff] }
 0x3b3   :  { %v2676_v18 = vpack.c.bf16 %v812_v23, %v811_v21  ;;  %2673 = vmatprep.subr.bf16.mxu1 %v2672_v15 }
 0x3b4   :  { %v624_v26 = vmax.f32 %v620_v24, 0.0  ;;  %v625_v27 = vmax.f32 %v621_v25, 0.0  ;;  %v813_v24 = vld [vmem:[%s3882_s7 + $0x20] sm:$0xff]  ;;  %v814_v25 = vld [vmem:[%s3882_s7 + $0x28] sm:$0xff]  ;;  %2675 = vmatpush3.bf16.msra.mxu1 %v2672_v15 }
 0x3b5   :  { %2663 = vmatpush3.bf16.msra.mxu0 %v2660_v11  ;;  %2677 = vmatprep.subr.bf16.mxu1 %v2676_v18 }
 0x3b6   :  { %2465 = vmatprep.mubr.msk.f32.mxu1 %vm443_vm8, %v624_v26  ;;  %2665 = vmatprep.subr.bf16.mxu0 %v2664_v14  ;;  %v2680_v26 = vpack.c.bf16 %v814_v25, %v813_v24 }
 0x3b7   :  { %2466 = vmatmul.mubr.msk.f32.gmra.mrb[2].mxu1 %vm443_vm8, %v625_v27 }
 0x3b8   :  { %2679 = vmatpush3.bf16.msra.mxu1 %v2676_v18 }
 0x3b9   :  { %2667 = vmatpush3.bf16.msra.mxu0 %v2664_v14  ;;  %2681 = vmatprep.subr.bf16.mxu1 %v2680_v26 }
 0x3ba   :  { %2669 = vmatprep.subr.bf16.mxu0 %v2668_v8 }
 0x3bc   :  { %2683 = vmatpush3.bf16.msra.mxu1 %v2680_v26 }
 0x3bd   :  { %2671 = vmatpush3.bf16.msra.mxu0 %v2668_v8 }
 0x47a   :  { %v2464_v30 = vpop.f32.mrb[0].mxu1 }
 0x47b   :  { %v714_v31 = vadd.f32 %v2464_v30, %v629_v29  ;;  %v708_v32 = vpop.f32.mrb[1].mxu1 }
 0x47c   :  { %v709_v33 = vadd.f32 %v708_v32, %v629_v29 }
 0x47d   :  { %v728_v34 = vmax.f32 %v714_v31, 0.0 }
 0x47e   :  { %v727_v35 = vmax.f32 %v709_v33, 0.0 }
 0x47f   :  { %v735_v36 = vsel %vm731_vm10, %v728_v34, 0.0 }
 0x480   :  { %736 = vadd.xlane.f32.xlu0 %v735_v36  ;;  %v732_v37 = vsel %vm731_vm10, %v727_v35, 0.0 }
 0x481   :  { %733 = vadd.xlane.f32.xlu1 %v732_v37 }
 0x48a   :  { %v2467_v39 = vpop.f32.mrb[2].mxu1 }
 0x48b   :  { %v724_v40 = vadd.f32 %v2467_v39, %v629_v29  ;;  %v718_v41 = vpop.f32.mrb[3].mxu1 }
 0x48c   :  { %v719_v43 = vadd.f32 %v718_v41, %v629_v29 }
 0x48d   :  { %v730_v44 = vmax.f32 %v724_v40, 0.0  ;;  %v796_v40 = vrot.slane %v3565_v22, %v3534_v59 }
 0x48e   :  { %v729_v6 = vmax.f32 %v719_v43, 0.0 }
 0x48f   :  { %v741_v45 = vsel %vm731_vm10, %v730_v44, 0.0 }
 0x490   :  { %742 = vadd.xlane.f32.xlu0 %v741_v45  ;;  %v738_v46 = vsel %vm731_vm10, %v729_v6, 0.0 }
 0x491   :  { %739 = vadd.xlane.f32.xlu1 %v738_v46 }
 0x50d   :  { %v737_v47 = vpop.xlane.xlu0 %736 }
 0x50e   :  { %v746_v48 = vmul.f32 0.015625, %v737_v47  ;;  %v734_v49 = vpop.xlane.xlu1 %733 }
 0x50f   :  { %v745_v38 = vmul.f32 0.015625, %v734_v49 }
 0x510   :  { %v3573_v50 = vsub.f32 %v728_v34, %v746_v48  ;;  %v788_v34 = vrot.slane %v3565_v22, %v3531_v58 }
 0x511   :  { %v3575_v51 = vsub.f32 %v727_v35, %v745_v38 }
 0x512   :  { %v754_v52 = vmul.f32 %v3573_v50, %v3573_v50 }
 0x513   :  { %v753_v53 = vmul.f32 %v3575_v51, %v3575_v51 }
 0x514   :  { %v760_v54 = vsel %vm731_vm10, %v754_v52, 0.0 }
 0x515   :  { %761 = vadd.xlane.f32.xlu0 %v760_v54  ;;  %v757_v55 = vsel %vm731_vm10, %v753_v53, 0.0 }
 0x516   :  { %758 = vadd.xlane.f32.xlu1 %v757_v55 }
 0x51d   :  { %v743_v56 = vpop.xlane.xlu0 %742 }
 0x51e   :  { %v748_v57 = vmul.f32 0.015625, %v743_v56  ;;  %v740_v60 = vpop.xlane.xlu1 %739 }
 0x51f   :  { %v747_v62 = vmul.f32 0.015625, %v740_v60  ;;  %v816_v60 = vld [vmem:[%s3882_s7 + $0x38] sm:$0xff] }
 0x520   :  { %v3583_v63 = vsub.f32 %v730_v44, %v748_v57  ;;  %v815_v57 = vld [vmem:[%s3882_s7 + $0x30] sm:$0xff] }
 0x521   :  { %v3585_v0 = vsub.f32 %v729_v6, %v747_v62  ;;  %v2684_v62 = vpack.c.bf16 %v816_v60, %v815_v57  ;;  %v1101_v57 = vld [vmem:[#allocation13 + $0x20] sm:$0xff]  ;;  %v1102_v60 = vld [vmem:[#allocation13 + $0x28] sm:$0xff] }
 0x522   :  { %v756_v2 = vmul.f32 %v3583_v63, %v3583_v63 }
 0x523   :  { %v755_v42 = vmul.f32 %v3585_v0, %v3585_v0  ;;  %2685 = vmatprep.subr.bf16.mxu1 %v2684_v62 }
 0x524   :  { %v766_v3 = vsel %vm731_vm10, %v756_v2, 0.0  ;;  %2687 = vmatpush3.bf16.msra.mxu1 %v2684_v62  ;;  %v2696_v62 = vpack.c.bf16 %v1102_v60, %v1101_v57 }
 0x525   :  { %767 = vadd.xlane.f32.xlu0 %v766_v3  ;;  %v763_v4 = vsel %vm731_vm10, %v755_v42, 0.0 }
 0x526   :  { %764 = vadd.xlane.f32.xlu1 %v763_v4 }
 0x5a2   :  { %v762_v27 = vpop.xlane.xlu0 %761 }
 0x5a3   :  { %v770_v29 = vmul.f32 0.015625, %v762_v27  ;;  %v759_v30 = vpop.xlane.xlu1 %758 }
 0x5a4   :  { %v769_v31 = vmul.f32 0.015625, %v759_v30 }
 0x5a5   :  { %v774_v32 = vadd.f32 1e-05, %v770_v29 }
 0x5a6   :  { %v773_v33 = vadd.f32 1e-05, %v769_v31 }
 0x5a7   :  { %2809 = vrsqrt.f32 %v774_v32 }
 0x5a8   :  { %2811 = vrsqrt.f32 %v773_v33 }
 0x5b1   :  { %v2810_v35 = vpop.eup %2809 }
 0x5b2   :  { %v2812_v36 = vpop.eup %2811  ;;  %v782_v37 = vmul.f32 %v2810_v35, %v3573_v50  ;;  %v768_v39 = vpop.xlane.xlu0 %767 }
 0x5b3   :  { %v772_v41 = vmul.f32 0.015625, %v768_v39  ;;  %v765_v43 = vpop.xlane.xlu1 %764  ;;  %v781_v44 = vmul.f32 %v2812_v36, %v3575_v51 }
 0x5b4   :  { %v790_v6 = vmul.f32 %v788_v34, %v782_v37  ;;  %v771_v45 = vmul.f32 0.015625, %v765_v43 }
 0x5b5   :  { %v776_v46 = vadd.f32 1e-05, %v772_v41  ;;  %v789_v47 = vmul.f32 %v788_v34, %v781_v44 }
 0x5b6   :  { %v775_v48 = vadd.f32 1e-05, %v771_v45  ;;  %v798_v38 = vadd.f32 %v796_v40, %v790_v6 }
 0x5b7   :  { %2813 = vrsqrt.f32 %v776_v46  ;;  %v797_v49 = vadd.f32 %v796_v40, %v789_v47 }
 0x5b8   :  { %2815 = vrsqrt.f32 %v775_v48 }
 0x5b9   :  { %2484 = vmatprep.mubr.msk.f32.mxu0 %vm731_vm10, %v797_v49 }
 0x5ba   :  { %2485 = vmatmul.mubr.msk.f32.vlgmr.msra.gmra.mrb[4].mxu0 %vm731_vm10, %v798_v38 }
 0x5c1   :  { %v2814_v50 = vpop.eup %2813 }
 0x5c2   :  { %v2816_v52 = vpop.eup %2815  ;;  %v784_v22 = vmul.f32 %v2814_v50, %v3583_v63  ;;  %v3632_v63 = vld [vmem:[%s3883_s8] sm:$0xf] }
 0x5c3   :  { %v783_v53 = vmul.f32 %v2816_v52, %v3585_v0  ;;  %v821_v0 = vrot.slane %v3632_v63, %v3508_v7  ;;  %v926_v14 = vrot.slane %v3632_v63, %v3531_v58 }
 0x5c4   :  { %v792_v51 = vmul.f32 %v788_v34, %v784_v22  ;;  %v1097_v22 = vld [vmem:[#allocation13] sm:$0xff] }
 0x5c5   :  { %v791_v54 = vmul.f32 %v788_v34, %v783_v53  ;;  %v1098_v53 = vld [vmem:[#allocation13 + $0x8] sm:$0xff] }
 0x5c6   :  { %v800_v56 = vadd.f32 %v796_v40, %v792_v51  ;;  %v2688_v51 = vpack.c.bf16 %v1098_v53, %v1097_v22 }
 0x5c7   :  { %v799_v55 = vadd.f32 %v796_v40, %v791_v54  ;;  %v1099_v54 = vld [vmem:[#allocation13 + $0x10] sm:$0xff] }
 0x5c8   :  { %2689 = vmatprep.subr.bf16.mxu0 %v2688_v51 }
 0x5c9   :  { %2487 = vmatprep.mubr.msk.f32.mxu0 %vm731_vm10, %v799_v55  ;;  %2691 = vmatpush3.bf16.msra.mxu0 %v2688_v51 }
 0x5ca   :  { %2488 = vmatmul.mubr.msk.f32.gmra.mrb[6].mxu0 %vm731_vm10, %v800_v56 }
 0x68d   :  { %v2486_v2 = vpop.f32.mrb[4].mxu0 }
 0x68e   :  { %v906_v42 = vadd.f32 %v2486_v2, %v821_v0  ;;  %v900_v3 = vpop.f32.mrb[5].mxu0  ;;  %v1104_v2 = vld [vmem:[#allocation13 + $0x38] sm:$0xff] }
 0x68f   :  { %v901_v4 = vadd.f32 %v900_v3, %v821_v0 }
 0x690   :  { %v920_v61 = vmax.f32 %v906_v42, 0.0 }
 0x691   :  { %v919_v5 = vmax.f32 %v901_v4, 0.0 }
 0x693   :  { %2506 = vmatprep.mubr.msk.f32.mxu1 %vm731_vm10, %v919_v5 }
 0x694   :  { %2507 = vmatmul.mubr.msk.f32.vlgmr.msra.gmra.mrb[4].mxu1 %vm731_vm10, %v920_v61 }
 0x69d   :  { %v2489_v9 = vpop.f32.mrb[6].mxu0 }
 0x69e   :  { %v916_v10 = vadd.f32 %v2489_v9, %v821_v0  ;;  %v910_v1 = vpop.f32.mrb[7].mxu0 }
 0x69f   :  { %v911_v11 = vadd.f32 %v910_v1, %v821_v0  ;;  %v1103_v0 = vld [vmem:[#allocation13 + $0x30] sm:$0xff]  ;;  %v1083_v1 = vrot.slane %v3632_v63, %v3534_v59 }
 0x6a0   :  { %v922_v13 = vmax.f32 %v916_v10, 0.0  ;;  %v2700_v42 = vpack.c.bf16 %v1104_v2, %v1103_v0 }
 0x6a1   :  { %v921_v12 = vmax.f32 %v911_v11, 0.0 }
 0x6a3   :  { %2509 = vmatprep.mubr.msk.f32.mxu1 %vm731_vm10, %v921_v12 }
 0x6a4   :  { %2510 = vmatmul.mubr.msk.f32.gmra.mrb[6].mxu1 %vm731_vm10, %v922_v13  ;;  %v1091_v13 = vrot.slane %v3632_v63, %v3546_v28 }
 0x767   :  { %v2508_v16 = vpop.f32.mrb[4].mxu1 }
 0x768   :  { %v1011_v17 = vadd.f32 %v2508_v16, %v926_v14  ;;  %v1005_v8 = vpop.f32.mrb[5].mxu1 }
 0x769   :  { %v1006_v19 = vadd.f32 %v1005_v8, %v926_v14 }
 0x76a   :  { %v1025_v20 = vadd.f32 %v1011_v17, %v798_v38 }
 0x76b   :  { %v1024_v21 = vadd.f32 %v1006_v19, %v797_v49 }
 0x76c   :  { %v1031_v15 = vsel %vm731_vm10, %v1025_v20, 0.0 }
 0x76d   :  { %1032 = vadd.xlane.f32.xlu0 %v1031_v15  ;;  %v1028_v23 = vsel %vm731_vm10, %v1024_v21, 0.0 }
 0x76e   :  { %1029 = vadd.xlane.f32.xlu1 %v1028_v23 }
 0x777   :  { %v2511_v18 = vpop.f32.mrb[6].mxu1 }
 0x778   :  { %v1021_v24 = vadd.f32 %v2511_v18, %v926_v14  ;;  %v1015_v25 = vpop.f32.mrb[7].mxu1 }
 0x779   :  { %v1016_v26 = vadd.f32 %v1015_v25, %v926_v14 }
 0x77a   :  { %v1027_v27 = vadd.f32 %v1021_v24, %v800_v56 }
 0x77b   :  { %v1026_v29 = vadd.f32 %v1016_v26, %v799_v55  ;;  %v1100_v55 = vld [vmem:[#allocation13 + $0x18] sm:$0xff] }
 0x77c   :  { %v1037_v30 = vsel %vm731_vm10, %v1027_v27, 0.0  ;;  %v2692_v56 = vpack.c.bf16 %v1100_v55, %v1099_v54 }
 0x77d   :  { %1038 = vadd.xlane.f32.xlu0 %v1037_v30  ;;  %v1034_v31 = vsel %vm731_vm10, %v1026_v29, 0.0 }
 0x77e   :  { %1035 = vadd.xlane.f32.xlu1 %v1034_v31  ;;  %2693 = vmatprep.subr.bf16.mxu0 %v2692_v56 }
 0x77f   :  { %2695 = vmatpush3.bf16.msra.mxu0 %v2692_v56 }
 0x780   :  { %2697 = vmatprep.subr.bf16.mxu0 %v2696_v62 }
 0x783   :  { %2699 = vmatpush3.bf16.msra.mxu0 %v2696_v62 }
 0x784   :  { %2701 = vmatprep.subr.bf16.mxu0 %v2700_v42 }
 0x787   :  { %2703 = vmatpush3.bf16.msra.mxu0 %v2700_v42 }
 0x7fa   :  { %v1033_v32 = vpop.xlane.xlu0 %1032 }
 0x7fb   :  { %v1041_v33 = vmul.f32 0.015625, %v1033_v32  ;;  %v1030_v34 = vpop.xlane.xlu1 %1029 }
 0x7fc   :  { %v1040_v35 = vmul.f32 0.015625, %v1030_v34 }
 0x7fd   :  { %v1045_v36 = vsub.f32 %v1025_v20, %v1041_v33  ;;  %v1096_v20 = vld [vmem:[%s3884_s9] sm:$0xf] }
 0x7fe   :  { %v1044_v37 = vsub.f32 %v1024_v21, %v1040_v35  ;;  %v1124_v26 = vrot.slane %v1096_v20, %v3531_v58  ;;  %v1118_v34 = vrot.slane %v1096_v20, %v3508_v7  ;;  %v1203_v51 = vrot.slane %v1096_v20, %v3546_v28 }
 0x7ff   :  { %v1049_v39 = vmul.f32 %v1045_v36, %v1045_v36 }
 0x800   :  { %v1048_v40 = vmul.f32 %v1044_v37, %v1044_v37 }
 0x801   :  { %v1055_v41 = vsel %vm731_vm10, %v1049_v39, 0.0 }
 0x802   :  { %1056 = vadd.xlane.f32.xlu0 %v1055_v41  ;;  %v1052_v43 = vsel %vm731_vm10, %v1048_v40, 0.0 }
 0x803   :  { %1053 = vadd.xlane.f32.xlu1 %v1052_v43 }
 0x80a   :  { %v1039_v44 = vpop.xlane.xlu0 %1038 }
 0x80b   :  { %v1043_v6 = vmul.f32 0.015625, %v1039_v44  ;;  %v1036_v45 = vpop.xlane.xlu1 %1035 }
 0x80c   :  { %v1042_v46 = vmul.f32 0.015625, %v1036_v45 }
 0x80d   :  { %v3648_v47 = vsub.f32 %v1027_v27, %v1043_v6 }
 0x80e   :  { %v3650_v48 = vsub.f32 %v1026_v29, %v1042_v46  ;;  %v1143_v29 = vrot.slane %v1096_v20, %v3534_v59 }
 0x80f   :  { %v1051_v49 = vmul.f32 %v3648_v47, %v3648_v47 }
 0x810   :  { %v1050_v38 = vmul.f32 %v3650_v48, %v3650_v48 }
 0x811   :  { %v1061_v50 = vsel %vm731_vm10, %v1051_v49, 0.0 }
 0x812   :  { %1062 = vadd.xlane.f32.xlu0 %v1061_v50  ;;  %v1058_v52 = vsel %vm731_vm10, %v1050_v38, 0.0 }
 0x813   :  { %1059 = vadd.xlane.f32.xlu1 %v1058_v52 }
 0x88f   :  { %v1057_v3 = vpop.xlane.xlu0 %1056 }
 0x890   :  { %v1065_v4 = vmul.f32 0.015625, %v1057_v3  ;;  %v1054_v5 = vpop.xlane.xlu1 %1053 }
 0x891   :  { %v1064_v61 = vmul.f32 0.015625, %v1054_v5 }
 0x892   :  { %v1069_v9 = vadd.f32 1e-05, %v1065_v4 }
 0x893   :  { %v1068_v10 = vadd.f32 1e-05, %v1064_v61 }
 0x894   :  { %2817 = vrsqrt.f32 %v1069_v9 }
 0x895   :  { %2819 = vrsqrt.f32 %v1068_v10 }
 0x89e   :  { %v2818_v11 = vpop.eup %2817 }
 0x89f   :  { %v2820_v12 = vpop.eup %2819  ;;  %v1077_v14 = vmul.f32 %v2818_v11, %v1045_v36  ;;  %v1063_v16 = vpop.xlane.xlu0 %1062 }
 0x8a0   :  { %v1076_v17 = vmul.f32 %v2820_v12, %v1044_v37  ;;  %v1067_v8 = vmul.f32 0.015625, %v1063_v16  ;;  %v1060_v19 = vpop.xlane.xlu1 %1059 }
 0x8a1   :  { %v1085_v21 = vmul.f32 %v1083_v1, %v1077_v14  ;;  %v1066_v15 = vmul.f32 0.015625, %v1060_v19 }
 0x8a2   :  { %v1084_v23 = vmul.f32 %v1083_v1, %v1076_v17  ;;  %v1071_v18 = vadd.f32 1e-05, %v1067_v8 }
 0x8a3   :  { %v1093_v24 = vadd.f32 %v1091_v13, %v1085_v21  ;;  %v1070_v25 = vadd.f32 1e-05, %v1066_v15 }
 0x8a4   :  { %v1092_v27 = vadd.f32 %v1091_v13, %v1084_v23  ;;  %2821 = vrsqrt.f32 %v1071_v18 }
 0x8a5   :  { %v1109_v63 = vrot.slane %v1093_v24, 6  ;;  %2823 = vrsqrt.f32 %v1070_v25 }
 0x8a6   :  { %v1108_v30 = vrot.slane %v1092_v27, 6 }
 0x8a7   :  { %v1127_v31 = vmul.f32 %v1124_v26, %v1109_v63  ;;  %v1146_v37 = vmul.f32 %v1143_v29, %v1109_v63 }
 0x8a8   :  { %v1110_v32 = vsel %vm521_vm9, %v1108_v30, %v1109_v63  ;;  %v1114_v33 = vsel %vm521_vm9, 0.0, %v1108_v30 }
 0x8a9   :  { %v1125_v35 = vmul.f32 %v1124_v26, %v1114_v33  ;;  %v1126_v36 = vmul.f32 %v1124_v26, %v1110_v32  ;;  %v1144_v39 = vmul.f32 %v1143_v29, %v1114_v33  ;;  %v1145_v40 = vmul.f32 %v1143_v29, %v1110_v32 }
 0x8aa   :  { %v1134_v44 = vrot.slane %v1127_v31, 1  ;;  %v1119_v6 = vmul.f32 %v1118_v34, %v1114_v33  ;;  %v1120_v45 = vmul.f32 %v1118_v34, %v1110_v32  ;;  %v1153_v50 = vrot.slane %v1146_v37, 2 }
 0x8ab   :  { %v1131_v41 = vrot.slane %v1125_v35, 1  ;;  %v1132_v43 = vrot.slane %v1126_v36, 1  ;;  %v1150_v46 = vrot.slane %v1144_v39, 2  ;;  %v1151_v49 = vrot.slane %v1145_v40, 2 }
 0x8ad   :  { %v1133_v38 = vsel %vm241_vm2, %v1131_v41, %v1132_v43  ;;  %v1135_v52 = vsel %vm241_vm2, %v1132_v43, %v1134_v44  ;;  %v1152_v57 = vsel %vm253_vm1, %v1150_v46, %v1151_v49  ;;  %v1154_v60 = vsel %vm253_vm1, %v1151_v49, %v1153_v50 }
 0x8ae   :  { %v2822_v22 = vpop.eup %2821  ;;  %v1138_v53 = vadd.f32 %v1133_v38, %v1119_v6  ;;  %v1139_v54 = vadd.f32 %v1135_v52, %v1120_v45 }
 0x8af   :  { %v2824_v55 = vpop.eup %2823  ;;  %v1079_v56 = vmul.f32 %v2822_v22, %v3648_v47 }
 0x8b0   :  { %v1078_v62 = vmul.f32 %v2824_v55, %v3650_v48  ;;  %v1157_v0 = vadd.f32 %v1152_v57, %v1138_v53  ;;  %v1158_v2 = vadd.f32 %v1154_v60, %v1139_v54 }
 0x8b1   :  { %v1087_v42 = vmul.f32 %v1083_v1, %v1079_v56 }
 0x8b2   :  { %v1086_v3 = vmul.f32 %v1083_v1, %v1078_v62  ;;  %v1204_v4 = vadd.f32 %v1203_v51, %v1157_v0  ;;  %v1205_v5 = vadd.f32 %v1203_v51, %v1158_v2 }
 0x8b3   :  { %v1095_v61 = vadd.f32 %v1091_v13, %v1087_v42 }
 0x8b4   :  { %v1094_v9 = vadd.f32 %v1091_v13, %v1086_v3  ;;  %v1208_v10 = vmax.f32 %v1204_v4, 0.0  ;;  %v1209_v11 = vmax.f32 %v1205_v5, 0.0 }
 0x8b5   :  { %v1162_v12 = vrot.slane %v1095_v61, 6 }
 0x8b6   :  { %v1161_v14 = vrot.slane %v1094_v9, 6  ;;  %2528 = vmatprep.mubr.msk.f32.mxu0 %vm731_vm10, %v1208_v10 }
 0x8b7   :  { %2529 = vmatmul.mubr.msk.f32.vlgmr.msra.gmra.mrb[8].mxu0 %vm731_vm10, %v1209_v11  ;;  %v1172_v47 = vmul.f32 %v1162_v12, %v1124_v26  ;;  %v1187_v19 = vmul.f32 %v1162_v12, %v1143_v29 }
 0x8b8   :  { %v1163_v16 = vsel %vm521_vm9, %v1161_v14, %v1162_v12  ;;  %v1167_v48 = vsel %vm521_vm9, 0.0, %v1161_v14 }
 0x8b9   :  { %v1170_v17 = vmul.f32 %v1167_v48, %v1124_v26  ;;  %v1171_v8 = vmul.f32 %v1163_v16, %v1124_v26  ;;  %v1185_v1 = vmul.f32 %v1167_v48, %v1143_v29  ;;  %v1186_v20 = vmul.f32 %v1163_v16, %v1143_v29 }
 0x8ba   :  { %v1179_v23 = vrot.slane %v1172_v47, 1  ;;  %v1168_v18 = vmul.f32 %v1167_v48, %v1118_v34  ;;  %v1169_v25 = vmul.f32 %v1163_v16, %v1118_v34  ;;  %v1194_v30 = vrot.slane %v1187_v19, 2  ;;  %v3690_v34 = vld [vmem:[%s3886_s11] sm:$0x7] }
 0x8bb   :  { %v1176_v21 = vrot.slane %v1170_v17, 1  ;;  %v1177_v13 = vrot.slane %v1171_v8, 1  ;;  %v1191_v15 = vrot.slane %v1185_v1, 2  ;;  %v1192_v24 = vrot.slane %v1186_v20, 2  ;;  %v1385_v19 = vld [vmem:[#allocation14] sm:$0xff]  ;;  %v1386_v20 = vld [vmem:[#allocation14 + $0x8] sm:$0xff] }
 0x8bc   :  { %v1215_v41 = vrot.slane %v3690_v34, %v3508_v7 }
 0x8bd   :  { %v1178_v27 = vsel %vm241_vm2, %v1176_v21, %v1177_v13  ;;  %v1180_v63 = vsel %vm241_vm2, %v1177_v13, %v1179_v23  ;;  %v1193_v33 = vsel %vm253_vm1, %v1191_v15, %v1192_v24  ;;  %v1195_v26 = vsel %vm253_vm1, %v1192_v24, %v1194_v30  ;;  %v1387_v13 = vld [vmem:[#allocation14 + $0x10] sm:$0xff]  ;;  %v1388_v15 = vld [vmem:[#allocation14 + $0x18] sm:$0xff]  ;;  %v1390_v24 = vld [vmem:[#allocation14 + $0x28] sm:$0xff] }
 0x8be   :  { %v1183_v31 = vadd.f32 %v1178_v27, %v1168_v18  ;;  %v1184_v32 = vadd.f32 %v1180_v63, %v1169_v25  ;;  %v2704_v21 = vpack.c.bf16 %v1386_v20, %v1385_v19  ;;  %v2708_v23 = vpack.c.bf16 %v1388_v15, %v1387_v13  ;;  %v1389_v18 = vld [vmem:[#allocation14 + $0x20] sm:$0xff]  ;;  %v1391_v27 = vld [vmem:[#allocation14 + $0x30] sm:$0xff]  ;;  %v1392_v63 = vld [vmem:[#allocation14 + $0x38] sm:$0xff] }
 0x8bf   :  { %v2712_v25 = vpack.c.bf16 %v1390_v24, %v1389_v18  ;;  %v2716_v30 = vpack.c.bf16 %v1392_v63, %v1391_v27 }
 0x8c0   :  { %v1198_v35 = vadd.f32 %v1193_v33, %v1183_v31  ;;  %v1199_v29 = vadd.f32 %v1195_v26, %v1184_v32  ;;  %2705 = vmatprep.subr.bf16.mxu1 %v2704_v21  ;;  %v1393_v31 = vld [vmem:[#allocation16] sm:$0xff]  ;;  %v1394_v32 = vld [vmem:[#allocation16 + $0x8] sm:$0xff]  ;;  %v1395_v33 = vld [vmem:[#allocation16 + $0x10] sm:$0xff] }
 0x8c1   :  { %2707 = vmatpush3.bf16.msra.mxu1 %v2704_v21  ;;  %v2720_v26 = vpack.c.bf16 %v1394_v32, %v1393_v31 }
 0x8c2   :  { %v1206_v36 = vadd.f32 %v1203_v51, %v1198_v35  ;;  %v1207_v37 = vadd.f32 %v1203_v51, %v1199_v29  ;;  %2709 = vmatprep.subr.bf16.mxu1 %v2708_v23  ;;  %v1396_v35 = vld [vmem:[#allocation16 + $0x18] sm:$0xff] }
 0x8c3   :  { %v2724_v29 = vpack.c.bf16 %v1396_v35, %v1395_v33  ;;  %2721 = vmatprep.subr.bf16.mxu0 %v2720_v26 }
 0x8c4   :  { %v1210_v39 = vmax.f32 %v1206_v36, 0.0  ;;  %v1211_v40 = vmax.f32 %v1207_v37, 0.0  ;;  %v1397_v36 = vld [vmem:[#allocation16 + $0x20] sm:$0xff]  ;;  %v1398_v37 = vld [vmem:[#allocation16 + $0x28] sm:$0xff]  ;;  %2723 = vmatpush3.bf16.msra.mxu0 %v2720_v26 }
 0x8c5   :  { %2711 = vmatpush3.bf16.msra.mxu1 %v2708_v23  ;;  %2725 = vmatprep.subr.bf16.mxu0 %v2724_v29 }
 0x8c6   :  { %2531 = vmatprep.mubr.msk.f32.mxu0 %vm731_vm10, %v1210_v39  ;;  %2713 = vmatprep.subr.bf16.mxu1 %v2712_v25  ;;  %v2728_v39 = vpack.c.bf16 %v1398_v37, %v1397_v36 }
 0x8c7   :  { %2532 = vmatmul.mubr.msk.f32.gmra.mrb[10].mxu0 %vm731_vm10, %v1211_v40 }
 0x8c8   :  { %2727 = vmatpush3.bf16.msra.mxu0 %v2724_v29 }
 0x8c9   :  { %2715 = vmatpush3.bf16.msra.mxu1 %v2712_v25  ;;  %2729 = vmatprep.subr.bf16.mxu0 %v2728_v39 }
 0x8ca   :  { %2717 = vmatprep.subr.bf16.mxu1 %v2716_v30 }
 0x8cc   :  { %2731 = vmatpush3.bf16.msra.mxu0 %v2728_v39 }
 0x8cd   :  { %2719 = vmatpush3.bf16.msra.mxu1 %v2716_v30 }
 0x98a   :  { %v2530_v43 = vpop.f32.mrb[8].mxu0 }
 0x98b   :  { %v1300_v44 = vadd.f32 %v2530_v43, %v1215_v41  ;;  %v1294_v6 = vpop.f32.mrb[9].mxu0 }
 0x98c   :  { %v1295_v45 = vadd.f32 %v1294_v6, %v1215_v41 }
 0x98d   :  { %v1314_v46 = vmax.f32 %v1300_v44, 0.0 }
 0x98e   :  { %v1313_v49 = vmax.f32 %v1295_v45, 0.0 }
 0x98f   :  { %v1320_v38 = vsel %vm731_vm10, %v1314_v46, 0.0 }
 0x990   :  { %1321 = vadd.xlane.f32.xlu0 %v1320_v38  ;;  %v1317_v50 = vsel %vm731_vm10, %v1313_v49, 0.0 }
 0x991   :  { %1318 = vadd.xlane.f32.xlu1 %v1317_v50 }
 0x99a   :  { %v2533_v52 = vpop.f32.mrb[10].mxu0 }
 0x99b   :  { %v1310_v22 = vadd.f32 %v2533_v52, %v1215_v41  ;;  %v1304_v53 = vpop.f32.mrb[11].mxu0 }
 0x99c   :  { %v1305_v51 = vadd.f32 %v1304_v53, %v1215_v41 }
 0x99d   :  { %v1316_v54 = vmax.f32 %v1310_v22, 0.0  ;;  %v1380_v22 = vrot.slane %v3690_v34, %v3534_v59 }
 0x99e   :  { %v1315_v55 = vmax.f32 %v1305_v51, 0.0 }
 0x99f   :  { %v1326_v56 = vsel %vm731_vm10, %v1316_v54, 0.0 }
 0x9a0   :  { %1327 = vadd.xlane.f32.xlu0 %v1326_v56  ;;  %v1323_v57 = vsel %vm731_vm10, %v1315_v55, 0.0 }
 0x9a1   :  { %1324 = vadd.xlane.f32.xlu1 %v1323_v57 }
 0xa1d   :  { %v1322_v60 = vpop.xlane.xlu0 %1321 }
 0xa1e   :  { %v1330_v62 = vmul.f32 0.015625, %v1322_v60  ;;  %v1319_v0 = vpop.xlane.xlu1 %1318 }
 0xa1f   :  { %v1329_v2 = vmul.f32 0.015625, %v1319_v0 }
 0xa20   :  { %v3698_v42 = vsub.f32 %v1314_v46, %v1330_v62  ;;  %v1372_v46 = vrot.slane %v3690_v34, %v3531_v58 }
 0xa21   :  { %v3700_v3 = vsub.f32 %v1313_v49, %v1329_v2 }
 0xa22   :  { %v1338_v4 = vmul.f32 %v3698_v42, %v3698_v42 }
 0xa23   :  { %v1337_v5 = vmul.f32 %v3700_v3, %v3700_v3 }
 0xa24   :  { %v1344_v61 = vsel %vm731_vm10, %v1338_v4, 0.0 }
 0xa25   :  { %1345 = vadd.xlane.f32.xlu0 %v1344_v61  ;;  %v1341_v9 = vsel %vm731_vm10, %v1337_v5, 0.0 }
 0xa26   :  { %1342 = vadd.xlane.f32.xlu1 %v1341_v9 }
 0xa2d   :  { %v1328_v10 = vpop.xlane.xlu0 %1327 }
 0xa2e   :  { %v1332_v11 = vmul.f32 0.015625, %v1328_v10  ;;  %v1325_v12 = vpop.xlane.xlu1 %1324 }
 0xa2f   :  { %v1331_v14 = vmul.f32 0.015625, %v1325_v12  ;;  %v1400_v12 = vld [vmem:[#allocation16 + $0x38] sm:$0xff] }
 0xa30   :  { %v3708_v47 = vsub.f32 %v1316_v54, %v1332_v11  ;;  %v1399_v11 = vld [vmem:[#allocation16 + $0x30] sm:$0xff] }
 0xa31   :  { %v3710_v16 = vsub.f32 %v1315_v55, %v1331_v14  ;;  %v2732_v14 = vpack.c.bf16 %v1400_v12, %v1399_v11  ;;  %v1685_v11 = vld [vmem:[#allocation17 + $0x20] sm:$0xff]  ;;  %v1686_v12 = vld [vmem:[#allocation17 + $0x28] sm:$0xff] }
 0xa32   :  { %v1340_v48 = vmul.f32 %v3708_v47, %v3708_v47 }
 0xa33   :  { %v1339_v17 = vmul.f32 %v3710_v16, %v3710_v16  ;;  %2733 = vmatprep.subr.bf16.mxu0 %v2732_v14 }
 0xa34   :  { %v1350_v8 = vsel %vm731_vm10, %v1340_v48, 0.0  ;;  %2735 = vmatpush3.bf16.msra.mxu0 %v2732_v14  ;;  %v3733_v48 = vld [vmem:[%s3889_s14] sm:$0xf]  ;;  %v2744_v14 = vpack.c.bf16 %v1686_v12, %v1685_v11 }
 0xa35   :  { %1351 = vadd.xlane.f32.xlu0 %v1350_v8  ;;  %v1347_v1 = vsel %vm731_vm10, %v1339_v17, 0.0  ;;  %v1510_v25 = vrot.slane %v3733_v48, %v3531_v58 }
 0xa36   :  { %1348 = vadd.xlane.f32.xlu1 %v1347_v1 }
 0xab2   :  { %v1346_v40 = vpop.xlane.xlu0 %1345 }
 0xab3   :  { %v1354_v41 = vmul.f32 0.015625, %v1346_v40  ;;  %v1343_v43 = vpop.xlane.xlu1 %1342 }
 0xab4   :  { %v1353_v44 = vmul.f32 0.015625, %v1343_v43 }
 0xab5   :  { %v1358_v6 = vadd.f32 1e-05, %v1354_v41 }
 0xab6   :  { %v1357_v45 = vadd.f32 1e-05, %v1353_v44 }
 0xab7   :  { %2825 = vrsqrt.f32 %v1358_v6 }
 0xab8   :  { %2827 = vrsqrt.f32 %v1357_v45 }
 0xac1   :  { %v2826_v49 = vpop.eup %2825 }
 0xac2   :  { %v2828_v38 = vpop.eup %2827  ;;  %v1366_v50 = vmul.f32 %v2826_v49, %v3698_v42  ;;  %v1352_v52 = vpop.xlane.xlu0 %1351 }
 0xac3   :  { %v1356_v53 = vmul.f32 0.015625, %v1352_v52  ;;  %v1349_v51 = vpop.xlane.xlu1 %1348  ;;  %v1365_v54 = vmul.f32 %v2828_v38, %v3700_v3 }
 0xac4   :  { %v1374_v55 = vmul.f32 %v1372_v46, %v1366_v50  ;;  %v1355_v56 = vmul.f32 0.015625, %v1349_v51 }
 0xac5   :  { %v1360_v57 = vadd.f32 1e-05, %v1356_v53  ;;  %v1373_v60 = vmul.f32 %v1372_v46, %v1365_v54 }
 0xac6   :  { %v1359_v62 = vadd.f32 1e-05, %v1355_v56  ;;  %v1382_v2 = vadd.f32 %v1380_v22, %v1374_v55 }
 0xac7   :  { %2829 = vrsqrt.f32 %v1360_v57  ;;  %v1381_v0 = vadd.f32 %v1380_v22, %v1373_v60 }
 0xac8   :  { %2831 = vrsqrt.f32 %v1359_v62 }
 0xac9   :  { %2550 = vmatprep.mubr.msk.f32.mxu1 %vm731_vm10, %v1381_v0 }
 0xaca   :  { %2551 = vmatmul.mubr.msk.f32.vlgmr.msra.gmra.mrb[8].mxu1 %vm731_vm10, %v1382_v2 }
 0xad1   :  { %v2830_v42 = vpop.eup %2829 }
 0xad2   :  { %v2832_v4 = vpop.eup %2831  ;;  %v1368_v34 = vmul.f32 %v2830_v42, %v3708_v47  ;;  %v1405_v47 = vrot.slane %v3733_v48, %v3508_v7 }
 0xad3   :  { %v1367_v5 = vmul.f32 %v2832_v4, %v3710_v16 }
 0xad4   :  { %v1376_v3 = vmul.f32 %v1372_v46, %v1368_v34  ;;  %v1681_v34 = vld [vmem:[#allocation17] sm:$0xff] }
 0xad5   :  { %v1375_v61 = vmul.f32 %v1372_v46, %v1367_v5  ;;  %v1682_v5 = vld [vmem:[#allocation17 + $0x8] sm:$0xff] }
 0xad6   :  { %v1384_v10 = vadd.f32 %v1380_v22, %v1376_v3  ;;  %v2736_v3 = vpack.c.bf16 %v1682_v5, %v1681_v34 }
 0xad7   :  { %v1383_v9 = vadd.f32 %v1380_v22, %v1375_v61  ;;  %v1683_v61 = vld [vmem:[#allocation17 + $0x10] sm:$0xff] }
 0xad8   :  { %2737 = vmatprep.subr.bf16.mxu1 %v2736_v3 }
 0xad9   :  { %2553 = vmatprep.mubr.msk.f32.mxu1 %vm731_vm10, %v1383_v9  ;;  %2739 = vmatpush3.bf16.msra.mxu1 %v2736_v3 }
 0xada   :  { %2554 = vmatmul.mubr.msk.f32.gmra.mrb[10].mxu1 %vm731_vm10, %v1384_v10 }
 0xb9d   :  { %v2552_v16 = vpop.f32.mrb[8].mxu1 }
 0xb9e   :  { %v1490_v17 = vadd.f32 %v2552_v16, %v1405_v47  ;;  %v1484_v8 = vpop.f32.mrb[9].mxu1  ;;  %v1688_v16 = vld [vmem:[#allocation17 + $0x38] sm:$0xff] }
 0xb9f   :  { %v1485_v1 = vadd.f32 %v1484_v8, %v1405_v47 }
 0xba0   :  { %v1504_v20 = vmax.f32 %v1490_v17, 0.0 }
 0xba1   :  { %v1503_v19 = vmax.f32 %v1485_v1, 0.0 }
 0xba3   :  { %2572 = vmatprep.mubr.msk.f32.mxu0 %vm731_vm10, %v1503_v19 }
 0xba4   :  { %2573 = vmatmul.mubr.msk.f32.vlgmr.msra.gmra.mrb[12].mxu0 %vm731_vm10, %v1504_v20 }
 0xbad   :  { %v2555_v21 = vpop.f32.mrb[10].mxu1 }
 0xbae   :  { %v1500_v13 = vadd.f32 %v2555_v21, %v1405_v47  ;;  %v1494_v15 = vpop.f32.mrb[11].mxu1 }
 0xbaf   :  { %v1495_v23 = vadd.f32 %v1494_v15, %v1405_v47  ;;  %v1687_v47 = vld [vmem:[#allocation17 + $0x30] sm:$0xff]  ;;  %v1667_v15 = vrot.slane %v3733_v48, %v3534_v59 }
 0xbb0   :  { %v1506_v24 = vmax.f32 %v1500_v13, 0.0  ;;  %v2748_v17 = vpack.c.bf16 %v1688_v16, %v1687_v47 }
 0xbb1   :  { %v1505_v18 = vmax.f32 %v1495_v23, 0.0 }
 0xbb3   :  { %2575 = vmatprep.mubr.msk.f32.mxu0 %vm731_vm10, %v1505_v18 }
 0xbb4   :  { %2576 = vmatmul.mubr.msk.f32.gmra.mrb[14].mxu0 %vm731_vm10, %v1506_v24  ;;  %v1675_v24 = vrot.slane %v3733_v48, %v3546_v28 }
 0xc77   :  { %v2574_v27 = vpop.f32.mrb[12].mxu0 }
 0xc78   :  { %v1595_v63 = vadd.f32 %v2574_v27, %v1510_v25  ;;  %v1589_v30 = vpop.f32.mrb[13].mxu0 }
 0xc79   :  { %v1590_v31 = vadd.f32 %v1589_v30, %v1510_v25 }
 0xc7a   :  { %v1609_v32 = vadd.f32 %v1595_v63, %v1382_v2 }
 0xc7b   :  { %v1608_v33 = vadd.f32 %v1590_v31, %v1381_v0 }
 0xc7c   :  { %v1615_v26 = vsel %vm731_vm10, %v1609_v32, 0.0 }
 0xc7d   :  { %1616 = vadd.xlane.f32.xlu0 %v1615_v26  ;;  %v1612_v35 = vsel %vm731_vm10, %v1608_v33, 0.0 }
 0xc7e   :  { %1613 = vadd.xlane.f32.xlu1 %v1612_v35 }
 0xc87   :  { %v2577_v29 = vpop.f32.mrb[14].mxu0 }
 0xc88   :  { %v1605_v36 = vadd.f32 %v2577_v29, %v1510_v25  ;;  %v1599_v37 = vpop.f32.mrb[15].mxu0 }
 0xc89   :  { %v1600_v39 = vadd.f32 %v1599_v37, %v1510_v25 }
 0xc8a   :  { %v1611_v40 = vadd.f32 %v1605_v36, %v1384_v10 }
 0xc8b   :  { %v1610_v41 = vadd.f32 %v1600_v39, %v1383_v9  ;;  %v1684_v9 = vld [vmem:[#allocation17 + $0x18] sm:$0xff] }
 0xc8c   :  { %v1621_v43 = vsel %vm731_vm10, %v1611_v40, 0.0  ;;  %v2740_v10 = vpack.c.bf16 %v1684_v9, %v1683_v61 }
 0xc8d   :  { %1622 = vadd.xlane.f32.xlu0 %v1621_v43  ;;  %v1618_v44 = vsel %vm731_vm10, %v1610_v41, 0.0 }
 0xc8e   :  { %1619 = vadd.xlane.f32.xlu1 %v1618_v44  ;;  %2741 = vmatprep.subr.bf16.mxu1 %v2740_v10 }
 0xc8f   :  { %2743 = vmatpush3.bf16.msra.mxu1 %v2740_v10 }
 0xc90   :  { %2745 = vmatprep.subr.bf16.mxu1 %v2744_v14 }
 0xc93   :  { %2747 = vmatpush3.bf16.msra.mxu1 %v2744_v14 }
 0xc94   :  { %2749 = vmatprep.subr.bf16.mxu1 %v2748_v17 }
 0xc97   :  { %2751 = vmatpush3.bf16.msra.mxu1 %v2748_v17 }
 0xd0a   :  { %v1617_v6 = vpop.xlane.xlu0 %1616 }
 0xd0b   :  { %v1625_v45 = vmul.f32 0.015625, %v1617_v6  ;;  %v1614_v46 = vpop.xlane.xlu1 %1613 }
 0xd0c   :  { %v1624_v49 = vmul.f32 0.015625, %v1614_v46 }
 0xd0d   :  { %v1629_v38 = vsub.f32 %v1609_v32, %v1625_v45  ;;  %v1680_v32 = vld [vmem:[%s3890_s15] sm:$0xf] }
 0xd0e   :  { %v1628_v50 = vsub.f32 %v1608_v33, %v1624_v49  ;;  %v1708_v39 = vrot.slane %v1680_v32, %v3531_v58  ;;  %v1702_v46 = vrot.slane %v1680_v32, %v3508_v7  ;;  %v1787_v3 = vrot.slane %v1680_v32, %v3546_v28 }
 0xd0f   :  { %v1633_v52 = vmul.f32 %v1629_v38, %v1629_v38 }
 0xd10   :  { %v1632_v22 = vmul.f32 %v1628_v50, %v1628_v50 }
 0xd11   :  { %v1639_v53 = vsel %vm731_vm10, %v1633_v52, 0.0 }
 0xd12   :  { %1640 = vadd.xlane.f32.xlu0 %v1639_v53  ;;  %v1636_v51 = vsel %vm731_vm10, %v1632_v22, 0.0 }
 0xd13   :  { %1637 = vadd.xlane.f32.xlu1 %v1636_v51 }
 0xd1a   :  { %v1623_v54 = vpop.xlane.xlu0 %1622 }
 0xd1b   :  { %v1627_v55 = vmul.f32 0.015625, %v1623_v54  ;;  %v1620_v56 = vpop.xlane.xlu1 %1619 }
 0xd1c   :  { %v1626_v57 = vmul.f32 0.015625, %v1620_v56 }
 0xd1d   :  { %v3749_v60 = vsub.f32 %v1611_v40, %v1627_v55 }
 0xd1e   :  { %v3751_v62 = vsub.f32 %v1610_v41, %v1626_v57  ;;  %v1727_v41 = vrot.slane %v1680_v32, %v3534_v59 }
 0xd1f   :  { %v1635_v0 = vmul.f32 %v3749_v60, %v3749_v60 }
 0xd20   :  { %v1634_v2 = vmul.f32 %v3751_v62, %v3751_v62 }
 0xd21   :  { %v1645_v42 = vsel %vm731_vm10, %v1635_v0, 0.0 }
 0xd22   :  { %1646 = vadd.xlane.f32.xlu0 %v1645_v42  ;;  %v1642_v4 = vsel %vm731_vm10, %v1634_v2, 0.0 }
 0xd23   :  { %1643 = vadd.xlane.f32.xlu1 %v1642_v4 }
 0xd9f   :  { %v1641_v8 = vpop.xlane.xlu0 %1640 }
 0xda0   :  { %v1649_v1 = vmul.f32 0.015625, %v1641_v8  ;;  %v1638_v19 = vpop.xlane.xlu1 %1637 }
 0xda1   :  { %v1648_v20 = vmul.f32 0.015625, %v1638_v19 }
 0xda2   :  { %v1653_v21 = vadd.f32 1e-05, %v1649_v1 }
 0xda3   :  { %v1652_v13 = vadd.f32 1e-05, %v1648_v20 }
 0xda4   :  { %2833 = vrsqrt.f32 %v1653_v21 }
 0xda5   :  { %2835 = vrsqrt.f32 %v1652_v13 }
 0xdae   :  { %v2834_v23 = vpop.eup %2833 }
 0xdaf   :  { %v2836_v18 = vpop.eup %2835  ;;  %v1661_v25 = vmul.f32 %v2834_v23, %v1629_v38  ;;  %v1647_v27 = vpop.xlane.xlu0 %1646 }
 0xdb0   :  { %v1660_v63 = vmul.f32 %v2836_v18, %v1628_v50  ;;  %v1651_v30 = vmul.f32 0.015625, %v1647_v27  ;;  %v1644_v31 = vpop.xlane.xlu1 %1643 }
 0xdb1   :  { %v1669_v33 = vmul.f32 %v1667_v15, %v1661_v25  ;;  %v1650_v26 = vmul.f32 0.015625, %v1644_v31 }
 0xdb2   :  { %v1668_v35 = vmul.f32 %v1667_v15, %v1660_v63  ;;  %v1655_v29 = vadd.f32 1e-05, %v1651_v30 }
 0xdb3   :  { %v1677_v36 = vadd.f32 %v1675_v24, %v1669_v33  ;;  %v1654_v37 = vadd.f32 1e-05, %v1650_v26 }
 0xdb4   :  { %v1676_v40 = vadd.f32 %v1675_v24, %v1668_v35  ;;  %2837 = vrsqrt.f32 %v1655_v29 }
 0xdb5   :  { %v1693_v48 = vrot.slane %v1677_v36, 6  ;;  %2839 = vrsqrt.f32 %v1654_v37 }
 0xdb6   :  { %v1692_v43 = vrot.slane %v1676_v40, 6 }
 0xdb7   :  { %v1711_v44 = vmul.f32 %v1708_v39, %v1693_v48  ;;  %v1730_v50 = vmul.f32 %v1727_v41, %v1693_v48 }
 0xdb8   :  { %v1694_v6 = vsel %vm521_vm9, %v1692_v43, %v1693_v48  ;;  %v1698_v45 = vsel %vm521_vm9, 0.0, %v1692_v43 }
 0xdb9   :  { %v1709_v49 = vmul.f32 %v1708_v39, %v1698_v45  ;;  %v1710_v38 = vmul.f32 %v1708_v39, %v1694_v6  ;;  %v1728_v52 = vmul.f32 %v1727_v41, %v1698_v45  ;;  %v1729_v22 = vmul.f32 %v1727_v41, %v1694_v6 }
 0xdba   :  { %v1718_v54 = vrot.slane %v1711_v44, 1  ;;  %v1703_v55 = vmul.f32 %v1702_v46, %v1698_v45  ;;  %v1704_v56 = vmul.f32 %v1702_v46, %v1694_v6  ;;  %v1737_v42 = vrot.slane %v1730_v50, 2 }
 0xdbb   :  { %v1715_v53 = vrot.slane %v1709_v49, 1  ;;  %v1716_v51 = vrot.slane %v1710_v38, 1  ;;  %v1734_v57 = vrot.slane %v1728_v52, 2  ;;  %v1735_v0 = vrot.slane %v1729_v22, 2 }
 0xdbd   :  { %v1717_v2 = vsel %vm241_vm2, %v1715_v53, %v1716_v51  ;;  %v1719_v4 = vsel %vm241_vm2, %v1716_v51, %v1718_v54  ;;  %v1736_v11 = vsel %vm253_vm1, %v1734_v57, %v1735_v0  ;;  %v1738_v12 = vsel %vm253_vm1, %v1735_v0, %v1737_v42 }
 0xdbe   :  { %v2838_v34 = vpop.eup %2837  ;;  %v1722_v5 = vadd.f32 %v1717_v2, %v1703_v55  ;;  %v1723_v61 = vadd.f32 %v1719_v4, %v1704_v56 }
 0xdbf   :  { %v2840_v9 = vpop.eup %2839  ;;  %v1663_v10 = vmul.f32 %v2838_v34, %v3749_v60 }
 0xdc0   :  { %v1662_v14 = vmul.f32 %v2840_v9, %v3751_v62  ;;  %v1741_v47 = vadd.f32 %v1736_v11, %v1722_v5  ;;  %v1742_v16 = vadd.f32 %v1738_v12, %v1723_v61 }
 0xdc1   :  { %v1671_v17 = vmul.f32 %v1667_v15, %v1663_v10 }
 0xdc2   :  { %v1670_v8 = vmul.f32 %v1667_v15, %v1662_v14  ;;  %v1788_v1 = vadd.f32 %v1787_v3, %v1741_v47  ;;  %v1789_v19 = vadd.f32 %v1787_v3, %v1742_v16 }
 0xdc3   :  { %v1679_v20 = vadd.f32 %v1675_v24, %v1671_v17 }
 0xdc4   :  { %v1678_v21 = vadd.f32 %v1675_v24, %v1670_v8  ;;  %v1792_v13 = vmax.f32 %v1788_v1, 0.0  ;;  %v1793_v23 = vmax.f32 %v1789_v19, 0.0 }
 0xdc5   :  { %v1746_v18 = vrot.slane %v1679_v20, 6 }
 0xdc6   :  { %v1745_v25 = vrot.slane %v1678_v21, 6  ;;  %2594 = vmatprep.mubr.msk.f32.mxu1 %vm731_vm10, %v1792_v13 }
 0xdc7   :  { %2595 = vmatmul.mubr.msk.f32.vlgmr.msra.gmra.mrb[12].mxu1 %vm731_vm10, %v1793_v23  ;;  %v1756_v60 = vmul.f32 %v1746_v18, %v1708_v39  ;;  %v1771_v31 = vmul.f32 %v1746_v18, %v1727_v41 }
 0xdc8   :  { %v1747_v27 = vsel %vm521_vm9, %v1745_v25, %v1746_v18  ;;  %v1751_v62 = vsel %vm521_vm9, 0.0, %v1745_v25 }
 0xdc9   :  { %v1754_v63 = vmul.f32 %v1751_v62, %v1708_v39  ;;  %v1755_v30 = vmul.f32 %v1747_v27, %v1708_v39  ;;  %v1769_v15 = vmul.f32 %v1751_v62, %v1727_v41  ;;  %v1770_v32 = vmul.f32 %v1747_v27, %v1727_v41 }
 0xdca   :  { %v1763_v35 = vrot.slane %v1756_v60, 1  ;;  %v1752_v29 = vmul.f32 %v1751_v62, %v1702_v46  ;;  %v1753_v37 = vmul.f32 %v1747_v27, %v1702_v46  ;;  %v1778_v43 = vrot.slane %v1771_v31, 2  ;;  %v3791_v46 = vld [vmem:[%s3892_s17] sm:$0x7] }
 0xdcb   :  { %v1760_v33 = vrot.slane %v1754_v63, 1  ;;  %v1761_v24 = vrot.slane %v1755_v30, 1  ;;  %v1775_v26 = vrot.slane %v1769_v15, 2  ;;  %v1776_v36 = vrot.slane %v1770_v32, 2  ;;  %v1969_v31 = vld [vmem:[#allocation19] sm:$0xff]  ;;  %v1970_v32 = vld [vmem:[#allocation19 + $0x8] sm:$0xff] }
 0xdcc   :  { %v1799_v53 = vrot.slane %v3791_v46, %v3508_v7 }
 0xdcd   :  { %v1762_v40 = vsel %vm241_vm2, %v1760_v33, %v1761_v24  ;;  %v1764_v48 = vsel %vm241_vm2, %v1761_v24, %v1763_v35  ;;  %v1777_v45 = vsel %vm253_vm1, %v1775_v26, %v1776_v36  ;;  %v1779_v39 = vsel %vm253_vm1, %v1776_v36, %v1778_v43  ;;  %v1971_v24 = vld [vmem:[#allocation19 + $0x10] sm:$0xff]  ;;  %v1972_v26 = vld [vmem:[#allocation19 + $0x18] sm:$0xff]  ;;  %v1974_v36 = vld [vmem:[#allocation19 + $0x28] sm:$0xff] }
 0xdce   :  { %v1767_v44 = vadd.f32 %v1762_v40, %v1752_v29  ;;  %v1768_v6 = vadd.f32 %v1764_v48, %v1753_v37  ;;  %v2752_v33 = vpack.c.bf16 %v1970_v32, %v1969_v31  ;;  %v2756_v35 = vpack.c.bf16 %v1972_v26, %v1971_v24  ;;  %v1973_v29 = vld [vmem:[#allocation19 + $0x20] sm:$0xff]  ;;  %v1975_v40 = vld [vmem:[#allocation19 + $0x30] sm:$0xff]  ;;  %v1976_v48 = vld [vmem:[#allocation19 + $0x38] sm:$0xff] }
 0xdcf   :  { %v2760_v37 = vpack.c.bf16 %v1974_v36, %v1973_v29  ;;  %v2764_v43 = vpack.c.bf16 %v1976_v48, %v1975_v40 }
 0xdd0   :  { %v1782_v49 = vadd.f32 %v1777_v45, %v1767_v44  ;;  %v1783_v41 = vadd.f32 %v1779_v39, %v1768_v6  ;;  %2753 = vmatprep.subr.bf16.mxu0 %v2752_v33  ;;  %v1977_v44 = vld [vmem:[#allocation20] sm:$0xff]  ;;  %v1978_v6 = vld [vmem:[#allocation20 + $0x8] sm:$0xff]  ;;  %v1979_v45 = vld [vmem:[#allocation20 + $0x10] sm:$0xff] }
 0xdd1   :  { %2755 = vmatpush3.bf16.msra.mxu0 %v2752_v33  ;;  %v2768_v39 = vpack.c.bf16 %v1978_v6, %v1977_v44 }
 0xdd2   :  { %v1790_v38 = vadd.f32 %v1787_v3, %v1782_v49  ;;  %v1791_v50 = vadd.f32 %v1787_v3, %v1783_v41  ;;  %2757 = vmatprep.subr.bf16.mxu0 %v2756_v35  ;;  %v1980_v49 = vld [vmem:[#allocation20 + $0x18] sm:$0xff] }
 0xdd3   :  { %v2772_v41 = vpack.c.bf16 %v1980_v49, %v1979_v45  ;;  %2769 = vmatprep.subr.bf16.mxu1 %v2768_v39 }
 0xdd4   :  { %v1794_v52 = vmax.f32 %v1790_v38, 0.0  ;;  %v1795_v22 = vmax.f32 %v1791_v50, 0.0  ;;  %v1981_v38 = vld [vmem:[#allocation20 + $0x20] sm:$0xff]  ;;  %v1982_v50 = vld [vmem:[#allocation20 + $0x28] sm:$0xff]  ;;  %2771 = vmatpush3.bf16.msra.mxu1 %v2768_v39 }
 0xdd5   :  { %2759 = vmatpush3.bf16.msra.mxu0 %v2756_v35  ;;  %2773 = vmatprep.subr.bf16.mxu1 %v2772_v41 }
 0xdd6   :  { %2597 = vmatprep.mubr.msk.f32.mxu1 %vm731_vm10, %v1794_v52  ;;  %2761 = vmatprep.subr.bf16.mxu0 %v2760_v37  ;;  %v2776_v52 = vpack.c.bf16 %v1982_v50, %v1981_v38 }
 0xdd7   :  { %2598 = vmatmul.mubr.msk.f32.gmra.mrb[14].mxu1 %vm731_vm10, %v1795_v22 }
 0xdd8   :  { %2775 = vmatpush3.bf16.msra.mxu1 %v2772_v41 }
 0xdd9   :  { %2763 = vmatpush3.bf16.msra.mxu0 %v2760_v37  ;;  %2777 = vmatprep.subr.bf16.mxu1 %v2776_v52 }
 0xdda   :  { %2765 = vmatprep.subr.bf16.mxu0 %v2764_v43 }
 0xddc   :  { %2779 = vmatpush3.bf16.msra.mxu1 %v2776_v52 }
 0xddd   :  { %2767 = vmatpush3.bf16.msra.mxu0 %v2764_v43 }
 0xe9a   :  { %v2596_v51 = vpop.f32.mrb[12].mxu1 }
 0xe9b   :  { %v1884_v54 = vadd.f32 %v2596_v51, %v1799_v53  ;;  %v1878_v55 = vpop.f32.mrb[13].mxu1 }
 0xe9c   :  { %v1879_v56 = vadd.f32 %v1878_v55, %v1799_v53 }
 0xe9d   :  { %v1898_v57 = vmax.f32 %v1884_v54, 0.0 }
 0xe9e   :  { %v1897_v0 = vmax.f32 %v1879_v56, 0.0 }
 0xe9f   :  { %v1904_v2 = vsel %vm731_vm10, %v1898_v57, 0.0 }
 0xea0   :  { %1905 = vadd.xlane.f32.xlu0 %v1904_v2  ;;  %v1901_v42 = vsel %vm731_vm10, %v1897_v0, 0.0 }
 0xea1   :  { %1902 = vadd.xlane.f32.xlu1 %v1901_v42 }
 0xeaa   :  { %v2599_v4 = vpop.f32.mrb[14].mxu1 }
 0xeab   :  { %v1894_v34 = vadd.f32 %v2599_v4, %v1799_v53  ;;  %v1888_v5 = vpop.f32.mrb[15].mxu1 }
 0xeac   :  { %v1889_v3 = vadd.f32 %v1888_v5, %v1799_v53 }
 0xead   :  { %v1900_v61 = vmax.f32 %v1894_v34, 0.0  ;;  %v1964_v34 = vrot.slane %v3791_v46, %v3534_v59 }
 0xeae   :  { %v1899_v9 = vmax.f32 %v1889_v3, 0.0 }
 0xeaf   :  { %v1910_v10 = vsel %vm731_vm10, %v1900_v61, 0.0 }
 0xeb0   :  { %1911 = vadd.xlane.f32.xlu0 %v1910_v10  ;;  %v1907_v11 = vsel %vm731_vm10, %v1899_v9, 0.0 }
 0xeb1   :  { %1908 = vadd.xlane.f32.xlu1 %v1907_v11 }
 0xf2d   :  { %v1906_v12 = vpop.xlane.xlu0 %1905 }
 0xf2e   :  { %v1914_v14 = vmul.f32 0.015625, %v1906_v12  ;;  %v1903_v47 = vpop.xlane.xlu1 %1902 }
 0xf2f   :  { %v1913_v16 = vmul.f32 0.015625, %v1903_v47 }
 0xf30   :  { %v3799_v17 = vsub.f32 %v1898_v57, %v1914_v14  ;;  %v1956_v57 = vrot.slane %v3791_v46, %v3531_v58 }
 0xf31   :  { %v3801_v8 = vsub.f32 %v1897_v0, %v1913_v16 }
 0xf32   :  { %v1922_v1 = vmul.f32 %v3799_v17, %v3799_v17 }
 0xf33   :  { %v1921_v19 = vmul.f32 %v3801_v8, %v3801_v8 }
 0xf34   :  { %v1928_v20 = vsel %vm731_vm10, %v1922_v1, 0.0 }
 0xf35   :  { %1929 = vadd.xlane.f32.xlu0 %v1928_v20  ;;  %v1925_v21 = vsel %vm731_vm10, %v1921_v19, 0.0 }
 0xf36   :  { %1926 = vadd.xlane.f32.xlu1 %v1925_v21 }
 0xf3d   :  { %v1912_v13 = vpop.xlane.xlu0 %1911 }
 0xf3e   :  { %v1916_v23 = vmul.f32 0.015625, %v1912_v13  ;;  %v1909_v18 = vpop.xlane.xlu1 %1908 }
 0xf3f   :  { %v1915_v25 = vmul.f32 0.015625, %v1909_v18  ;;  %v1984_v18 = vld [vmem:[#allocation20 + $0x38] sm:$0xff] }
 0xf40   :  { %v3809_v60 = vsub.f32 %v1900_v61, %v1916_v23  ;;  %v1983_v23 = vld [vmem:[#allocation20 + $0x30] sm:$0xff] }
 0xf41   :  { %v3811_v27 = vsub.f32 %v1899_v9, %v1915_v25  ;;  %v2780_v25 = vpack.c.bf16 %v1984_v18, %v1983_v23 }
 0xf42   :  { %v1924_v62 = vmul.f32 %v3809_v60, %v3809_v60 }
 0xf43   :  { %v1923_v63 = vmul.f32 %v3811_v27, %v3811_v27  ;;  %2781 = vmatprep.subr.bf16.mxu1 %v2780_v25 }
 0xf44   :  { %v1934_v30 = vsel %vm731_vm10, %v1924_v62, 0.0  ;;  %2783 = vmatpush3.bf16.msra.mxu1 %v2780_v25  ;;  %v3834_v62 = vld [vmem:[%s3895_s20] sm:$0xf]  ;;  %s3175_s20 = smov [#allocation22]  }
 0xf45   :  { %1935 = vadd.xlane.f32.xlu0 %v1934_v30  ;;  %v1931_v15 = vsel %vm731_vm10, %v1923_v63, 0.0  ;;  %v2259_v18 = vrot.slane %v3834_v62, %v3546_v28  ;;  %s2274_s4 = sshll.u32 %s3175_s20, 4  ;;  %s2275_s4 = int_to_ptr.vmem [resolvable:$true] %s2274_s4 }
 0xf46   :  { %1932 = vadd.xlane.f32.xlu1 %v1931_v15  ;;  %s3121_s10 = scalar_lea.vmem %s2275_s4, 512  ;;  %p3126_p13 = scmp.lt.s32.totalorder %s2275_s4, %s2275_s4 }
 0xf47   :  { %p3122_p12 = scmp.ne.s32.totalorder %s2275_s4, %s3121_s10  ;;  %p3127_p0 = scmp.lt.s32.totalorder %s3121_s10, %s3121_s10 }
 0xf49   :  { %p3128_p1 = por %p3127_p0, %p3126_p13 }
 0xf4b   :  { %p3129_p2 = pnand %p3128_p1, %p3122_p12 }
 0xfc2   :  { %v1930_v22 = vpop.xlane.xlu0 %1929 }
 0xfc3   :  { %v1938_v53 = vmul.f32 0.015625, %v1930_v22  ;;  %v1927_v51 = vpop.xlane.xlu1 %1926 }
 0xfc4   :  { %v1937_v54 = vmul.f32 0.015625, %v1927_v51 }
 0xfc5   :  { %v1942_v55 = vadd.f32 1e-05, %v1938_v53 }
 0xfc6   :  { %v1941_v56 = vadd.f32 1e-05, %v1937_v54 }
 0xfc7   :  { %2841 = vrsqrt.f32 %v1942_v55 }
 0xfc8   :  { %2843 = vrsqrt.f32 %v1941_v56 }
 0xfd1   :  { %v2842_v0 = vpop.eup %2841 }
 0xfd2   :  { %v2844_v2 = vpop.eup %2843  ;;  %v1950_v42 = vmul.f32 %v2842_v0, %v3799_v17  ;;  %v1936_v4 = vpop.xlane.xlu0 %1935 }
 0xfd3   :  { %v1940_v5 = vmul.f32 0.015625, %v1936_v4  ;;  %v1933_v3 = vpop.xlane.xlu1 %1932  ;;  %v1949_v61 = vmul.f32 %v2844_v2, %v3801_v8 }
 0xfd4   :  { %v1958_v9 = vmul.f32 %v1956_v57, %v1950_v42  ;;  %v1939_v10 = vmul.f32 0.015625, %v1933_v3 }
 0xfd5   :  { %v1944_v11 = vadd.f32 1e-05, %v1940_v5  ;;  %v1957_v12 = vmul.f32 %v1956_v57, %v1949_v61 }
 0xfd6   :  { %v1943_v14 = vadd.f32 1e-05, %v1939_v10  ;;  %v1966_v16 = vadd.f32 %v1964_v34, %v1958_v9 }
 0xfd7   :  { %2845 = vrsqrt.f32 %v1944_v11  ;;  %v1965_v47 = vadd.f32 %v1964_v34, %v1957_v12 }
 0xfd8   :  { %2847 = vrsqrt.f32 %v1943_v14 }
 0xfd9   :  { %2616 = vmatprep.mubr.msk.f32.mxu0 %vm731_vm10, %v1965_v47 }
 0xfda   :  { %2617 = vmatmul.mubr.msk.f32.vlgmr.msra.gmra.mrb[16].mxu0 %vm731_vm10, %v1966_v16 }
 0xfe1   :  { %v2846_v17 = vpop.eup %2845 }
 0xfe2   :  { %v2848_v1 = vpop.eup %2847  ;;  %v1952_v46 = vmul.f32 %v2846_v17, %v3809_v60  ;;  %v1989_v60 = vrot.slane %v3834_v62, %v3508_v7  ;;  %v2094_v7 = vrot.slane %v3834_v62, %v3531_v58 }
 0xfe3   :  { %v1951_v19 = vmul.f32 %v2848_v1, %v3811_v27 }
 0xfe4   :  { %v1960_v8 = vmul.f32 %v1956_v57, %v1952_v46 }
 0xfe5   :  { %v1959_v20 = vmul.f32 %v1956_v57, %v1951_v19 }
 0xfe6   :  { %v1968_v13 = vadd.f32 %v1964_v34, %v1960_v8 }
 0xfe7   :  { %v1967_v21 = vadd.f32 %v1964_v34, %v1959_v20 }
 0xfe9   :  { %2619 = vmatprep.mubr.msk.f32.mxu0 %vm731_vm10, %v1967_v21 }
 0xfea   :  { %2620 = vmatmul.mubr.msk.f32.gmra.mrb[18].mxu0 %vm731_vm10, %v1968_v13 }
0x10ad   :  { %v2618_v27 = vpop.f32.mrb[16].mxu0 }
0x10ae   :  { %v2074_v63 = vadd.f32 %v2618_v27, %v1989_v60  ;;  %v2068_v30 = vpop.f32.mrb[17].mxu0 }
0x10af   :  { %v2069_v15 = vadd.f32 %v2068_v30, %v1989_v60 }
0x10b0   :  { %v2088_v32 = vmax.f32 %v2074_v63, 0.0 }
0x10b1   :  { %v2087_v31 = vmax.f32 %v2069_v15, 0.0 }
0x10b3   :  { %2638 = vmatprep.mubr.msk.f32.mxu1 %vm731_vm10, %v2087_v31 }
0x10b4   :  { %2639 = vmatmul.mubr.msk.f32.vlgmr.msra.gmra.mrb[16].mxu1 %vm731_vm10, %v2088_v32 }
0x10bd   :  { %v2621_v33 = vpop.f32.mrb[18].mxu0 }
0x10be   :  { %v2084_v24 = vadd.f32 %v2621_v33, %v1989_v60  ;;  %v2078_v26 = vpop.f32.mrb[19].mxu0 }
0x10bf   :  { %v2079_v35 = vadd.f32 %v2078_v26, %v1989_v60 }
0x10c0   :  { %v2090_v36 = vmax.f32 %v2084_v24, 0.0 }
0x10c1   :  { %v2089_v29 = vmax.f32 %v2079_v35, 0.0 }
0x10c3   :  { %2641 = vmatprep.mubr.msk.f32.mxu1 %vm731_vm10, %v2089_v29 }
0x10c4   :  { %2642 = vmatmul.mubr.msk.f32.gmra.mrb[18].mxu1 %vm731_vm10, %v2090_v36 }
0x1187   :  { %v2640_v37 = vpop.f32.mrb[16].mxu1 }
0x1188   :  { %v2179_v40 = vadd.f32 %v2640_v37, %v2094_v7  ;;  %v2173_v48 = vpop.f32.mrb[17].mxu1 }
0x1189   :  { %v2174_v43 = vadd.f32 %v2173_v48, %v2094_v7 }
0x118a   :  { %v2193_v44 = vadd.f32 %v2179_v40, %v1966_v16 }
0x118b   :  { %v2192_v6 = vadd.f32 %v2174_v43, %v1965_v47 }
0x118c   :  { %v2199_v45 = vsel %vm731_vm10, %v2193_v44, 0.0 }
0x118d   :  { %2200 = vadd.xlane.f32.xlu0 %v2199_v45  ;;  %v2196_v39 = vsel %vm731_vm10, %v2192_v6, 0.0 }
0x118e   :  { %2197 = vadd.xlane.f32.xlu1 %v2196_v39 }
0x1197   :  { %v2643_v49 = vpop.f32.mrb[18].mxu1 }
0x1198   :  { %v2189_v41 = vadd.f32 %v2643_v49, %v2094_v7  ;;  %v2183_v38 = vpop.f32.mrb[19].mxu1 }
0x1199   :  { %v2184_v50 = vadd.f32 %v2183_v38, %v2094_v7 }
0x119a   :  { %v2195_v52 = vadd.f32 %v2189_v41, %v1968_v13 }
0x119b   :  { %v2194_v22 = vadd.f32 %v2184_v50, %v1967_v21  ;;  %v2251_v21 = vrot.slane %v3834_v62, %v3534_v59 }
0x119c   :  { %v2205_v58 = vsel %vm731_vm10, %v2195_v52, 0.0 }
0x119d   :  { %2206 = vadd.xlane.f32.xlu0 %v2205_v58  ;;  %v2202_v53 = vsel %vm731_vm10, %v2194_v22, 0.0 }
0x119e   :  { %2203 = vadd.xlane.f32.xlu1 %v2202_v53 }
0x121a   :  { %v2201_v51 = vpop.xlane.xlu0 %2200 }
0x121b   :  { %v2209_v54 = vmul.f32 0.015625, %v2201_v51  ;;  %v2198_v55 = vpop.xlane.xlu1 %2197 }
0x121c   :  { %v2208_v56 = vmul.f32 0.015625, %v2198_v55 }
0x121d   :  { %v2213_v57 = vsub.f32 %v2193_v44, %v2209_v54 }
0x121e   :  { %v2212_v0 = vsub.f32 %v2192_v6, %v2208_v56 }
0x121f   :  { %v2217_v2 = vmul.f32 %v2213_v57, %v2213_v57 }
0x1220   :  { %v2216_v42 = vmul.f32 %v2212_v0, %v2212_v0 }
0x1221   :  { %v2223_v4 = vsel %vm731_vm10, %v2217_v2, 0.0 }
0x1222   :  { %2224 = vadd.xlane.f32.xlu0 %v2223_v4  ;;  %v2220_v34 = vsel %vm731_vm10, %v2216_v42, 0.0 }
0x1223   :  { %2221 = vadd.xlane.f32.xlu1 %v2220_v34 }
0x122a   :  { %v2207_v5 = vpop.xlane.xlu0 %2206 }
0x122b   :  { %v2211_v3 = vmul.f32 0.015625, %v2207_v5  ;;  %v2204_v61 = vpop.xlane.xlu1 %2203 }
0x122c   :  { %v2210_v9 = vmul.f32 0.015625, %v2204_v61 }
0x122d   :  { %v2215_v10 = vsub.f32 %v2195_v52, %v2211_v3 }
0x122e   :  { %v2214_v11 = vsub.f32 %v2194_v22, %v2210_v9 }
0x122f   :  { %v2219_v12 = vmul.f32 %v2215_v10, %v2215_v10 }
0x1230   :  { %v2218_v14 = vmul.f32 %v2214_v11, %v2214_v11 }
0x1231   :  { %v2229_v47 = vsel %vm731_vm10, %v2219_v12, 0.0 }
0x1232   :  { %2230 = vadd.xlane.f32.xlu0 %v2229_v47  ;;  %v2226_v16 = vsel %vm731_vm10, %v2218_v14, 0.0 }
0x1233   :  { %2227 = vadd.xlane.f32.xlu1 %v2226_v16 }
0x12af   :  { %v2225_v17 = vpop.xlane.xlu0 %2224 }
0x12b0   :  { %v2233_v1 = vmul.f32 0.015625, %v2225_v17  ;;  %v2222_v46 = vpop.xlane.xlu1 %2221 }
0x12b1   :  { %v2232_v19 = vmul.f32 0.015625, %v2222_v46 }
0x12b2   :  { %v2237_v8 = vadd.f32 1e-05, %v2233_v1 }
0x12b3   :  { %v2236_v20 = vadd.f32 1e-05, %v2232_v19 }
0x12b4   :  { %2849 = vrsqrt.f32 %v2237_v8 }
0x12b5   :  { %2851 = vrsqrt.f32 %v2236_v20 }
0x12be   :  { %v2850_v13 = vpop.eup %2849 }
0x12bf   :  { %v2852_v23 = vpop.eup %2851  ;;  %v2245_v25 = vmul.f32 %v2850_v13, %v2213_v57  ;;  %v2231_v60 = vpop.xlane.xlu0 %2230 }
0x12c0   :  { %v2244_v27 = vmul.f32 %v2852_v23, %v2212_v0  ;;  %v2235_v63 = vmul.f32 0.015625, %v2231_v60  ;;  %v2228_v30 = vpop.xlane.xlu1 %2227 }
0x12c1   :  { %v2253_v15 = vmul.f32 %v2251_v21, %v2245_v25  ;;  %v2234_v31 = vmul.f32 0.015625, %v2228_v30 }
0x12c2   :  { %v2252_v32 = vmul.f32 %v2251_v21, %v2244_v27  ;;  %v2239_v33 = vadd.f32 1e-05, %v2235_v63 }
0x12c3   :  { %v2238_v24 = vadd.f32 1e-05, %v2234_v31  ;;  %v2261_v26 = vadd.f32 %v2259_v18, %v2253_v15 }
0x12c4   :  { %2853 = vrsqrt.f32 %v2239_v33  ;;  %v2260_v35 = vadd.f32 %v2259_v18, %v2252_v32 }
0x12c5   :  { %2855 = vrsqrt.f32 %v2238_v24  ;;  %2265 = vst.msk [vmem:[#allocation22 + $0x8] sm:$0xff] %vm731_vm10, %v2261_v26 }
0x12c6   :  { %2264 = vst.msk [vmem:[#allocation22] sm:$0xff] %vm731_vm10, %v2260_v35 }
0x12ce   :  { %v2854_v59 = vpop.eup %2853 }
0x12cf   :  { %v2856_v28 = vpop.eup %2855  ;;  %v2247_v62 = vmul.f32 %v2854_v59, %v2215_v10 }
0x12d0   :  { %v2246_v29 = vmul.f32 %v2856_v28, %v2214_v11 }
0x12d1   :  { %v2255_v36 = vmul.f32 %v2251_v21, %v2247_v62 }
0x12d2   :  { %v2254_v7 = vmul.f32 %v2251_v21, %v2246_v29 }
0x12d3   :  { %v2263_v37 = vadd.f32 %v2259_v18, %v2255_v36 }
0x12d4   :  { %v2262_v40 = vadd.f32 %v2259_v18, %v2254_v7 }
0x12d5   :  { %2268 = vst.msk [vmem:[#allocation22 + $0x18] sm:$0xff] %vm731_vm10, %v2263_v37 }
0x12d6   :  { %2267 = vst.msk [vmem:[#allocation22 + $0x10] sm:$0xff] %vm731_vm10, %v2262_v40 }
0x12d7   :  { %3132 = shalt.err (!%p3129_p2)
}
0x12d8   :  { %s3917_s6 = sld [smem:[#allocation37_spill]] }
0x12de   :  { %s3133_s24 = scalar_lea.hbm %s3917_s6, 512 }
0x12df   :  { %p3134_p3 = scmp.ne.s32.totalorder %s3917_s6, %s3133_s24  ;;  %p3137_p4 = scmp.lt.u32.totalorder %s3133_s24, %s3917_s6 }
0x12e1   :  { %p3139_p5 = pnand %p3137_p4, %p3134_p3 }
0x12e3   :  { %3142 = shalt.err (!%p3139_p5)
}
0x12e4   :  { %2280 = dma.vmem_to_hbm [thread:$0]  %s2275_s4, 512, %s3917_s6, [#allocation4], %s3162_s3, %s3162_s3, %s3163_s22  }
0x12e5   :  { %3157 = dma.done.wait [#allocation4], 512  }
0x12e6   :  { %3158 = vsyncadd [#allocation4], 4294966784 }
0x12e7   :  { %2284 = vsyncpa [#allocation3], 1 }
0x12e8   :  { %2285 = vsyncpa [#allocation6], 1 }
0x12e9   :  { %2286 = vsyncpa [#allocation9], 1 }
0x12ea   :  { %2287 = vsyncpa [#allocation12], 1 }
0x12eb   :  { %2288 = vsyncpa [#allocation15], 1 }
0x12ec   :  { %2289 = vsyncpa [#allocation18], 1 }
0x12ed   :  { %2290 = vsyncpa [#allocation21], 1 }
0x12ee   :  { %2291 = vsyncpa [#allocation4], 1 }

</bundles_post_ra>
